<compile_context>
chip_gen: v5e
topology: v5e:2x2
jax: 0.10.0
libtpu: 0.0.40
codegen_flags: <defaults>
</compile_context>

<pallas_src>
import functools

import jax
import jax.numpy as jnp
from jax.experimental import pallas as pl
from jax.experimental.pallas import tpu as pltpu

_LANE_BLOCK = 128  # lane sub-tile width: one f32 (8, 128) vreg per tile


def _choose_chunks_per_block(n_chunks, max_chunks_per_block=4):
    """How many 128-lane chunks one grid block covers.

    Prefer an even number of grid blocks (the batch axis is 'parallel', so a
    v7x megacore shards it across its two TensorCores; an even count keeps the
    split balanced), then the largest block (fewest grid steps -> least
    per-step pipeline overhead).  Only divisors of n_chunks are considered so
    no padding beyond the 128-lane round-up is ever needed.
    """
    best = (False, 1)
    for cpb in range(1, min(max_chunks_per_block, n_chunks) + 1):
        if n_chunks % cpb:
            continue
        blocks = n_chunks // cpb
        balanced = (blocks % 2 == 0) or (n_chunks == 1)
        best = max(best, (balanced, cpb))
    return best[1]


def _make_kernel(n, f_in, mid, f_out, residual, chunks):
    lb = _LANE_BLOCK

    def kernel(x_ref, w1_ref, w2_ref, w3_ref, b2_ref, b3_ref, out_ref):
        def weight_apply(w_ref, feats, out_dim, in_dim):
            # out[o] = sum_c w[o, c] * feats[c].  w[o, c] are SMEM scalars, so
            # every term is a scalar x lane-dense (n, 128) multiply on the VPU;
            # results stay as a Python list of tiles (no jnp.stack copies).
            outs = []
            for o in range(out_dim):
                acc = w_ref[o, 0] * feats[0]
                for cc in range(1, in_dim):
                    acc = acc + w_ref[o, cc] * feats[cc]
                outs.append(acc)
            return outs

        def adj_contract(get_row, num_ch, adj_tiles):
            # out[c][m, b] = sum_k row(c, k)[b] * adj_tiles[k][m, b]
            # Fully unrolled over k (<= 8): plain multiply-accumulate into an
            # (n, 128) accumulator -- no (c, m, k, b) outer-product temporary
            # and no cross-sublane reduction, so nothing spills and the
            # contraction never touches the XLU.
            outs = []
            for cc in range(num_ch):
                acc = None
                for k, ak in enumerate(adj_tiles):
                    term = get_row(cc, k) * ak       # (1,128) bcast * (n,128)
                    acc = term if acc is None else acc + term
                outs.append(acc)
            return outs

        # 128-lane sub-tiles keep the live set small while the BlockSpec block
        # stays large for DMA amortization.
        for j in range(chunks):
            lanes = slice(j * lb, (j + 1) * lb)

            # adjacency tiles adj[k][m, b] = A_b[k, m]; kept in registers.
            adj = [x_ref[k, :, lanes] for k in range(n)]

            # ---- GraphConvolution 1 (no bias): x1 = W1 . (nf . A) ---------
            # (adjacency contraction first: only f_in channels contract, and
            #  the feature rows are read straight from the input ref)
            z1 = adj_contract(
                lambda f, k: x_ref[n + f, k:k + 1, lanes], f_in, adj)
            x1 = [jnp.clip(t, 0.0, 6.0)                    # ReLU6 (features)
                  for t in weight_apply(w1_ref, z1, mid, f_in)]

            # ReLU6 also clips the adjacency rows of the concatenated tensor;
            # the clipped adjacency is both an output and the operand of the
            # remaining two graph convolutions.
            adj_c = [jnp.clip(a, 0.0, 6.0) for a in adj]
            for k in range(n):
                out_ref[k, :, lanes] = adj_c[k].astype(out_ref.dtype)

            # ---- GraphConvolution 2 (+bias): x2 = W2 . (x1 . Ac) + b2 -----
            z2 = adj_contract(lambda c, k: x1[c][k:k + 1, :], mid, adj_c)
            x2 = [t + b2_ref[o, :, :]
                  for o, t in enumerate(weight_apply(w2_ref, z2, mid, mid))]

            # ---- GraphConvolution 3 (+bias): x3 = (W3 . x2) . Ac + b3 -----
            # (weight first so only f_out channels go through the contraction)
            x2w = weight_apply(w3_ref, x2, f_out, mid)
            z3 = adj_contract(lambda p, k: x2w[p][k:k + 1, :], f_out, adj_c)
            for p in range(f_out):
                r = z3[p] + b3_ref[p, :, :]
                if residual:                               # f_in == f_out
                    r = r + x_ref[n + p, :, lanes]
                out_ref[n + p, :, lanes] = r.astype(out_ref.dtype)

    return kernel


def inverted_graph_convolution(inp, w1, w2, w3, b2, b3, *, node_num,
                               input_feature_num, output_feature_num):
    """inp: (batch, node_num + input_feature_num, node_num) float32."""
    b, c, n = inp.shape
    assert n == node_num and c == node_num + input_feature_num
    mid = w1.shape[0]
    f_in, f_out = input_feature_num, output_feature_num
    residual = (f_in == f_out)
    lb = _LANE_BLOCK

    # ---- batch blocking: the lane extent is always a multiple of 128 -------
    n_chunks = -(-b // lb)
    bp = n_chunks * lb
    cpb = _choose_chunks_per_block(n_chunks)
    tb = cpb * lb
    grid = (n_chunks // cpb,)

    x = inp
    if bp != b:
        x = jnp.concatenate(
            [x, jnp.zeros((bp - b, c, n), dtype=inp.dtype)], axis=0)

    # Single packed, lane-dense input slab (channel, node, batch): one
    # transpose in, one transpose out, no output concatenation.
    x_t = jnp.transpose(x, (1, 2, 0))

    # Biases pre-broadcast to the 128-lane sub-tile width (resident in VMEM via
    # a constant index map) -> the bias add is a plain lane-aligned VALU add.
    b2t = jnp.broadcast_to(b2[:, :, None], (mid, n, lb)).astype(inp.dtype)
    b3t = jnp.broadcast_to(b3[:, :, None], (f_out, n, lb)).astype(inp.dtype)

    kernel = _make_kernel(n, f_in, mid, f_out, residual, cpb)
    smem = pl.BlockSpec(memory_space=pltpu.MemorySpace.SMEM)

    flops_per_batch = (2 * n * n * (f_in + mid + f_out)
                       + 2 * n * (mid * f_in + mid * mid + f_out * mid))
    bytes_accessed = 4 * (x_t.size + (n + f_out) * n * bp + w1.size + w2.size
                          + w3.size + b2t.size + b3t.size)

    out_t = pl.pallas_call(
        kernel,
        out_shape=jax.ShapeDtypeStruct((n + f_out, n, bp), inp.dtype),
        grid_spec=pltpu.PrefetchScalarGridSpec(
            num_scalar_prefetch=0,
            grid=grid,
            in_specs=[
                pl.BlockSpec((c, n, tb), lambda i: (0, 0, i)),      # input slab
                smem, smem, smem,                                   # w1, w2, w3
                pl.BlockSpec((mid, n, lb), lambda i: (0, 0, 0)),    # b2 tiles
                pl.BlockSpec((f_out, n, lb), lambda i: (0, 0, 0)),  # b3 tiles
            ],
            out_specs=pl.BlockSpec((n + f_out, n, tb), lambda i: (0, 0, i)),
        ),
        compiler_params=pltpu.CompilerParams(
            dimension_semantics=("parallel",)),
        cost_estimate=pl.CostEstimate(flops=b * flops_per_batch,
                                      transcendentals=0,
                                      bytes_accessed=int(bytes_accessed)),
    )(x_t, w1, w2, w3, b2t, b3t)

    # Layout plumbing back to (batch, node_num + f_out, node_num).
    return jnp.transpose(out_t, (2, 0, 1))[:b]


def _reference(inp, w1, w2, w3, b2, b3, *, node_num, input_feature_num,
               output_feature_num):
    n = node_num
    adj, nf = inp[:, :n, :], inp[:, n:, :]

    def gc(adj, feat, w, bias):
        x = jnp.einsum('oi,bin->bon', w, feat)
        x = jnp.einsum('bon,bnm->bom', x, adj)
        if bias is not None:
            x = x + bias[None]
        return jnp.concatenate([adj, x], axis=1)

    x = gc(adj, nf, w1, None)
    x = jnp.clip(x, 0.0, 6.0)
    x = gc(x[:, :n, :], x[:, n:, :], w2, b2)
    x = gc(x[:, :n, :], x[:, n:, :], w3, b3)
    if input_feature_num == output_feature_num:
        x = x.at[:, n:, :].add(inp[:, n:, :])
    return x


if __name__ == "__main__":
    node_num = 8
    in_feat = 4
    mid_feat = 8
    out_feat = 4            # == in_feat -> residual path exercised

    key = jax.random.PRNGKey(0)
    k_inp, k_w1, k_w2, k_w3, k_b2, k_b3, k_big = jax.random.split(key, 7)

    # Deterministic synthetic parameters (the torch module uses torch.empty,
    # i.e. uninitialized weights, so any fixed values are equally faithful).
    w1 = 0.1 * jax.random.normal(k_w1, (mid_feat, in_feat), dtype=jnp.float32)
    w2 = 0.1 * jax.random.normal(k_w2, (mid_feat, mid_feat), dtype=jnp.float32)
    w3 = 0.1 * jax.random.normal(k_w3, (out_feat, mid_feat), dtype=jnp.float32)
    b2 = 0.1 * jax.random.normal(k_b2, (mid_feat, node_num), dtype=jnp.float32)
    b3 = 0.1 * jax.random.normal(k_b3, (out_feat, node_num), dtype=jnp.float32)

    run = functools.partial(
        inverted_graph_convolution, node_num=node_num,
        input_feature_num=in_feat, output_feature_num=out_feat)
    ref = functools.partial(
        _reference, node_num=node_num,
        input_feature_num=in_feat, output_feature_num=out_feat)

    # Small batch: single 128-lane chunk, exercises the batch-padding path.
    batch = 4
    inp = jax.random.normal(k_inp, (batch, node_num + in_feat, node_num),
                            dtype=jnp.float32)
    out = jax.block_until_ready(run(inp, w1, w2, w3, b2, b3))
    assert out.shape == (batch, node_num + out_feat, node_num)
    assert jnp.allclose(out, ref(inp, w1, w2, w3, b2, b3), atol=1e-4, rtol=1e-4)

    # Larger batch: multi-block 'parallel' grid (4 x 384-lane blocks), padding,
    # and the in-kernel 128-lane sub-tiling path.
    big_batch = 1500
    inp_big = jax.random.normal(k_big, (big_batch, node_num + in_feat, node_num),
                                dtype=jnp.float32)
    out_big = jax.block_until_ready(run(inp_big, w1, w2, w3, b2, b3))
    assert out_big.shape == (big_batch, node_num + out_feat, node_num)
    assert jnp.allclose(out_big, ref(inp_big, w1, w2, w3, b2, b3),
                        atol=1e-4, rtol=1e-4)

    print("KERNEL_OK")
</pallas_src>

<mosaic_0001>
module attributes {stable_mosaic.version = 11 : i64} {
  func.func @kernel(%arg0: i32, %arg1: memref<12x8x128xf32, #tpu.memory_space<vmem>>, %arg2: memref<8x4xf32, #tpu.memory_space<smem>>, %arg3: memref<8x8xf32, #tpu.memory_space<smem>>, %arg4: memref<4x8xf32, #tpu.memory_space<smem>>, %arg5: memref<8x8x128xf32, #tpu.memory_space<vmem>>, %arg6: memref<4x8x128xf32, #tpu.memory_space<vmem>>, %arg7: memref<12x8x128xf32, #tpu.memory_space<vmem>>) attributes {dimension_semantics = [#tpu.dimension_semantics<parallel>], iteration_bounds = array<i64: 1>, scalar_prefetch = 0 : i64, scratch_operands = 0 : i64, tpu.core_type = #tpu.core_type<tc>, window_params = [{transform_indices = @transform_0, window_bounds = array<i64: 12, 8, 128>}, {transform_indices = @transform_1, window_bounds = array<i64: 8, 4>}, {transform_indices = @transform_2, window_bounds = array<i64: 8, 8>}, {transform_indices = @transform_3, window_bounds = array<i64: 4, 8>}, {pipeline_mode = #tpu.pipeline_mode<synchronous>, transform_indices = @transform_4, window_bounds = array<i64: 8, 8, 128>}, {pipeline_mode = #tpu.pipeline_mode<synchronous>, transform_indices = @transform_5, window_bounds = array<i64: 4, 8, 128>}, {transform_indices = @transform_6, window_bounds = array<i64: 12, 8, 128>}]} {
    %c0 = arith.constant 0 : index
    %c0_0 = arith.constant 0 : index
    %c0_1 = arith.constant 0 : index
    %0 = vector.load %arg1[%c0, %c0_0, %c0_1] : memref<12x8x128xf32, #tpu.memory_space<vmem>>, vector<1x8x128xf32>
    %1 = vector.shape_cast %0 : vector<1x8x128xf32> to vector<8x128xf32>
    %c1 = arith.constant 1 : index
    %c0_2 = arith.constant 0 : index
    %c0_3 = arith.constant 0 : index
    %2 = vector.load %arg1[%c1, %c0_2, %c0_3] : memref<12x8x128xf32, #tpu.memory_space<vmem>>, vector<1x8x128xf32>
    %3 = vector.shape_cast %2 : vector<1x8x128xf32> to vector<8x128xf32>
    %c2 = arith.constant 2 : index
    %c0_4 = arith.constant 0 : index
    %c0_5 = arith.constant 0 : index
    %4 = vector.load %arg1[%c2, %c0_4, %c0_5] : memref<12x8x128xf32, #tpu.memory_space<vmem>>, vector<1x8x128xf32>
    %5 = vector.shape_cast %4 : vector<1x8x128xf32> to vector<8x128xf32>
    %c3 = arith.constant 3 : index
    %c0_6 = arith.constant 0 : index
    %c0_7 = arith.constant 0 : index
    %6 = vector.load %arg1[%c3, %c0_6, %c0_7] : memref<12x8x128xf32, #tpu.memory_space<vmem>>, vector<1x8x128xf32>
    %7 = vector.shape_cast %6 : vector<1x8x128xf32> to vector<8x128xf32>
    %c4 = arith.constant 4 : index
    %c0_8 = arith.constant 0 : index
    %c0_9 = arith.constant 0 : index
    %8 = vector.load %arg1[%c4, %c0_8, %c0_9] : memref<12x8x128xf32, #tpu.memory_space<vmem>>, vector<1x8x128xf32>
    %9 = vector.shape_cast %8 : vector<1x8x128xf32> to vector<8x128xf32>
    %c5 = arith.constant 5 : index
    %c0_10 = arith.constant 0 : index
    %c0_11 = arith.constant 0 : index
    %10 = vector.load %arg1[%c5, %c0_10, %c0_11] : memref<12x8x128xf32, #tpu.memory_space<vmem>>, vector<1x8x128xf32>
    %11 = vector.shape_cast %10 : vector<1x8x128xf32> to vector<8x128xf32>
    %c6 = arith.constant 6 : index
    %c0_12 = arith.constant 0 : index
    %c0_13 = arith.constant 0 : index
    %12 = vector.load %arg1[%c6, %c0_12, %c0_13] : memref<12x8x128xf32, #tpu.memory_space<vmem>>, vector<1x8x128xf32>
    %13 = vector.shape_cast %12 : vector<1x8x128xf32> to vector<8x128xf32>
    %c7 = arith.constant 7 : index
    %c0_14 = arith.constant 0 : index
    %c0_15 = arith.constant 0 : index
    %14 = vector.load %arg1[%c7, %c0_14, %c0_15] : memref<12x8x128xf32, #tpu.memory_space<vmem>>, vector<1x8x128xf32>
    %15 = vector.shape_cast %14 : vector<1x8x128xf32> to vector<8x128xf32>
    %c8 = arith.constant 8 : index
    %c0_16 = arith.constant 0 : index
    %c0_17 = arith.constant 0 : index
    %16 = vector.load %arg1[%c8, %c0_16, %c0_17] : memref<12x8x128xf32, #tpu.memory_space<vmem>>, vector<1x1x128xf32>
    %17 = vector.shape_cast %16 : vector<1x1x128xf32> to vector<1x128xf32>
    %18 = vector.broadcast %17 : vector<1x128xf32> to vector<8x128xf32>
    %19 = arith.mulf %18, %1 : vector<8x128xf32>
    %c8_18 = arith.constant 8 : index
    %c1_19 = arith.constant 1 : index
    %c0_20 = arith.constant 0 : index
    %20 = vector.load %arg1[%c8_18, %c1_19, %c0_20] : memref<12x8x128xf32, #tpu.memory_space<vmem>>, vector<1x1x128xf32>
    %21 = vector.shape_cast %20 : vector<1x1x128xf32> to vector<1x128xf32>
    %22 = vector.broadcast %21 : vector<1x128xf32> to vector<8x128xf32>
    %23 = arith.mulf %22, %3 : vector<8x128xf32>
    %24 = arith.addf %19, %23 : vector<8x128xf32>
    %c8_21 = arith.constant 8 : index
    %c2_22 = arith.constant 2 : index
    %c0_23 = arith.constant 0 : index
    %25 = vector.load %arg1[%c8_21, %c2_22, %c0_23] : memref<12x8x128xf32, #tpu.memory_space<vmem>>, vector<1x1x128xf32>
    %26 = vector.shape_cast %25 : vector<1x1x128xf32> to vector<1x128xf32>
    %27 = vector.broadcast %26 : vector<1x128xf32> to vector<8x128xf32>
    %28 = arith.mulf %27, %5 : vector<8x128xf32>
    %29 = arith.addf %24, %28 : vector<8x128xf32>
    %c8_24 = arith.constant 8 : index
    %c3_25 = arith.constant 3 : index
    %c0_26 = arith.constant 0 : index
    %30 = vector.load %arg1[%c8_24, %c3_25, %c0_26] : memref<12x8x128xf32, #tpu.memory_space<vmem>>, vector<1x1x128xf32>
    %31 = vector.shape_cast %30 : vector<1x1x128xf32> to vector<1x128xf32>
    %32 = vector.broadcast %31 : vector<1x128xf32> to vector<8x128xf32>
    %33 = arith.mulf %32, %7 : vector<8x128xf32>
    %34 = arith.addf %29, %33 : vector<8x128xf32>
    %c8_27 = arith.constant 8 : index
    %c4_28 = arith.constant 4 : index
    %c0_29 = arith.constant 0 : index
    %35 = vector.load %arg1[%c8_27, %c4_28, %c0_29] : memref<12x8x128xf32, #tpu.memory_space<vmem>>, vector<1x1x128xf32>
    %36 = vector.shape_cast %35 : vector<1x1x128xf32> to vector<1x128xf32>
    %37 = vector.broadcast %36 : vector<1x128xf32> to vector<8x128xf32>
    %38 = arith.mulf %37, %9 : vector<8x128xf32>
    %39 = arith.addf %34, %38 : vector<8x128xf32>
    %c8_30 = arith.constant 8 : index
    %c5_31 = arith.constant 5 : index
    %c0_32 = arith.constant 0 : index
    %40 = vector.load %arg1[%c8_30, %c5_31, %c0_32] : memref<12x8x128xf32, #tpu.memory_space<vmem>>, vector<1x1x128xf32>
    %41 = vector.shape_cast %40 : vector<1x1x128xf32> to vector<1x128xf32>
    %42 = vector.broadcast %41 : vector<1x128xf32> to vector<8x128xf32>
    %43 = arith.mulf %42, %11 : vector<8x128xf32>
    %44 = arith.addf %39, %43 : vector<8x128xf32>
    %c8_33 = arith.constant 8 : index
    %c6_34 = arith.constant 6 : index
    %c0_35 = arith.constant 0 : index
    %45 = vector.load %arg1[%c8_33, %c6_34, %c0_35] : memref<12x8x128xf32, #tpu.memory_space<vmem>>, vector<1x1x128xf32>
    %46 = vector.shape_cast %45 : vector<1x1x128xf32> to vector<1x128xf32>
    %47 = vector.broadcast %46 : vector<1x128xf32> to vector<8x128xf32>
    %48 = arith.mulf %47, %13 : vector<8x128xf32>
    %49 = arith.addf %44, %48 : vector<8x128xf32>
    %c8_36 = arith.constant 8 : index
    %c7_37 = arith.constant 7 : index
    %c0_38 = arith.constant 0 : index
    %50 = vector.load %arg1[%c8_36, %c7_37, %c0_38] : memref<12x8x128xf32, #tpu.memory_space<vmem>>, vector<1x1x128xf32>
    %51 = vector.shape_cast %50 : vector<1x1x128xf32> to vector<1x128xf32>
    %52 = vector.broadcast %51 : vector<1x128xf32> to vector<8x128xf32>
    %53 = arith.mulf %52, %15 : vector<8x128xf32>
    %54 = arith.addf %49, %53 : vector<8x128xf32>
    %c9 = arith.constant 9 : index
    %c0_39 = arith.constant 0 : index
    %c0_40 = arith.constant 0 : index
    %55 = vector.load %arg1[%c9, %c0_39, %c0_40] : memref<12x8x128xf32, #tpu.memory_space<vmem>>, vector<1x1x128xf32>
    %56 = vector.shape_cast %55 : vector<1x1x128xf32> to vector<1x128xf32>
    %57 = vector.broadcast %56 : vector<1x128xf32> to vector<8x128xf32>
    %58 = arith.mulf %57, %1 : vector<8x128xf32>
    %c9_41 = arith.constant 9 : index
    %c1_42 = arith.constant 1 : index
    %c0_43 = arith.constant 0 : index
    %59 = vector.load %arg1[%c9_41, %c1_42, %c0_43] : memref<12x8x128xf32, #tpu.memory_space<vmem>>, vector<1x1x128xf32>
    %60 = vector.shape_cast %59 : vector<1x1x128xf32> to vector<1x128xf32>
    %61 = vector.broadcast %60 : vector<1x128xf32> to vector<8x128xf32>
    %62 = arith.mulf %61, %3 : vector<8x128xf32>
    %63 = arith.addf %58, %62 : vector<8x128xf32>
    %c9_44 = arith.constant 9 : index
    %c2_45 = arith.constant 2 : index
    %c0_46 = arith.constant 0 : index
    %64 = vector.load %arg1[%c9_44, %c2_45, %c0_46] : memref<12x8x128xf32, #tpu.memory_space<vmem>>, vector<1x1x128xf32>
    %65 = vector.shape_cast %64 : vector<1x1x128xf32> to vector<1x128xf32>
    %66 = vector.broadcast %65 : vector<1x128xf32> to vector<8x128xf32>
    %67 = arith.mulf %66, %5 : vector<8x128xf32>
    %68 = arith.addf %63, %67 : vector<8x128xf32>
    %c9_47 = arith.constant 9 : index
    %c3_48 = arith.constant 3 : index
    %c0_49 = arith.constant 0 : index
    %69 = vector.load %arg1[%c9_47, %c3_48, %c0_49] : memref<12x8x128xf32, #tpu.memory_space<vmem>>, vector<1x1x128xf32>
    %70 = vector.shape_cast %69 : vector<1x1x128xf32> to vector<1x128xf32>
    %71 = vector.broadcast %70 : vector<1x128xf32> to vector<8x128xf32>
    %72 = arith.mulf %71, %7 : vector<8x128xf32>
    %73 = arith.addf %68, %72 : vector<8x128xf32>
    %c9_50 = arith.constant 9 : index
    %c4_51 = arith.constant 4 : index
    %c0_52 = arith.constant 0 : index
    %74 = vector.load %arg1[%c9_50, %c4_51, %c0_52] : memref<12x8x128xf32, #tpu.memory_space<vmem>>, vector<1x1x128xf32>
    %75 = vector.shape_cast %74 : vector<1x1x128xf32> to vector<1x128xf32>
    %76 = vector.broadcast %75 : vector<1x128xf32> to vector<8x128xf32>
    %77 = arith.mulf %76, %9 : vector<8x128xf32>
    %78 = arith.addf %73, %77 : vector<8x128xf32>
    %c9_53 = arith.constant 9 : index
    %c5_54 = arith.constant 5 : index
    %c0_55 = arith.constant 0 : index
    %79 = vector.load %arg1[%c9_53, %c5_54, %c0_55] : memref<12x8x128xf32, #tpu.memory_space<vmem>>, vector<1x1x128xf32>
    %80 = vector.shape_cast %79 : vector<1x1x128xf32> to vector<1x128xf32>
    %81 = vector.broadcast %80 : vector<1x128xf32> to vector<8x128xf32>
    %82 = arith.mulf %81, %11 : vector<8x128xf32>
    %83 = arith.addf %78, %82 : vector<8x128xf32>
    %c9_56 = arith.constant 9 : index
    %c6_57 = arith.constant 6 : index
    %c0_58 = arith.constant 0 : index
    %84 = vector.load %arg1[%c9_56, %c6_57, %c0_58] : memref<12x8x128xf32, #tpu.memory_space<vmem>>, vector<1x1x128xf32>
    %85 = vector.shape_cast %84 : vector<1x1x128xf32> to vector<1x128xf32>
    %86 = vector.broadcast %85 : vector<1x128xf32> to vector<8x128xf32>
    %87 = arith.mulf %86, %13 : vector<8x128xf32>
    %88 = arith.addf %83, %87 : vector<8x128xf32>
    %c9_59 = arith.constant 9 : index
    %c7_60 = arith.constant 7 : index
    %c0_61 = arith.constant 0 : index
    %89 = vector.load %arg1[%c9_59, %c7_60, %c0_61] : memref<12x8x128xf32, #tpu.memory_space<vmem>>, vector<1x1x128xf32>
    %90 = vector.shape_cast %89 : vector<1x1x128xf32> to vector<1x128xf32>
    %91 = vector.broadcast %90 : vector<1x128xf32> to vector<8x128xf32>
    %92 = arith.mulf %91, %15 : vector<8x128xf32>
    %93 = arith.addf %88, %92 : vector<8x128xf32>
    %c10 = arith.constant 10 : index
    %c0_62 = arith.constant 0 : index
    %c0_63 = arith.constant 0 : index
    %94 = vector.load %arg1[%c10, %c0_62, %c0_63] : memref<12x8x128xf32, #tpu.memory_space<vmem>>, vector<1x1x128xf32>
    %95 = vector.shape_cast %94 : vector<1x1x128xf32> to vector<1x128xf32>
    %96 = vector.broadcast %95 : vector<1x128xf32> to vector<8x128xf32>
    %97 = arith.mulf %96, %1 : vector<8x128xf32>
    %c10_64 = arith.constant 10 : index
    %c1_65 = arith.constant 1 : index
    %c0_66 = arith.constant 0 : index
    %98 = vector.load %arg1[%c10_64, %c1_65, %c0_66] : memref<12x8x128xf32, #tpu.memory_space<vmem>>, vector<1x1x128xf32>
    %99 = vector.shape_cast %98 : vector<1x1x128xf32> to vector<1x128xf32>
    %100 = vector.broadcast %99 : vector<1x128xf32> to vector<8x128xf32>
    %101 = arith.mulf %100, %3 : vector<8x128xf32>
    %102 = arith.addf %97, %101 : vector<8x128xf32>
    %c10_67 = arith.constant 10 : index
    %c2_68 = arith.constant 2 : index
    %c0_69 = arith.constant 0 : index
    %103 = vector.load %arg1[%c10_67, %c2_68, %c0_69] : memref<12x8x128xf32, #tpu.memory_space<vmem>>, vector<1x1x128xf32>
    %104 = vector.shape_cast %103 : vector<1x1x128xf32> to vector<1x128xf32>
    %105 = vector.broadcast %104 : vector<1x128xf32> to vector<8x128xf32>
    %106 = arith.mulf %105, %5 : vector<8x128xf32>
    %107 = arith.addf %102, %106 : vector<8x128xf32>
    %c10_70 = arith.constant 10 : index
    %c3_71 = arith.constant 3 : index
    %c0_72 = arith.constant 0 : index
    %108 = vector.load %arg1[%c10_70, %c3_71, %c0_72] : memref<12x8x128xf32, #tpu.memory_space<vmem>>, vector<1x1x128xf32>
    %109 = vector.shape_cast %108 : vector<1x1x128xf32> to vector<1x128xf32>
    %110 = vector.broadcast %109 : vector<1x128xf32> to vector<8x128xf32>
    %111 = arith.mulf %110, %7 : vector<8x128xf32>
    %112 = arith.addf %107, %111 : vector<8x128xf32>
    %c10_73 = arith.constant 10 : index
    %c4_74 = arith.constant 4 : index
    %c0_75 = arith.constant 0 : index
    %113 = vector.load %arg1[%c10_73, %c4_74, %c0_75] : memref<12x8x128xf32, #tpu.memory_space<vmem>>, vector<1x1x128xf32>
    %114 = vector.shape_cast %113 : vector<1x1x128xf32> to vector<1x128xf32>
    %115 = vector.broadcast %114 : vector<1x128xf32> to vector<8x128xf32>
    %116 = arith.mulf %115, %9 : vector<8x128xf32>
    %117 = arith.addf %112, %116 : vector<8x128xf32>
    %c10_76 = arith.constant 10 : index
    %c5_77 = arith.constant 5 : index
    %c0_78 = arith.constant 0 : index
    %118 = vector.load %arg1[%c10_76, %c5_77, %c0_78] : memref<12x8x128xf32, #tpu.memory_space<vmem>>, vector<1x1x128xf32>
    %119 = vector.shape_cast %118 : vector<1x1x128xf32> to vector<1x128xf32>
    %120 = vector.broadcast %119 : vector<1x128xf32> to vector<8x128xf32>
    %121 = arith.mulf %120, %11 : vector<8x128xf32>
    %122 = arith.addf %117, %121 : vector<8x128xf32>
    %c10_79 = arith.constant 10 : index
    %c6_80 = arith.constant 6 : index
    %c0_81 = arith.constant 0 : index
    %123 = vector.load %arg1[%c10_79, %c6_80, %c0_81] : memref<12x8x128xf32, #tpu.memory_space<vmem>>, vector<1x1x128xf32>
    %124 = vector.shape_cast %123 : vector<1x1x128xf32> to vector<1x128xf32>
    %125 = vector.broadcast %124 : vector<1x128xf32> to vector<8x128xf32>
    %126 = arith.mulf %125, %13 : vector<8x128xf32>
    %127 = arith.addf %122, %126 : vector<8x128xf32>
    %c10_82 = arith.constant 10 : index
    %c7_83 = arith.constant 7 : index
    %c0_84 = arith.constant 0 : index
    %128 = vector.load %arg1[%c10_82, %c7_83, %c0_84] : memref<12x8x128xf32, #tpu.memory_space<vmem>>, vector<1x1x128xf32>
    %129 = vector.shape_cast %128 : vector<1x1x128xf32> to vector<1x128xf32>
    %130 = vector.broadcast %129 : vector<1x128xf32> to vector<8x128xf32>
    %131 = arith.mulf %130, %15 : vector<8x128xf32>
    %132 = arith.addf %127, %131 : vector<8x128xf32>
    %c11 = arith.constant 11 : index
    %c0_85 = arith.constant 0 : index
    %c0_86 = arith.constant 0 : index
    %133 = vector.load %arg1[%c11, %c0_85, %c0_86] : memref<12x8x128xf32, #tpu.memory_space<vmem>>, vector<1x1x128xf32>
    %134 = vector.shape_cast %133 : vector<1x1x128xf32> to vector<1x128xf32>
    %135 = vector.broadcast %134 : vector<1x128xf32> to vector<8x128xf32>
    %136 = arith.mulf %135, %1 : vector<8x128xf32>
    %c11_87 = arith.constant 11 : index
    %c1_88 = arith.constant 1 : index
    %c0_89 = arith.constant 0 : index
    %137 = vector.load %arg1[%c11_87, %c1_88, %c0_89] : memref<12x8x128xf32, #tpu.memory_space<vmem>>, vector<1x1x128xf32>
    %138 = vector.shape_cast %137 : vector<1x1x128xf32> to vector<1x128xf32>
    %139 = vector.broadcast %138 : vector<1x128xf32> to vector<8x128xf32>
    %140 = arith.mulf %139, %3 : vector<8x128xf32>
    %141 = arith.addf %136, %140 : vector<8x128xf32>
    %c11_90 = arith.constant 11 : index
    %c2_91 = arith.constant 2 : index
    %c0_92 = arith.constant 0 : index
    %142 = vector.load %arg1[%c11_90, %c2_91, %c0_92] : memref<12x8x128xf32, #tpu.memory_space<vmem>>, vector<1x1x128xf32>
    %143 = vector.shape_cast %142 : vector<1x1x128xf32> to vector<1x128xf32>
    %144 = vector.broadcast %143 : vector<1x128xf32> to vector<8x128xf32>
    %145 = arith.mulf %144, %5 : vector<8x128xf32>
    %146 = arith.addf %141, %145 : vector<8x128xf32>
    %c11_93 = arith.constant 11 : index
    %c3_94 = arith.constant 3 : index
    %c0_95 = arith.constant 0 : index
    %147 = vector.load %arg1[%c11_93, %c3_94, %c0_95] : memref<12x8x128xf32, #tpu.memory_space<vmem>>, vector<1x1x128xf32>
    %148 = vector.shape_cast %147 : vector<1x1x128xf32> to vector<1x128xf32>
    %149 = vector.broadcast %148 : vector<1x128xf32> to vector<8x128xf32>
    %150 = arith.mulf %149, %7 : vector<8x128xf32>
    %151 = arith.addf %146, %150 : vector<8x128xf32>
    %c11_96 = arith.constant 11 : index
    %c4_97 = arith.constant 4 : index
    %c0_98 = arith.constant 0 : index
    %152 = vector.load %arg1[%c11_96, %c4_97, %c0_98] : memref<12x8x128xf32, #tpu.memory_space<vmem>>, vector<1x1x128xf32>
    %153 = vector.shape_cast %152 : vector<1x1x128xf32> to vector<1x128xf32>
    %154 = vector.broadcast %153 : vector<1x128xf32> to vector<8x128xf32>
    %155 = arith.mulf %154, %9 : vector<8x128xf32>
    %156 = arith.addf %151, %155 : vector<8x128xf32>
    %c11_99 = arith.constant 11 : index
    %c5_100 = arith.constant 5 : index
    %c0_101 = arith.constant 0 : index
    %157 = vector.load %arg1[%c11_99, %c5_100, %c0_101] : memref<12x8x128xf32, #tpu.memory_space<vmem>>, vector<1x1x128xf32>
    %158 = vector.shape_cast %157 : vector<1x1x128xf32> to vector<1x128xf32>
    %159 = vector.broadcast %158 : vector<1x128xf32> to vector<8x128xf32>
    %160 = arith.mulf %159, %11 : vector<8x128xf32>
    %161 = arith.addf %156, %160 : vector<8x128xf32>
    %c11_102 = arith.constant 11 : index
    %c6_103 = arith.constant 6 : index
    %c0_104 = arith.constant 0 : index
    %162 = vector.load %arg1[%c11_102, %c6_103, %c0_104] : memref<12x8x128xf32, #tpu.memory_space<vmem>>, vector<1x1x128xf32>
    %163 = vector.shape_cast %162 : vector<1x1x128xf32> to vector<1x128xf32>
    %164 = vector.broadcast %163 : vector<1x128xf32> to vector<8x128xf32>
    %165 = arith.mulf %164, %13 : vector<8x128xf32>
    %166 = arith.addf %161, %165 : vector<8x128xf32>
    %c11_105 = arith.constant 11 : index
    %c7_106 = arith.constant 7 : index
    %c0_107 = arith.constant 0 : index
    %167 = vector.load %arg1[%c11_105, %c7_106, %c0_107] : memref<12x8x128xf32, #tpu.memory_space<vmem>>, vector<1x1x128xf32>
    %168 = vector.shape_cast %167 : vector<1x1x128xf32> to vector<1x128xf32>
    %169 = vector.broadcast %168 : vector<1x128xf32> to vector<8x128xf32>
    %170 = arith.mulf %169, %15 : vector<8x128xf32>
    %171 = arith.addf %166, %170 : vector<8x128xf32>
    %c0_108 = arith.constant 0 : index
    %c0_109 = arith.constant 0 : index
    %172 = memref.load %arg2[%c0_108, %c0_109] : memref<8x4xf32, #tpu.memory_space<smem>>
    %173 = vector.broadcast %172 : f32 to vector<8x128xf32>
    %174 = arith.mulf %173, %54 : vector<8x128xf32>
    %c0_110 = arith.constant 0 : index
    %c1_111 = arith.constant 1 : index
    %175 = memref.load %arg2[%c0_110, %c1_111] : memref<8x4xf32, #tpu.memory_space<smem>>
    %176 = vector.broadcast %175 : f32 to vector<8x128xf32>
    %177 = arith.mulf %176, %93 : vector<8x128xf32>
    %178 = arith.addf %174, %177 : vector<8x128xf32>
    %c0_112 = arith.constant 0 : index
    %c2_113 = arith.constant 2 : index
    %179 = memref.load %arg2[%c0_112, %c2_113] : memref<8x4xf32, #tpu.memory_space<smem>>
    %180 = vector.broadcast %179 : f32 to vector<8x128xf32>
    %181 = arith.mulf %180, %132 : vector<8x128xf32>
    %182 = arith.addf %178, %181 : vector<8x128xf32>
    %c0_114 = arith.constant 0 : index
    %c3_115 = arith.constant 3 : index
    %183 = memref.load %arg2[%c0_114, %c3_115] : memref<8x4xf32, #tpu.memory_space<smem>>
    %184 = vector.broadcast %183 : f32 to vector<8x128xf32>
    %185 = arith.mulf %184, %171 : vector<8x128xf32>
    %186 = arith.addf %182, %185 : vector<8x128xf32>
    %c1_116 = arith.constant 1 : index
    %c0_117 = arith.constant 0 : index
    %187 = memref.load %arg2[%c1_116, %c0_117] : memref<8x4xf32, #tpu.memory_space<smem>>
    %188 = vector.broadcast %187 : f32 to vector<8x128xf32>
    %189 = arith.mulf %188, %54 : vector<8x128xf32>
    %c1_118 = arith.constant 1 : index
    %c1_119 = arith.constant 1 : index
    %190 = memref.load %arg2[%c1_118, %c1_119] : memref<8x4xf32, #tpu.memory_space<smem>>
    %191 = vector.broadcast %190 : f32 to vector<8x128xf32>
    %192 = arith.mulf %191, %93 : vector<8x128xf32>
    %193 = arith.addf %189, %192 : vector<8x128xf32>
    %c1_120 = arith.constant 1 : index
    %c2_121 = arith.constant 2 : index
    %194 = memref.load %arg2[%c1_120, %c2_121] : memref<8x4xf32, #tpu.memory_space<smem>>
    %195 = vector.broadcast %194 : f32 to vector<8x128xf32>
    %196 = arith.mulf %195, %132 : vector<8x128xf32>
    %197 = arith.addf %193, %196 : vector<8x128xf32>
    %c1_122 = arith.constant 1 : index
    %c3_123 = arith.constant 3 : index
    %198 = memref.load %arg2[%c1_122, %c3_123] : memref<8x4xf32, #tpu.memory_space<smem>>
    %199 = vector.broadcast %198 : f32 to vector<8x128xf32>
    %200 = arith.mulf %199, %171 : vector<8x128xf32>
    %201 = arith.addf %197, %200 : vector<8x128xf32>
    %c2_124 = arith.constant 2 : index
    %c0_125 = arith.constant 0 : index
    %202 = memref.load %arg2[%c2_124, %c0_125] : memref<8x4xf32, #tpu.memory_space<smem>>
    %203 = vector.broadcast %202 : f32 to vector<8x128xf32>
    %204 = arith.mulf %203, %54 : vector<8x128xf32>
    %c2_126 = arith.constant 2 : index
    %c1_127 = arith.constant 1 : index
    %205 = memref.load %arg2[%c2_126, %c1_127] : memref<8x4xf32, #tpu.memory_space<smem>>
    %206 = vector.broadcast %205 : f32 to vector<8x128xf32>
    %207 = arith.mulf %206, %93 : vector<8x128xf32>
    %208 = arith.addf %204, %207 : vector<8x128xf32>
    %c2_128 = arith.constant 2 : index
    %c2_129 = arith.constant 2 : index
    %209 = memref.load %arg2[%c2_128, %c2_129] : memref<8x4xf32, #tpu.memory_space<smem>>
    %210 = vector.broadcast %209 : f32 to vector<8x128xf32>
    %211 = arith.mulf %210, %132 : vector<8x128xf32>
    %212 = arith.addf %208, %211 : vector<8x128xf32>
    %c2_130 = arith.constant 2 : index
    %c3_131 = arith.constant 3 : index
    %213 = memref.load %arg2[%c2_130, %c3_131] : memref<8x4xf32, #tpu.memory_space<smem>>
    %214 = vector.broadcast %213 : f32 to vector<8x128xf32>
    %215 = arith.mulf %214, %171 : vector<8x128xf32>
    %216 = arith.addf %212, %215 : vector<8x128xf32>
    %c3_132 = arith.constant 3 : index
    %c0_133 = arith.constant 0 : index
    %217 = memref.load %arg2[%c3_132, %c0_133] : memref<8x4xf32, #tpu.memory_space<smem>>
    %218 = vector.broadcast %217 : f32 to vector<8x128xf32>
    %219 = arith.mulf %218, %54 : vector<8x128xf32>
    %c3_134 = arith.constant 3 : index
    %c1_135 = arith.constant 1 : index
    %220 = memref.load %arg2[%c3_134, %c1_135] : memref<8x4xf32, #tpu.memory_space<smem>>
    %221 = vector.broadcast %220 : f32 to vector<8x128xf32>
    %222 = arith.mulf %221, %93 : vector<8x128xf32>
    %223 = arith.addf %219, %222 : vector<8x128xf32>
    %c3_136 = arith.constant 3 : index
    %c2_137 = arith.constant 2 : index
    %224 = memref.load %arg2[%c3_136, %c2_137] : memref<8x4xf32, #tpu.memory_space<smem>>
    %225 = vector.broadcast %224 : f32 to vector<8x128xf32>
    %226 = arith.mulf %225, %132 : vector<8x128xf32>
    %227 = arith.addf %223, %226 : vector<8x128xf32>
    %c3_138 = arith.constant 3 : index
    %c3_139 = arith.constant 3 : index
    %228 = memref.load %arg2[%c3_138, %c3_139] : memref<8x4xf32, #tpu.memory_space<smem>>
    %229 = vector.broadcast %228 : f32 to vector<8x128xf32>
    %230 = arith.mulf %229, %171 : vector<8x128xf32>
    %231 = arith.addf %227, %230 : vector<8x128xf32>
    %c4_140 = arith.constant 4 : index
    %c0_141 = arith.constant 0 : index
    %232 = memref.load %arg2[%c4_140, %c0_141] : memref<8x4xf32, #tpu.memory_space<smem>>
    %233 = vector.broadcast %232 : f32 to vector<8x128xf32>
    %234 = arith.mulf %233, %54 : vector<8x128xf32>
    %c4_142 = arith.constant 4 : index
    %c1_143 = arith.constant 1 : index
    %235 = memref.load %arg2[%c4_142, %c1_143] : memref<8x4xf32, #tpu.memory_space<smem>>
    %236 = vector.broadcast %235 : f32 to vector<8x128xf32>
    %237 = arith.mulf %236, %93 : vector<8x128xf32>
    %238 = arith.addf %234, %237 : vector<8x128xf32>
    %c4_144 = arith.constant 4 : index
    %c2_145 = arith.constant 2 : index
    %239 = memref.load %arg2[%c4_144, %c2_145] : memref<8x4xf32, #tpu.memory_space<smem>>
    %240 = vector.broadcast %239 : f32 to vector<8x128xf32>
    %241 = arith.mulf %240, %132 : vector<8x128xf32>
    %242 = arith.addf %238, %241 : vector<8x128xf32>
    %c4_146 = arith.constant 4 : index
    %c3_147 = arith.constant 3 : index
    %243 = memref.load %arg2[%c4_146, %c3_147] : memref<8x4xf32, #tpu.memory_space<smem>>
    %244 = vector.broadcast %243 : f32 to vector<8x128xf32>
    %245 = arith.mulf %244, %171 : vector<8x128xf32>
    %246 = arith.addf %242, %245 : vector<8x128xf32>
    %c5_148 = arith.constant 5 : index
    %c0_149 = arith.constant 0 : index
    %247 = memref.load %arg2[%c5_148, %c0_149] : memref<8x4xf32, #tpu.memory_space<smem>>
    %248 = vector.broadcast %247 : f32 to vector<8x128xf32>
    %249 = arith.mulf %248, %54 : vector<8x128xf32>
    %c5_150 = arith.constant 5 : index
    %c1_151 = arith.constant 1 : index
    %250 = memref.load %arg2[%c5_150, %c1_151] : memref<8x4xf32, #tpu.memory_space<smem>>
    %251 = vector.broadcast %250 : f32 to vector<8x128xf32>
    %252 = arith.mulf %251, %93 : vector<8x128xf32>
    %253 = arith.addf %249, %252 : vector<8x128xf32>
    %c5_152 = arith.constant 5 : index
    %c2_153 = arith.constant 2 : index
    %254 = memref.load %arg2[%c5_152, %c2_153] : memref<8x4xf32, #tpu.memory_space<smem>>
    %255 = vector.broadcast %254 : f32 to vector<8x128xf32>
    %256 = arith.mulf %255, %132 : vector<8x128xf32>
    %257 = arith.addf %253, %256 : vector<8x128xf32>
    %c5_154 = arith.constant 5 : index
    %c3_155 = arith.constant 3 : index
    %258 = memref.load %arg2[%c5_154, %c3_155] : memref<8x4xf32, #tpu.memory_space<smem>>
    %259 = vector.broadcast %258 : f32 to vector<8x128xf32>
    %260 = arith.mulf %259, %171 : vector<8x128xf32>
    %261 = arith.addf %257, %260 : vector<8x128xf32>
    %c6_156 = arith.constant 6 : index
    %c0_157 = arith.constant 0 : index
    %262 = memref.load %arg2[%c6_156, %c0_157] : memref<8x4xf32, #tpu.memory_space<smem>>
    %263 = vector.broadcast %262 : f32 to vector<8x128xf32>
    %264 = arith.mulf %263, %54 : vector<8x128xf32>
    %c6_158 = arith.constant 6 : index
    %c1_159 = arith.constant 1 : index
    %265 = memref.load %arg2[%c6_158, %c1_159] : memref<8x4xf32, #tpu.memory_space<smem>>
    %266 = vector.broadcast %265 : f32 to vector<8x128xf32>
    %267 = arith.mulf %266, %93 : vector<8x128xf32>
    %268 = arith.addf %264, %267 : vector<8x128xf32>
    %c6_160 = arith.constant 6 : index
    %c2_161 = arith.constant 2 : index
    %269 = memref.load %arg2[%c6_160, %c2_161] : memref<8x4xf32, #tpu.memory_space<smem>>
    %270 = vector.broadcast %269 : f32 to vector<8x128xf32>
    %271 = arith.mulf %270, %132 : vector<8x128xf32>
    %272 = arith.addf %268, %271 : vector<8x128xf32>
    %c6_162 = arith.constant 6 : index
    %c3_163 = arith.constant 3 : index
    %273 = memref.load %arg2[%c6_162, %c3_163] : memref<8x4xf32, #tpu.memory_space<smem>>
    %274 = vector.broadcast %273 : f32 to vector<8x128xf32>
    %275 = arith.mulf %274, %171 : vector<8x128xf32>
    %276 = arith.addf %272, %275 : vector<8x128xf32>
    %c7_164 = arith.constant 7 : index
    %c0_165 = arith.constant 0 : index
    %277 = memref.load %arg2[%c7_164, %c0_165] : memref<8x4xf32, #tpu.memory_space<smem>>
    %278 = vector.broadcast %277 : f32 to vector<8x128xf32>
    %279 = arith.mulf %278, %54 : vector<8x128xf32>
    %c7_166 = arith.constant 7 : index
    %c1_167 = arith.constant 1 : index
    %280 = memref.load %arg2[%c7_166, %c1_167] : memref<8x4xf32, #tpu.memory_space<smem>>
    %281 = vector.broadcast %280 : f32 to vector<8x128xf32>
    %282 = arith.mulf %281, %93 : vector<8x128xf32>
    %283 = arith.addf %279, %282 : vector<8x128xf32>
    %c7_168 = arith.constant 7 : index
    %c2_169 = arith.constant 2 : index
    %284 = memref.load %arg2[%c7_168, %c2_169] : memref<8x4xf32, #tpu.memory_space<smem>>
    %285 = vector.broadcast %284 : f32 to vector<8x128xf32>
    %286 = arith.mulf %285, %132 : vector<8x128xf32>
    %287 = arith.addf %283, %286 : vector<8x128xf32>
    %c7_170 = arith.constant 7 : index
    %c3_171 = arith.constant 3 : index
    %288 = memref.load %arg2[%c7_170, %c3_171] : memref<8x4xf32, #tpu.memory_space<smem>>
    %289 = vector.broadcast %288 : f32 to vector<8x128xf32>
    %290 = arith.mulf %289, %171 : vector<8x128xf32>
    %291 = arith.addf %287, %290 : vector<8x128xf32>
    %cst = arith.constant 0.000000e+00 : f32
    %cst_172 = arith.constant 6.000000e+00 : f32
    %292 = vector.broadcast %cst : f32 to vector<8x128xf32>
    %293 = arith.maximumf %292, %186 : vector<8x128xf32>
    %294 = vector.broadcast %cst_172 : f32 to vector<8x128xf32>
    %295 = arith.minimumf %294, %293 : vector<8x128xf32>
    %cst_173 = arith.constant 0.000000e+00 : f32
    %cst_174 = arith.constant 6.000000e+00 : f32
    %296 = vector.broadcast %cst_173 : f32 to vector<8x128xf32>
    %297 = arith.maximumf %296, %201 : vector<8x128xf32>
    %298 = vector.broadcast %cst_174 : f32 to vector<8x128xf32>
    %299 = arith.minimumf %298, %297 : vector<8x128xf32>
    %cst_175 = arith.constant 0.000000e+00 : f32
    %cst_176 = arith.constant 6.000000e+00 : f32
    %300 = vector.broadcast %cst_175 : f32 to vector<8x128xf32>
    %301 = arith.maximumf %300, %216 : vector<8x128xf32>
    %302 = vector.broadcast %cst_176 : f32 to vector<8x128xf32>
    %303 = arith.minimumf %302, %301 : vector<8x128xf32>
    %cst_177 = arith.constant 0.000000e+00 : f32
    %cst_178 = arith.constant 6.000000e+00 : f32
    %304 = vector.broadcast %cst_177 : f32 to vector<8x128xf32>
    %305 = arith.maximumf %304, %231 : vector<8x128xf32>
    %306 = vector.broadcast %cst_178 : f32 to vector<8x128xf32>
    %307 = arith.minimumf %306, %305 : vector<8x128xf32>
    %cst_179 = arith.constant 0.000000e+00 : f32
    %cst_180 = arith.constant 6.000000e+00 : f32
    %308 = vector.broadcast %cst_179 : f32 to vector<8x128xf32>
    %309 = arith.maximumf %308, %246 : vector<8x128xf32>
    %310 = vector.broadcast %cst_180 : f32 to vector<8x128xf32>
    %311 = arith.minimumf %310, %309 : vector<8x128xf32>
    %cst_181 = arith.constant 0.000000e+00 : f32
    %cst_182 = arith.constant 6.000000e+00 : f32
    %312 = vector.broadcast %cst_181 : f32 to vector<8x128xf32>
    %313 = arith.maximumf %312, %261 : vector<8x128xf32>
    %314 = vector.broadcast %cst_182 : f32 to vector<8x128xf32>
    %315 = arith.minimumf %314, %313 : vector<8x128xf32>
    %cst_183 = arith.constant 0.000000e+00 : f32
    %cst_184 = arith.constant 6.000000e+00 : f32
    %316 = vector.broadcast %cst_183 : f32 to vector<8x128xf32>
    %317 = arith.maximumf %316, %276 : vector<8x128xf32>
    %318 = vector.broadcast %cst_184 : f32 to vector<8x128xf32>
    %319 = arith.minimumf %318, %317 : vector<8x128xf32>
    %cst_185 = arith.constant 0.000000e+00 : f32
    %cst_186 = arith.constant 6.000000e+00 : f32
    %320 = vector.broadcast %cst_185 : f32 to vector<8x128xf32>
    %321 = arith.maximumf %320, %291 : vector<8x128xf32>
    %322 = vector.broadcast %cst_186 : f32 to vector<8x128xf32>
    %323 = arith.minimumf %322, %321 : vector<8x128xf32>
    %cst_187 = arith.constant 0.000000e+00 : f32
    %cst_188 = arith.constant 6.000000e+00 : f32
    %324 = vector.broadcast %cst_187 : f32 to vector<8x128xf32>
    %325 = arith.maximumf %324, %1 : vector<8x128xf32>
    %326 = vector.broadcast %cst_188 : f32 to vector<8x128xf32>
    %327 = arith.minimumf %326, %325 : vector<8x128xf32>
    %cst_189 = arith.constant 0.000000e+00 : f32
    %cst_190 = arith.constant 6.000000e+00 : f32
    %328 = vector.broadcast %cst_189 : f32 to vector<8x128xf32>
    %329 = arith.maximumf %328, %3 : vector<8x128xf32>
    %330 = vector.broadcast %cst_190 : f32 to vector<8x128xf32>
    %331 = arith.minimumf %330, %329 : vector<8x128xf32>
    %cst_191 = arith.constant 0.000000e+00 : f32
    %cst_192 = arith.constant 6.000000e+00 : f32
    %332 = vector.broadcast %cst_191 : f32 to vector<8x128xf32>
    %333 = arith.maximumf %332, %5 : vector<8x128xf32>
    %334 = vector.broadcast %cst_192 : f32 to vector<8x128xf32>
    %335 = arith.minimumf %334, %333 : vector<8x128xf32>
    %cst_193 = arith.constant 0.000000e+00 : f32
    %cst_194 = arith.constant 6.000000e+00 : f32
    %336 = vector.broadcast %cst_193 : f32 to vector<8x128xf32>
    %337 = arith.maximumf %336, %7 : vector<8x128xf32>
    %338 = vector.broadcast %cst_194 : f32 to vector<8x128xf32>
    %339 = arith.minimumf %338, %337 : vector<8x128xf32>
    %cst_195 = arith.constant 0.000000e+00 : f32
    %cst_196 = arith.constant 6.000000e+00 : f32
    %340 = vector.broadcast %cst_195 : f32 to vector<8x128xf32>
    %341 = arith.maximumf %340, %9 : vector<8x128xf32>
    %342 = vector.broadcast %cst_196 : f32 to vector<8x128xf32>
    %343 = arith.minimumf %342, %341 : vector<8x128xf32>
    %cst_197 = arith.constant 0.000000e+00 : f32
    %cst_198 = arith.constant 6.000000e+00 : f32
    %344 = vector.broadcast %cst_197 : f32 to vector<8x128xf32>
    %345 = arith.maximumf %344, %11 : vector<8x128xf32>
    %346 = vector.broadcast %cst_198 : f32 to vector<8x128xf32>
    %347 = arith.minimumf %346, %345 : vector<8x128xf32>
    %cst_199 = arith.constant 0.000000e+00 : f32
    %cst_200 = arith.constant 6.000000e+00 : f32
    %348 = vector.broadcast %cst_199 : f32 to vector<8x128xf32>
    %349 = arith.maximumf %348, %13 : vector<8x128xf32>
    %350 = vector.broadcast %cst_200 : f32 to vector<8x128xf32>
    %351 = arith.minimumf %350, %349 : vector<8x128xf32>
    %cst_201 = arith.constant 0.000000e+00 : f32
    %cst_202 = arith.constant 6.000000e+00 : f32
    %352 = vector.broadcast %cst_201 : f32 to vector<8x128xf32>
    %353 = arith.maximumf %352, %15 : vector<8x128xf32>
    %354 = vector.broadcast %cst_202 : f32 to vector<8x128xf32>
    %355 = arith.minimumf %354, %353 : vector<8x128xf32>
    %c0_203 = arith.constant 0 : index
    %c0_204 = arith.constant 0 : index
    %c0_205 = arith.constant 0 : index
    %356 = vector.load %arg7[%c0_203, %c0_204, %c0_205] : memref<12x8x128xf32, #tpu.memory_space<vmem>>, vector<1x8x128xf32>
    %357 = vector.shape_cast %356 : vector<1x8x128xf32> to vector<8x128xf32>
    %358 = vector.shape_cast %327 : vector<8x128xf32> to vector<1x8x128xf32>
    tpu.vector_store %arg7[%c0_203, %c0_204, %c0_205], %358 {strides = array<i32>} : memref<12x8x128xf32, #tpu.memory_space<vmem>>, vector<1x8x128xf32>,
    %c1_206 = arith.constant 1 : index
    %c0_207 = arith.constant 0 : index
    %c0_208 = arith.constant 0 : index
    %359 = vector.load %arg7[%c1_206, %c0_207, %c0_208] : memref<12x8x128xf32, #tpu.memory_space<vmem>>, vector<1x8x128xf32>
    %360 = vector.shape_cast %359 : vector<1x8x128xf32> to vector<8x128xf32>
    %361 = vector.shape_cast %331 : vector<8x128xf32> to vector<1x8x128xf32>
    tpu.vector_store %arg7[%c1_206, %c0_207, %c0_208], %361 {strides = array<i32>} : memref<12x8x128xf32, #tpu.memory_space<vmem>>, vector<1x8x128xf32>,
    %c2_209 = arith.constant 2 : index
    %c0_210 = arith.constant 0 : index
    %c0_211 = arith.constant 0 : index
    %362 = vector.load %arg7[%c2_209, %c0_210, %c0_211] : memref<12x8x128xf32, #tpu.memory_space<vmem>>, vector<1x8x128xf32>
    %363 = vector.shape_cast %362 : vector<1x8x128xf32> to vector<8x128xf32>
    %364 = vector.shape_cast %335 : vector<8x128xf32> to vector<1x8x128xf32>
    tpu.vector_store %arg7[%c2_209, %c0_210, %c0_211], %364 {strides = array<i32>} : memref<12x8x128xf32, #tpu.memory_space<vmem>>, vector<1x8x128xf32>,
    %c3_212 = arith.constant 3 : index
    %c0_213 = arith.constant 0 : index
    %c0_214 = arith.constant 0 : index
    %365 = vector.load %arg7[%c3_212, %c0_213, %c0_214] : memref<12x8x128xf32, #tpu.memory_space<vmem>>, vector<1x8x128xf32>
    %366 = vector.shape_cast %365 : vector<1x8x128xf32> to vector<8x128xf32>
    %367 = vector.shape_cast %339 : vector<8x128xf32> to vector<1x8x128xf32>
    tpu.vector_store %arg7[%c3_212, %c0_213, %c0_214], %367 {strides = array<i32>} : memref<12x8x128xf32, #tpu.memory_space<vmem>>, vector<1x8x128xf32>,
    %c4_215 = arith.constant 4 : index
    %c0_216 = arith.constant 0 : index
    %c0_217 = arith.constant 0 : index
    %368 = vector.load %arg7[%c4_215, %c0_216, %c0_217] : memref<12x8x128xf32, #tpu.memory_space<vmem>>, vector<1x8x128xf32>
    %369 = vector.shape_cast %368 : vector<1x8x128xf32> to vector<8x128xf32>
    %370 = vector.shape_cast %343 : vector<8x128xf32> to vector<1x8x128xf32>
    tpu.vector_store %arg7[%c4_215, %c0_216, %c0_217], %370 {strides = array<i32>} : memref<12x8x128xf32, #tpu.memory_space<vmem>>, vector<1x8x128xf32>,
    %c5_218 = arith.constant 5 : index
    %c0_219 = arith.constant 0 : index
    %c0_220 = arith.constant 0 : index
    %371 = vector.load %arg7[%c5_218, %c0_219, %c0_220] : memref<12x8x128xf32, #tpu.memory_space<vmem>>, vector<1x8x128xf32>
    %372 = vector.shape_cast %371 : vector<1x8x128xf32> to vector<8x128xf32>
    %373 = vector.shape_cast %347 : vector<8x128xf32> to vector<1x8x128xf32>
    tpu.vector_store %arg7[%c5_218, %c0_219, %c0_220], %373 {strides = array<i32>} : memref<12x8x128xf32, #tpu.memory_space<vmem>>, vector<1x8x128xf32>,
    %c6_221 = arith.constant 6 : index
    %c0_222 = arith.constant 0 : index
    %c0_223 = arith.constant 0 : index
    %374 = vector.load %arg7[%c6_221, %c0_222, %c0_223] : memref<12x8x128xf32, #tpu.memory_space<vmem>>, vector<1x8x128xf32>
    %375 = vector.shape_cast %374 : vector<1x8x128xf32> to vector<8x128xf32>
    %376 = vector.shape_cast %351 : vector<8x128xf32> to vector<1x8x128xf32>
    tpu.vector_store %arg7[%c6_221, %c0_222, %c0_223], %376 {strides = array<i32>} : memref<12x8x128xf32, #tpu.memory_space<vmem>>, vector<1x8x128xf32>,
    %c7_224 = arith.constant 7 : index
    %c0_225 = arith.constant 0 : index
    %c0_226 = arith.constant 0 : index
    %377 = vector.load %arg7[%c7_224, %c0_225, %c0_226] : memref<12x8x128xf32, #tpu.memory_space<vmem>>, vector<1x8x128xf32>
    %378 = vector.shape_cast %377 : vector<1x8x128xf32> to vector<8x128xf32>
    %379 = vector.shape_cast %355 : vector<8x128xf32> to vector<1x8x128xf32>
    tpu.vector_store %arg7[%c7_224, %c0_225, %c0_226], %379 {strides = array<i32>} : memref<12x8x128xf32, #tpu.memory_space<vmem>>, vector<1x8x128xf32>,
    %380 = vector.extract_strided_slice %295 {offsets = [0, 0], sizes = [1, 128], strides = [1, 1]} : vector<8x128xf32> to vector<1x128xf32>
    %381 = vector.broadcast %380 : vector<1x128xf32> to vector<8x128xf32>
    %382 = arith.mulf %381, %327 : vector<8x128xf32>
    %383 = vector.extract_strided_slice %295 {offsets = [1, 0], sizes = [1, 128], strides = [1, 1]} : vector<8x128xf32> to vector<1x128xf32>
    %384 = vector.broadcast %383 : vector<1x128xf32> to vector<8x128xf32>
    %385 = arith.mulf %384, %331 : vector<8x128xf32>
    %386 = arith.addf %382, %385 : vector<8x128xf32>
    %387 = vector.extract_strided_slice %295 {offsets = [2, 0], sizes = [1, 128], strides = [1, 1]} : vector<8x128xf32> to vector<1x128xf32>
    %388 = vector.broadcast %387 : vector<1x128xf32> to vector<8x128xf32>
    %389 = arith.mulf %388, %335 : vector<8x128xf32>
    %390 = arith.addf %386, %389 : vector<8x128xf32>
    %391 = vector.extract_strided_slice %295 {offsets = [3, 0], sizes = [1, 128], strides = [1, 1]} : vector<8x128xf32> to vector<1x128xf32>
    %392 = vector.broadcast %391 : vector<1x128xf32> to vector<8x128xf32>
    %393 = arith.mulf %392, %339 : vector<8x128xf32>
    %394 = arith.addf %390, %393 : vector<8x128xf32>
    %395 = vector.extract_strided_slice %295 {offsets = [4, 0], sizes = [1, 128], strides = [1, 1]} : vector<8x128xf32> to vector<1x128xf32>
    %396 = vector.broadcast %395 : vector<1x128xf32> to vector<8x128xf32>
    %397 = arith.mulf %396, %343 : vector<8x128xf32>
    %398 = arith.addf %394, %397 : vector<8x128xf32>
    %399 = vector.extract_strided_slice %295 {offsets = [5, 0], sizes = [1, 128], strides = [1, 1]} : vector<8x128xf32> to vector<1x128xf32>
    %400 = vector.broadcast %399 : vector<1x128xf32> to vector<8x128xf32>
    %401 = arith.mulf %400, %347 : vector<8x128xf32>
    %402 = arith.addf %398, %401 : vector<8x128xf32>
    %403 = vector.extract_strided_slice %295 {offsets = [6, 0], sizes = [1, 128], strides = [1, 1]} : vector<8x128xf32> to vector<1x128xf32>
    %404 = vector.broadcast %403 : vector<1x128xf32> to vector<8x128xf32>
    %405 = arith.mulf %404, %351 : vector<8x128xf32>
    %406 = arith.addf %402, %405 : vector<8x128xf32>
    %407 = vector.extract_strided_slice %295 {offsets = [7, 0], sizes = [1, 128], strides = [1, 1]} : vector<8x128xf32> to vector<1x128xf32>
    %408 = vector.broadcast %407 : vector<1x128xf32> to vector<8x128xf32>
    %409 = arith.mulf %408, %355 : vector<8x128xf32>
    %410 = arith.addf %406, %409 : vector<8x128xf32>
    %411 = vector.extract_strided_slice %299 {offsets = [0, 0], sizes = [1, 128], strides = [1, 1]} : vector<8x128xf32> to vector<1x128xf32>
    %412 = vector.broadcast %411 : vector<1x128xf32> to vector<8x128xf32>
    %413 = arith.mulf %412, %327 : vector<8x128xf32>
    %414 = vector.extract_strided_slice %299 {offsets = [1, 0], sizes = [1, 128], strides = [1, 1]} : vector<8x128xf32> to vector<1x128xf32>
    %415 = vector.broadcast %414 : vector<1x128xf32> to vector<8x128xf32>
    %416 = arith.mulf %415, %331 : vector<8x128xf32>
    %417 = arith.addf %413, %416 : vector<8x128xf32>
    %418 = vector.extract_strided_slice %299 {offsets = [2, 0], sizes = [1, 128], strides = [1, 1]} : vector<8x128xf32> to vector<1x128xf32>
    %419 = vector.broadcast %418 : vector<1x128xf32> to vector<8x128xf32>
    %420 = arith.mulf %419, %335 : vector<8x128xf32>
    %421 = arith.addf %417, %420 : vector<8x128xf32>
    %422 = vector.extract_strided_slice %299 {offsets = [3, 0], sizes = [1, 128], strides = [1, 1]} : vector<8x128xf32> to vector<1x128xf32>
    %423 = vector.broadcast %422 : vector<1x128xf32> to vector<8x128xf32>
    %424 = arith.mulf %423, %339 : vector<8x128xf32>
    %425 = arith.addf %421, %424 : vector<8x128xf32>
    %426 = vector.extract_strided_slice %299 {offsets = [4, 0], sizes = [1, 128], strides = [1, 1]} : vector<8x128xf32> to vector<1x128xf32>
    %427 = vector.broadcast %426 : vector<1x128xf32> to vector<8x128xf32>
    %428 = arith.mulf %427, %343 : vector<8x128xf32>
    %429 = arith.addf %425, %428 : vector<8x128xf32>
    %430 = vector.extract_strided_slice %299 {offsets = [5, 0], sizes = [1, 128], strides = [1, 1]} : vector<8x128xf32> to vector<1x128xf32>
    %431 = vector.broadcast %430 : vector<1x128xf32> to vector<8x128xf32>
    %432 = arith.mulf %431, %347 : vector<8x128xf32>
    %433 = arith.addf %429, %432 : vector<8x128xf32>
    %434 = vector.extract_strided_slice %299 {offsets = [6, 0], sizes = [1, 128], strides = [1, 1]} : vector<8x128xf32> to vector<1x128xf32>
    %435 = vector.broadcast %434 : vector<1x128xf32> to vector<8x128xf32>
    %436 = arith.mulf %435, %351 : vector<8x128xf32>
    %437 = arith.addf %433, %436 : vector<8x128xf32>
    %438 = vector.extract_strided_slice %299 {offsets = [7, 0], sizes = [1, 128], strides = [1, 1]} : vector<8x128xf32> to vector<1x128xf32>
    %439 = vector.broadcast %438 : vector<1x128xf32> to vector<8x128xf32>
    %440 = arith.mulf %439, %355 : vector<8x128xf32>
    %441 = arith.addf %437, %440 : vector<8x128xf32>
    %442 = vector.extract_strided_slice %303 {offsets = [0, 0], sizes = [1, 128], strides = [1, 1]} : vector<8x128xf32> to vector<1x128xf32>
    %443 = vector.broadcast %442 : vector<1x128xf32> to vector<8x128xf32>
    %444 = arith.mulf %443, %327 : vector<8x128xf32>
    %445 = vector.extract_strided_slice %303 {offsets = [1, 0], sizes = [1, 128], strides = [1, 1]} : vector<8x128xf32> to vector<1x128xf32>
    %446 = vector.broadcast %445 : vector<1x128xf32> to vector<8x128xf32>
    %447 = arith.mulf %446, %331 : vector<8x128xf32>
    %448 = arith.addf %444, %447 : vector<8x128xf32>
    %449 = vector.extract_strided_slice %303 {offsets = [2, 0], sizes = [1, 128], strides = [1, 1]} : vector<8x128xf32> to vector<1x128xf32>
    %450 = vector.broadcast %449 : vector<1x128xf32> to vector<8x128xf32>
    %451 = arith.mulf %450, %335 : vector<8x128xf32>
    %452 = arith.addf %448, %451 : vector<8x128xf32>
    %453 = vector.extract_strided_slice %303 {offsets = [3, 0], sizes = [1, 128], strides = [1, 1]} : vector<8x128xf32> to vector<1x128xf32>
    %454 = vector.broadcast %453 : vector<1x128xf32> to vector<8x128xf32>
    %455 = arith.mulf %454, %339 : vector<8x128xf32>
    %456 = arith.addf %452, %455 : vector<8x128xf32>
    %457 = vector.extract_strided_slice %303 {offsets = [4, 0], sizes = [1, 128], strides = [1, 1]} : vector<8x128xf32> to vector<1x128xf32>
    %458 = vector.broadcast %457 : vector<1x128xf32> to vector<8x128xf32>
    %459 = arith.mulf %458, %343 : vector<8x128xf32>
    %460 = arith.addf %456, %459 : vector<8x128xf32>
    %461 = vector.extract_strided_slice %303 {offsets = [5, 0], sizes = [1, 128], strides = [1, 1]} : vector<8x128xf32> to vector<1x128xf32>
    %462 = vector.broadcast %461 : vector<1x128xf32> to vector<8x128xf32>
    %463 = arith.mulf %462, %347 : vector<8x128xf32>
    %464 = arith.addf %460, %463 : vector<8x128xf32>
    %465 = vector.extract_strided_slice %303 {offsets = [6, 0], sizes = [1, 128], strides = [1, 1]} : vector<8x128xf32> to vector<1x128xf32>
    %466 = vector.broadcast %465 : vector<1x128xf32> to vector<8x128xf32>
    %467 = arith.mulf %466, %351 : vector<8x128xf32>
    %468 = arith.addf %464, %467 : vector<8x128xf32>
    %469 = vector.extract_strided_slice %303 {offsets = [7, 0], sizes = [1, 128], strides = [1, 1]} : vector<8x128xf32> to vector<1x128xf32>
    %470 = vector.broadcast %469 : vector<1x128xf32> to vector<8x128xf32>
    %471 = arith.mulf %470, %355 : vector<8x128xf32>
    %472 = arith.addf %468, %471 : vector<8x128xf32>
    %473 = vector.extract_strided_slice %307 {offsets = [0, 0], sizes = [1, 128], strides = [1, 1]} : vector<8x128xf32> to vector<1x128xf32>
    %474 = vector.broadcast %473 : vector<1x128xf32> to vector<8x128xf32>
    %475 = arith.mulf %474, %327 : vector<8x128xf32>
    %476 = vector.extract_strided_slice %307 {offsets = [1, 0], sizes = [1, 128], strides = [1, 1]} : vector<8x128xf32> to vector<1x128xf32>
    %477 = vector.broadcast %476 : vector<1x128xf32> to vector<8x128xf32>
    %478 = arith.mulf %477, %331 : vector<8x128xf32>
    %479 = arith.addf %475, %478 : vector<8x128xf32>
    %480 = vector.extract_strided_slice %307 {offsets = [2, 0], sizes = [1, 128], strides = [1, 1]} : vector<8x128xf32> to vector<1x128xf32>
    %481 = vector.broadcast %480 : vector<1x128xf32> to vector<8x128xf32>
    %482 = arith.mulf %481, %335 : vector<8x128xf32>
    %483 = arith.addf %479, %482 : vector<8x128xf32>
    %484 = vector.extract_strided_slice %307 {offsets = [3, 0], sizes = [1, 128], strides = [1, 1]} : vector<8x128xf32> to vector<1x128xf32>
    %485 = vector.broadcast %484 : vector<1x128xf32> to vector<8x128xf32>
    %486 = arith.mulf %485, %339 : vector<8x128xf32>
    %487 = arith.addf %483, %486 : vector<8x128xf32>
    %488 = vector.extract_strided_slice %307 {offsets = [4, 0], sizes = [1, 128], strides = [1, 1]} : vector<8x128xf32> to vector<1x128xf32>
    %489 = vector.broadcast %488 : vector<1x128xf32> to vector<8x128xf32>
    %490 = arith.mulf %489, %343 : vector<8x128xf32>
    %491 = arith.addf %487, %490 : vector<8x128xf32>
    %492 = vector.extract_strided_slice %307 {offsets = [5, 0], sizes = [1, 128], strides = [1, 1]} : vector<8x128xf32> to vector<1x128xf32>
    %493 = vector.broadcast %492 : vector<1x128xf32> to vector<8x128xf32>
    %494 = arith.mulf %493, %347 : vector<8x128xf32>
    %495 = arith.addf %491, %494 : vector<8x128xf32>
    %496 = vector.extract_strided_slice %307 {offsets = [6, 0], sizes = [1, 128], strides = [1, 1]} : vector<8x128xf32> to vector<1x128xf32>
    %497 = vector.broadcast %496 : vector<1x128xf32> to vector<8x128xf32>
    %498 = arith.mulf %497, %351 : vector<8x128xf32>
    %499 = arith.addf %495, %498 : vector<8x128xf32>
    %500 = vector.extract_strided_slice %307 {offsets = [7, 0], sizes = [1, 128], strides = [1, 1]} : vector<8x128xf32> to vector<1x128xf32>
    %501 = vector.broadcast %500 : vector<1x128xf32> to vector<8x128xf32>
    %502 = arith.mulf %501, %355 : vector<8x128xf32>
    %503 = arith.addf %499, %502 : vector<8x128xf32>
    %504 = vector.extract_strided_slice %311 {offsets = [0, 0], sizes = [1, 128], strides = [1, 1]} : vector<8x128xf32> to vector<1x128xf32>
    %505 = vector.broadcast %504 : vector<1x128xf32> to vector<8x128xf32>
    %506 = arith.mulf %505, %327 : vector<8x128xf32>
    %507 = vector.extract_strided_slice %311 {offsets = [1, 0], sizes = [1, 128], strides = [1, 1]} : vector<8x128xf32> to vector<1x128xf32>
    %508 = vector.broadcast %507 : vector<1x128xf32> to vector<8x128xf32>
    %509 = arith.mulf %508, %331 : vector<8x128xf32>
    %510 = arith.addf %506, %509 : vector<8x128xf32>
    %511 = vector.extract_strided_slice %311 {offsets = [2, 0], sizes = [1, 128], strides = [1, 1]} : vector<8x128xf32> to vector<1x128xf32>
    %512 = vector.broadcast %511 : vector<1x128xf32> to vector<8x128xf32>
    %513 = arith.mulf %512, %335 : vector<8x128xf32>
    %514 = arith.addf %510, %513 : vector<8x128xf32>
    %515 = vector.extract_strided_slice %311 {offsets = [3, 0], sizes = [1, 128], strides = [1, 1]} : vector<8x128xf32> to vector<1x128xf32>
    %516 = vector.broadcast %515 : vector<1x128xf32> to vector<8x128xf32>
    %517 = arith.mulf %516, %339 : vector<8x128xf32>
    %518 = arith.addf %514, %517 : vector<8x128xf32>
    %519 = vector.extract_strided_slice %311 {offsets = [4, 0], sizes = [1, 128], strides = [1, 1]} : vector<8x128xf32> to vector<1x128xf32>
    %520 = vector.broadcast %519 : vector<1x128xf32> to vector<8x128xf32>
    %521 = arith.mulf %520, %343 : vector<8x128xf32>
    %522 = arith.addf %518, %521 : vector<8x128xf32>
    %523 = vector.extract_strided_slice %311 {offsets = [5, 0], sizes = [1, 128], strides = [1, 1]} : vector<8x128xf32> to vector<1x128xf32>
    %524 = vector.broadcast %523 : vector<1x128xf32> to vector<8x128xf32>
    %525 = arith.mulf %524, %347 : vector<8x128xf32>
    %526 = arith.addf %522, %525 : vector<8x128xf32>
    %527 = vector.extract_strided_slice %311 {offsets = [6, 0], sizes = [1, 128], strides = [1, 1]} : vector<8x128xf32> to vector<1x128xf32>
    %528 = vector.broadcast %527 : vector<1x128xf32> to vector<8x128xf32>
    %529 = arith.mulf %528, %351 : vector<8x128xf32>
    %530 = arith.addf %526, %529 : vector<8x128xf32>
    %531 = vector.extract_strided_slice %311 {offsets = [7, 0], sizes = [1, 128], strides = [1, 1]} : vector<8x128xf32> to vector<1x128xf32>
    %532 = vector.broadcast %531 : vector<1x128xf32> to vector<8x128xf32>
    %533 = arith.mulf %532, %355 : vector<8x128xf32>
    %534 = arith.addf %530, %533 : vector<8x128xf32>
    %535 = vector.extract_strided_slice %315 {offsets = [0, 0], sizes = [1, 128], strides = [1, 1]} : vector<8x128xf32> to vector<1x128xf32>
    %536 = vector.broadcast %535 : vector<1x128xf32> to vector<8x128xf32>
    %537 = arith.mulf %536, %327 : vector<8x128xf32>
    %538 = vector.extract_strided_slice %315 {offsets = [1, 0], sizes = [1, 128], strides = [1, 1]} : vector<8x128xf32> to vector<1x128xf32>
    %539 = vector.broadcast %538 : vector<1x128xf32> to vector<8x128xf32>
    %540 = arith.mulf %539, %331 : vector<8x128xf32>
    %541 = arith.addf %537, %540 : vector<8x128xf32>
    %542 = vector.extract_strided_slice %315 {offsets = [2, 0], sizes = [1, 128], strides = [1, 1]} : vector<8x128xf32> to vector<1x128xf32>
    %543 = vector.broadcast %542 : vector<1x128xf32> to vector<8x128xf32>
    %544 = arith.mulf %543, %335 : vector<8x128xf32>
    %545 = arith.addf %541, %544 : vector<8x128xf32>
    %546 = vector.extract_strided_slice %315 {offsets = [3, 0], sizes = [1, 128], strides = [1, 1]} : vector<8x128xf32> to vector<1x128xf32>
    %547 = vector.broadcast %546 : vector<1x128xf32> to vector<8x128xf32>
    %548 = arith.mulf %547, %339 : vector<8x128xf32>
    %549 = arith.addf %545, %548 : vector<8x128xf32>
    %550 = vector.extract_strided_slice %315 {offsets = [4, 0], sizes = [1, 128], strides = [1, 1]} : vector<8x128xf32> to vector<1x128xf32>
    %551 = vector.broadcast %550 : vector<1x128xf32> to vector<8x128xf32>
    %552 = arith.mulf %551, %343 : vector<8x128xf32>
    %553 = arith.addf %549, %552 : vector<8x128xf32>
    %554 = vector.extract_strided_slice %315 {offsets = [5, 0], sizes = [1, 128], strides = [1, 1]} : vector<8x128xf32> to vector<1x128xf32>
    %555 = vector.broadcast %554 : vector<1x128xf32> to vector<8x128xf32>
    %556 = arith.mulf %555, %347 : vector<8x128xf32>
    %557 = arith.addf %553, %556 : vector<8x128xf32>
    %558 = vector.extract_strided_slice %315 {offsets = [6, 0], sizes = [1, 128], strides = [1, 1]} : vector<8x128xf32> to vector<1x128xf32>
    %559 = vector.broadcast %558 : vector<1x128xf32> to vector<8x128xf32>
    %560 = arith.mulf %559, %351 : vector<8x128xf32>
    %561 = arith.addf %557, %560 : vector<8x128xf32>
    %562 = vector.extract_strided_slice %315 {offsets = [7, 0], sizes = [1, 128], strides = [1, 1]} : vector<8x128xf32> to vector<1x128xf32>
    %563 = vector.broadcast %562 : vector<1x128xf32> to vector<8x128xf32>
    %564 = arith.mulf %563, %355 : vector<8x128xf32>
    %565 = arith.addf %561, %564 : vector<8x128xf32>
    %566 = vector.extract_strided_slice %319 {offsets = [0, 0], sizes = [1, 128], strides = [1, 1]} : vector<8x128xf32> to vector<1x128xf32>
    %567 = vector.broadcast %566 : vector<1x128xf32> to vector<8x128xf32>
    %568 = arith.mulf %567, %327 : vector<8x128xf32>
    %569 = vector.extract_strided_slice %319 {offsets = [1, 0], sizes = [1, 128], strides = [1, 1]} : vector<8x128xf32> to vector<1x128xf32>
    %570 = vector.broadcast %569 : vector<1x128xf32> to vector<8x128xf32>
    %571 = arith.mulf %570, %331 : vector<8x128xf32>
    %572 = arith.addf %568, %571 : vector<8x128xf32>
    %573 = vector.extract_strided_slice %319 {offsets = [2, 0], sizes = [1, 128], strides = [1, 1]} : vector<8x128xf32> to vector<1x128xf32>
    %574 = vector.broadcast %573 : vector<1x128xf32> to vector<8x128xf32>
    %575 = arith.mulf %574, %335 : vector<8x128xf32>
    %576 = arith.addf %572, %575 : vector<8x128xf32>
    %577 = vector.extract_strided_slice %319 {offsets = [3, 0], sizes = [1, 128], strides = [1, 1]} : vector<8x128xf32> to vector<1x128xf32>
    %578 = vector.broadcast %577 : vector<1x128xf32> to vector<8x128xf32>
    %579 = arith.mulf %578, %339 : vector<8x128xf32>
    %580 = arith.addf %576, %579 : vector<8x128xf32>
    %581 = vector.extract_strided_slice %319 {offsets = [4, 0], sizes = [1, 128], strides = [1, 1]} : vector<8x128xf32> to vector<1x128xf32>
    %582 = vector.broadcast %581 : vector<1x128xf32> to vector<8x128xf32>
    %583 = arith.mulf %582, %343 : vector<8x128xf32>
    %584 = arith.addf %580, %583 : vector<8x128xf32>
    %585 = vector.extract_strided_slice %319 {offsets = [5, 0], sizes = [1, 128], strides = [1, 1]} : vector<8x128xf32> to vector<1x128xf32>
    %586 = vector.broadcast %585 : vector<1x128xf32> to vector<8x128xf32>
    %587 = arith.mulf %586, %347 : vector<8x128xf32>
    %588 = arith.addf %584, %587 : vector<8x128xf32>
    %589 = vector.extract_strided_slice %319 {offsets = [6, 0], sizes = [1, 128], strides = [1, 1]} : vector<8x128xf32> to vector<1x128xf32>
    %590 = vector.broadcast %589 : vector<1x128xf32> to vector<8x128xf32>
    %591 = arith.mulf %590, %351 : vector<8x128xf32>
    %592 = arith.addf %588, %591 : vector<8x128xf32>
    %593 = vector.extract_strided_slice %319 {offsets = [7, 0], sizes = [1, 128], strides = [1, 1]} : vector<8x128xf32> to vector<1x128xf32>
    %594 = vector.broadcast %593 : vector<1x128xf32> to vector<8x128xf32>
    %595 = arith.mulf %594, %355 : vector<8x128xf32>
    %596 = arith.addf %592, %595 : vector<8x128xf32>
    %597 = vector.extract_strided_slice %323 {offsets = [0, 0], sizes = [1, 128], strides = [1, 1]} : vector<8x128xf32> to vector<1x128xf32>
    %598 = vector.broadcast %597 : vector<1x128xf32> to vector<8x128xf32>
    %599 = arith.mulf %598, %327 : vector<8x128xf32>
    %600 = vector.extract_strided_slice %323 {offsets = [1, 0], sizes = [1, 128], strides = [1, 1]} : vector<8x128xf32> to vector<1x128xf32>
    %601 = vector.broadcast %600 : vector<1x128xf32> to vector<8x128xf32>
    %602 = arith.mulf %601, %331 : vector<8x128xf32>
    %603 = arith.addf %599, %602 : vector<8x128xf32>
    %604 = vector.extract_strided_slice %323 {offsets = [2, 0], sizes = [1, 128], strides = [1, 1]} : vector<8x128xf32> to vector<1x128xf32>
    %605 = vector.broadcast %604 : vector<1x128xf32> to vector<8x128xf32>
    %606 = arith.mulf %605, %335 : vector<8x128xf32>
    %607 = arith.addf %603, %606 : vector<8x128xf32>
    %608 = vector.extract_strided_slice %323 {offsets = [3, 0], sizes = [1, 128], strides = [1, 1]} : vector<8x128xf32> to vector<1x128xf32>
    %609 = vector.broadcast %608 : vector<1x128xf32> to vector<8x128xf32>
    %610 = arith.mulf %609, %339 : vector<8x128xf32>
    %611 = arith.addf %607, %610 : vector<8x128xf32>
    %612 = vector.extract_strided_slice %323 {offsets = [4, 0], sizes = [1, 128], strides = [1, 1]} : vector<8x128xf32> to vector<1x128xf32>
    %613 = vector.broadcast %612 : vector<1x128xf32> to vector<8x128xf32>
    %614 = arith.mulf %613, %343 : vector<8x128xf32>
    %615 = arith.addf %611, %614 : vector<8x128xf32>
    %616 = vector.extract_strided_slice %323 {offsets = [5, 0], sizes = [1, 128], strides = [1, 1]} : vector<8x128xf32> to vector<1x128xf32>
    %617 = vector.broadcast %616 : vector<1x128xf32> to vector<8x128xf32>
    %618 = arith.mulf %617, %347 : vector<8x128xf32>
    %619 = arith.addf %615, %618 : vector<8x128xf32>
    %620 = vector.extract_strided_slice %323 {offsets = [6, 0], sizes = [1, 128], strides = [1, 1]} : vector<8x128xf32> to vector<1x128xf32>
    %621 = vector.broadcast %620 : vector<1x128xf32> to vector<8x128xf32>
    %622 = arith.mulf %621, %351 : vector<8x128xf32>
    %623 = arith.addf %619, %622 : vector<8x128xf32>
    %624 = vector.extract_strided_slice %323 {offsets = [7, 0], sizes = [1, 128], strides = [1, 1]} : vector<8x128xf32> to vector<1x128xf32>
    %625 = vector.broadcast %624 : vector<1x128xf32> to vector<8x128xf32>
    %626 = arith.mulf %625, %355 : vector<8x128xf32>
    %627 = arith.addf %623, %626 : vector<8x128xf32>
    %c0_227 = arith.constant 0 : index
    %c0_228 = arith.constant 0 : index
    %628 = memref.load %arg3[%c0_227, %c0_228] : memref<8x8xf32, #tpu.memory_space<smem>>
    %629 = vector.broadcast %628 : f32 to vector<8x128xf32>
    %630 = arith.mulf %629, %410 : vector<8x128xf32>
    %c0_229 = arith.constant 0 : index
    %c1_230 = arith.constant 1 : index
    %631 = memref.load %arg3[%c0_229, %c1_230] : memref<8x8xf32, #tpu.memory_space<smem>>
    %632 = vector.broadcast %631 : f32 to vector<8x128xf32>
    %633 = arith.mulf %632, %441 : vector<8x128xf32>
    %634 = arith.addf %630, %633 : vector<8x128xf32>
    %c0_231 = arith.constant 0 : index
    %c2_232 = arith.constant 2 : index
    %635 = memref.load %arg3[%c0_231, %c2_232] : memref<8x8xf32, #tpu.memory_space<smem>>
    %636 = vector.broadcast %635 : f32 to vector<8x128xf32>
    %637 = arith.mulf %636, %472 : vector<8x128xf32>
    %638 = arith.addf %634, %637 : vector<8x128xf32>
    %c0_233 = arith.constant 0 : index
    %c3_234 = arith.constant 3 : index
    %639 = memref.load %arg3[%c0_233, %c3_234] : memref<8x8xf32, #tpu.memory_space<smem>>
    %640 = vector.broadcast %639 : f32 to vector<8x128xf32>
    %641 = arith.mulf %640, %503 : vector<8x128xf32>
    %642 = arith.addf %638, %641 : vector<8x128xf32>
    %c0_235 = arith.constant 0 : index
    %c4_236 = arith.constant 4 : index
    %643 = memref.load %arg3[%c0_235, %c4_236] : memref<8x8xf32, #tpu.memory_space<smem>>
    %644 = vector.broadcast %643 : f32 to vector<8x128xf32>
    %645 = arith.mulf %644, %534 : vector<8x128xf32>
    %646 = arith.addf %642, %645 : vector<8x128xf32>
    %c0_237 = arith.constant 0 : index
    %c5_238 = arith.constant 5 : index
    %647 = memref.load %arg3[%c0_237, %c5_238] : memref<8x8xf32, #tpu.memory_space<smem>>
    %648 = vector.broadcast %647 : f32 to vector<8x128xf32>
    %649 = arith.mulf %648, %565 : vector<8x128xf32>
    %650 = arith.addf %646, %649 : vector<8x128xf32>
    %c0_239 = arith.constant 0 : index
    %c6_240 = arith.constant 6 : index
    %651 = memref.load %arg3[%c0_239, %c6_240] : memref<8x8xf32, #tpu.memory_space<smem>>
    %652 = vector.broadcast %651 : f32 to vector<8x128xf32>
    %653 = arith.mulf %652, %596 : vector<8x128xf32>
    %654 = arith.addf %650, %653 : vector<8x128xf32>
    %c0_241 = arith.constant 0 : index
    %c7_242 = arith.constant 7 : index
    %655 = memref.load %arg3[%c0_241, %c7_242] : memref<8x8xf32, #tpu.memory_space<smem>>
    %656 = vector.broadcast %655 : f32 to vector<8x128xf32>
    %657 = arith.mulf %656, %627 : vector<8x128xf32>
    %658 = arith.addf %654, %657 : vector<8x128xf32>
    %c1_243 = arith.constant 1 : index
    %c0_244 = arith.constant 0 : index
    %659 = memref.load %arg3[%c1_243, %c0_244] : memref<8x8xf32, #tpu.memory_space<smem>>
    %660 = vector.broadcast %659 : f32 to vector<8x128xf32>
    %661 = arith.mulf %660, %410 : vector<8x128xf32>
    %c1_245 = arith.constant 1 : index
    %c1_246 = arith.constant 1 : index
    %662 = memref.load %arg3[%c1_245, %c1_246] : memref<8x8xf32, #tpu.memory_space<smem>>
    %663 = vector.broadcast %662 : f32 to vector<8x128xf32>
    %664 = arith.mulf %663, %441 : vector<8x128xf32>
    %665 = arith.addf %661, %664 : vector<8x128xf32>
    %c1_247 = arith.constant 1 : index
    %c2_248 = arith.constant 2 : index
    %666 = memref.load %arg3[%c1_247, %c2_248] : memref<8x8xf32, #tpu.memory_space<smem>>
    %667 = vector.broadcast %666 : f32 to vector<8x128xf32>
    %668 = arith.mulf %667, %472 : vector<8x128xf32>
    %669 = arith.addf %665, %668 : vector<8x128xf32>
    %c1_249 = arith.constant 1 : index
    %c3_250 = arith.constant 3 : index
    %670 = memref.load %arg3[%c1_249, %c3_250] : memref<8x8xf32, #tpu.memory_space<smem>>
    %671 = vector.broadcast %670 : f32 to vector<8x128xf32>
    %672 = arith.mulf %671, %503 : vector<8x128xf32>
    %673 = arith.addf %669, %672 : vector<8x128xf32>
    %c1_251 = arith.constant 1 : index
    %c4_252 = arith.constant 4 : index
    %674 = memref.load %arg3[%c1_251, %c4_252] : memref<8x8xf32, #tpu.memory_space<smem>>
    %675 = vector.broadcast %674 : f32 to vector<8x128xf32>
    %676 = arith.mulf %675, %534 : vector<8x128xf32>
    %677 = arith.addf %673, %676 : vector<8x128xf32>
    %c1_253 = arith.constant 1 : index
    %c5_254 = arith.constant 5 : index
    %678 = memref.load %arg3[%c1_253, %c5_254] : memref<8x8xf32, #tpu.memory_space<smem>>
    %679 = vector.broadcast %678 : f32 to vector<8x128xf32>
    %680 = arith.mulf %679, %565 : vector<8x128xf32>
    %681 = arith.addf %677, %680 : vector<8x128xf32>
    %c1_255 = arith.constant 1 : index
    %c6_256 = arith.constant 6 : index
    %682 = memref.load %arg3[%c1_255, %c6_256] : memref<8x8xf32, #tpu.memory_space<smem>>
    %683 = vector.broadcast %682 : f32 to vector<8x128xf32>
    %684 = arith.mulf %683, %596 : vector<8x128xf32>
    %685 = arith.addf %681, %684 : vector<8x128xf32>
    %c1_257 = arith.constant 1 : index
    %c7_258 = arith.constant 7 : index
    %686 = memref.load %arg3[%c1_257, %c7_258] : memref<8x8xf32, #tpu.memory_space<smem>>
    %687 = vector.broadcast %686 : f32 to vector<8x128xf32>
    %688 = arith.mulf %687, %627 : vector<8x128xf32>
    %689 = arith.addf %685, %688 : vector<8x128xf32>
    %c2_259 = arith.constant 2 : index
    %c0_260 = arith.constant 0 : index
    %690 = memref.load %arg3[%c2_259, %c0_260] : memref<8x8xf32, #tpu.memory_space<smem>>
    %691 = vector.broadcast %690 : f32 to vector<8x128xf32>
    %692 = arith.mulf %691, %410 : vector<8x128xf32>
    %c2_261 = arith.constant 2 : index
    %c1_262 = arith.constant 1 : index
    %693 = memref.load %arg3[%c2_261, %c1_262] : memref<8x8xf32, #tpu.memory_space<smem>>
    %694 = vector.broadcast %693 : f32 to vector<8x128xf32>
    %695 = arith.mulf %694, %441 : vector<8x128xf32>
    %696 = arith.addf %692, %695 : vector<8x128xf32>
    %c2_263 = arith.constant 2 : index
    %c2_264 = arith.constant 2 : index
    %697 = memref.load %arg3[%c2_263, %c2_264] : memref<8x8xf32, #tpu.memory_space<smem>>
    %698 = vector.broadcast %697 : f32 to vector<8x128xf32>
    %699 = arith.mulf %698, %472 : vector<8x128xf32>
    %700 = arith.addf %696, %699 : vector<8x128xf32>
    %c2_265 = arith.constant 2 : index
    %c3_266 = arith.constant 3 : index
    %701 = memref.load %arg3[%c2_265, %c3_266] : memref<8x8xf32, #tpu.memory_space<smem>>
    %702 = vector.broadcast %701 : f32 to vector<8x128xf32>
    %703 = arith.mulf %702, %503 : vector<8x128xf32>
    %704 = arith.addf %700, %703 : vector<8x128xf32>
    %c2_267 = arith.constant 2 : index
    %c4_268 = arith.constant 4 : index
    %705 = memref.load %arg3[%c2_267, %c4_268] : memref<8x8xf32, #tpu.memory_space<smem>>
    %706 = vector.broadcast %705 : f32 to vector<8x128xf32>
    %707 = arith.mulf %706, %534 : vector<8x128xf32>
    %708 = arith.addf %704, %707 : vector<8x128xf32>
    %c2_269 = arith.constant 2 : index
    %c5_270 = arith.constant 5 : index
    %709 = memref.load %arg3[%c2_269, %c5_270] : memref<8x8xf32, #tpu.memory_space<smem>>
    %710 = vector.broadcast %709 : f32 to vector<8x128xf32>
    %711 = arith.mulf %710, %565 : vector<8x128xf32>
    %712 = arith.addf %708, %711 : vector<8x128xf32>
    %c2_271 = arith.constant 2 : index
    %c6_272 = arith.constant 6 : index
    %713 = memref.load %arg3[%c2_271, %c6_272] : memref<8x8xf32, #tpu.memory_space<smem>>
    %714 = vector.broadcast %713 : f32 to vector<8x128xf32>
    %715 = arith.mulf %714, %596 : vector<8x128xf32>
    %716 = arith.addf %712, %715 : vector<8x128xf32>
    %c2_273 = arith.constant 2 : index
    %c7_274 = arith.constant 7 : index
    %717 = memref.load %arg3[%c2_273, %c7_274] : memref<8x8xf32, #tpu.memory_space<smem>>
    %718 = vector.broadcast %717 : f32 to vector<8x128xf32>
    %719 = arith.mulf %718, %627 : vector<8x128xf32>
    %720 = arith.addf %716, %719 : vector<8x128xf32>
    %c3_275 = arith.constant 3 : index
    %c0_276 = arith.constant 0 : index
    %721 = memref.load %arg3[%c3_275, %c0_276] : memref<8x8xf32, #tpu.memory_space<smem>>
    %722 = vector.broadcast %721 : f32 to vector<8x128xf32>
    %723 = arith.mulf %722, %410 : vector<8x128xf32>
    %c3_277 = arith.constant 3 : index
    %c1_278 = arith.constant 1 : index
    %724 = memref.load %arg3[%c3_277, %c1_278] : memref<8x8xf32, #tpu.memory_space<smem>>
    %725 = vector.broadcast %724 : f32 to vector<8x128xf32>
    %726 = arith.mulf %725, %441 : vector<8x128xf32>
    %727 = arith.addf %723, %726 : vector<8x128xf32>
    %c3_279 = arith.constant 3 : index
    %c2_280 = arith.constant 2 : index
    %728 = memref.load %arg3[%c3_279, %c2_280] : memref<8x8xf32, #tpu.memory_space<smem>>
    %729 = vector.broadcast %728 : f32 to vector<8x128xf32>
    %730 = arith.mulf %729, %472 : vector<8x128xf32>
    %731 = arith.addf %727, %730 : vector<8x128xf32>
    %c3_281 = arith.constant 3 : index
    %c3_282 = arith.constant 3 : index
    %732 = memref.load %arg3[%c3_281, %c3_282] : memref<8x8xf32, #tpu.memory_space<smem>>
    %733 = vector.broadcast %732 : f32 to vector<8x128xf32>
    %734 = arith.mulf %733, %503 : vector<8x128xf32>
    %735 = arith.addf %731, %734 : vector<8x128xf32>
    %c3_283 = arith.constant 3 : index
    %c4_284 = arith.constant 4 : index
    %736 = memref.load %arg3[%c3_283, %c4_284] : memref<8x8xf32, #tpu.memory_space<smem>>
    %737 = vector.broadcast %736 : f32 to vector<8x128xf32>
    %738 = arith.mulf %737, %534 : vector<8x128xf32>
    %739 = arith.addf %735, %738 : vector<8x128xf32>
    %c3_285 = arith.constant 3 : index
    %c5_286 = arith.constant 5 : index
    %740 = memref.load %arg3[%c3_285, %c5_286] : memref<8x8xf32, #tpu.memory_space<smem>>
    %741 = vector.broadcast %740 : f32 to vector<8x128xf32>
    %742 = arith.mulf %741, %565 : vector<8x128xf32>
    %743 = arith.addf %739, %742 : vector<8x128xf32>
    %c3_287 = arith.constant 3 : index
    %c6_288 = arith.constant 6 : index
    %744 = memref.load %arg3[%c3_287, %c6_288] : memref<8x8xf32, #tpu.memory_space<smem>>
    %745 = vector.broadcast %744 : f32 to vector<8x128xf32>
    %746 = arith.mulf %745, %596 : vector<8x128xf32>
    %747 = arith.addf %743, %746 : vector<8x128xf32>
    %c3_289 = arith.constant 3 : index
    %c7_290 = arith.constant 7 : index
    %748 = memref.load %arg3[%c3_289, %c7_290] : memref<8x8xf32, #tpu.memory_space<smem>>
    %749 = vector.broadcast %748 : f32 to vector<8x128xf32>
    %750 = arith.mulf %749, %627 : vector<8x128xf32>
    %751 = arith.addf %747, %750 : vector<8x128xf32>
    %c4_291 = arith.constant 4 : index
    %c0_292 = arith.constant 0 : index
    %752 = memref.load %arg3[%c4_291, %c0_292] : memref<8x8xf32, #tpu.memory_space<smem>>
    %753 = vector.broadcast %752 : f32 to vector<8x128xf32>
    %754 = arith.mulf %753, %410 : vector<8x128xf32>
    %c4_293 = arith.constant 4 : index
    %c1_294 = arith.constant 1 : index
    %755 = memref.load %arg3[%c4_293, %c1_294] : memref<8x8xf32, #tpu.memory_space<smem>>
    %756 = vector.broadcast %755 : f32 to vector<8x128xf32>
    %757 = arith.mulf %756, %441 : vector<8x128xf32>
    %758 = arith.addf %754, %757 : vector<8x128xf32>
    %c4_295 = arith.constant 4 : index
    %c2_296 = arith.constant 2 : index
    %759 = memref.load %arg3[%c4_295, %c2_296] : memref<8x8xf32, #tpu.memory_space<smem>>
    %760 = vector.broadcast %759 : f32 to vector<8x128xf32>
    %761 = arith.mulf %760, %472 : vector<8x128xf32>
    %762 = arith.addf %758, %761 : vector<8x128xf32>
    %c4_297 = arith.constant 4 : index
    %c3_298 = arith.constant 3 : index
    %763 = memref.load %arg3[%c4_297, %c3_298] : memref<8x8xf32, #tpu.memory_space<smem>>
    %764 = vector.broadcast %763 : f32 to vector<8x128xf32>
    %765 = arith.mulf %764, %503 : vector<8x128xf32>
    %766 = arith.addf %762, %765 : vector<8x128xf32>
    %c4_299 = arith.constant 4 : index
    %c4_300 = arith.constant 4 : index
    %767 = memref.load %arg3[%c4_299, %c4_300] : memref<8x8xf32, #tpu.memory_space<smem>>
    %768 = vector.broadcast %767 : f32 to vector<8x128xf32>
    %769 = arith.mulf %768, %534 : vector<8x128xf32>
    %770 = arith.addf %766, %769 : vector<8x128xf32>
    %c4_301 = arith.constant 4 : index
    %c5_302 = arith.constant 5 : index
    %771 = memref.load %arg3[%c4_301, %c5_302] : memref<8x8xf32, #tpu.memory_space<smem>>
    %772 = vector.broadcast %771 : f32 to vector<8x128xf32>
    %773 = arith.mulf %772, %565 : vector<8x128xf32>
    %774 = arith.addf %770, %773 : vector<8x128xf32>
    %c4_303 = arith.constant 4 : index
    %c6_304 = arith.constant 6 : index
    %775 = memref.load %arg3[%c4_303, %c6_304] : memref<8x8xf32, #tpu.memory_space<smem>>
    %776 = vector.broadcast %775 : f32 to vector<8x128xf32>
    %777 = arith.mulf %776, %596 : vector<8x128xf32>
    %778 = arith.addf %774, %777 : vector<8x128xf32>
    %c4_305 = arith.constant 4 : index
    %c7_306 = arith.constant 7 : index
    %779 = memref.load %arg3[%c4_305, %c7_306] : memref<8x8xf32, #tpu.memory_space<smem>>
    %780 = vector.broadcast %779 : f32 to vector<8x128xf32>
    %781 = arith.mulf %780, %627 : vector<8x128xf32>
    %782 = arith.addf %778, %781 : vector<8x128xf32>
    %c5_307 = arith.constant 5 : index
    %c0_308 = arith.constant 0 : index
    %783 = memref.load %arg3[%c5_307, %c0_308] : memref<8x8xf32, #tpu.memory_space<smem>>
    %784 = vector.broadcast %783 : f32 to vector<8x128xf32>
    %785 = arith.mulf %784, %410 : vector<8x128xf32>
    %c5_309 = arith.constant 5 : index
    %c1_310 = arith.constant 1 : index
    %786 = memref.load %arg3[%c5_309, %c1_310] : memref<8x8xf32, #tpu.memory_space<smem>>
    %787 = vector.broadcast %786 : f32 to vector<8x128xf32>
    %788 = arith.mulf %787, %441 : vector<8x128xf32>
    %789 = arith.addf %785, %788 : vector<8x128xf32>
    %c5_311 = arith.constant 5 : index
    %c2_312 = arith.constant 2 : index
    %790 = memref.load %arg3[%c5_311, %c2_312] : memref<8x8xf32, #tpu.memory_space<smem>>
    %791 = vector.broadcast %790 : f32 to vector<8x128xf32>
    %792 = arith.mulf %791, %472 : vector<8x128xf32>
    %793 = arith.addf %789, %792 : vector<8x128xf32>
    %c5_313 = arith.constant 5 : index
    %c3_314 = arith.constant 3 : index
    %794 = memref.load %arg3[%c5_313, %c3_314] : memref<8x8xf32, #tpu.memory_space<smem>>
    %795 = vector.broadcast %794 : f32 to vector<8x128xf32>
    %796 = arith.mulf %795, %503 : vector<8x128xf32>
    %797 = arith.addf %793, %796 : vector<8x128xf32>
    %c5_315 = arith.constant 5 : index
    %c4_316 = arith.constant 4 : index
    %798 = memref.load %arg3[%c5_315, %c4_316] : memref<8x8xf32, #tpu.memory_space<smem>>
    %799 = vector.broadcast %798 : f32 to vector<8x128xf32>
    %800 = arith.mulf %799, %534 : vector<8x128xf32>
    %801 = arith.addf %797, %800 : vector<8x128xf32>
    %c5_317 = arith.constant 5 : index
    %c5_318 = arith.constant 5 : index
    %802 = memref.load %arg3[%c5_317, %c5_318] : memref<8x8xf32, #tpu.memory_space<smem>>
    %803 = vector.broadcast %802 : f32 to vector<8x128xf32>
    %804 = arith.mulf %803, %565 : vector<8x128xf32>
    %805 = arith.addf %801, %804 : vector<8x128xf32>
    %c5_319 = arith.constant 5 : index
    %c6_320 = arith.constant 6 : index
    %806 = memref.load %arg3[%c5_319, %c6_320] : memref<8x8xf32, #tpu.memory_space<smem>>
    %807 = vector.broadcast %806 : f32 to vector<8x128xf32>
    %808 = arith.mulf %807, %596 : vector<8x128xf32>
    %809 = arith.addf %805, %808 : vector<8x128xf32>
    %c5_321 = arith.constant 5 : index
    %c7_322 = arith.constant 7 : index
    %810 = memref.load %arg3[%c5_321, %c7_322] : memref<8x8xf32, #tpu.memory_space<smem>>
    %811 = vector.broadcast %810 : f32 to vector<8x128xf32>
    %812 = arith.mulf %811, %627 : vector<8x128xf32>
    %813 = arith.addf %809, %812 : vector<8x128xf32>
    %c6_323 = arith.constant 6 : index
    %c0_324 = arith.constant 0 : index
    %814 = memref.load %arg3[%c6_323, %c0_324] : memref<8x8xf32, #tpu.memory_space<smem>>
    %815 = vector.broadcast %814 : f32 to vector<8x128xf32>
    %816 = arith.mulf %815, %410 : vector<8x128xf32>
    %c6_325 = arith.constant 6 : index
    %c1_326 = arith.constant 1 : index
    %817 = memref.load %arg3[%c6_325, %c1_326] : memref<8x8xf32, #tpu.memory_space<smem>>
    %818 = vector.broadcast %817 : f32 to vector<8x128xf32>
    %819 = arith.mulf %818, %441 : vector<8x128xf32>
    %820 = arith.addf %816, %819 : vector<8x128xf32>
    %c6_327 = arith.constant 6 : index
    %c2_328 = arith.constant 2 : index
    %821 = memref.load %arg3[%c6_327, %c2_328] : memref<8x8xf32, #tpu.memory_space<smem>>
    %822 = vector.broadcast %821 : f32 to vector<8x128xf32>
    %823 = arith.mulf %822, %472 : vector<8x128xf32>
    %824 = arith.addf %820, %823 : vector<8x128xf32>
    %c6_329 = arith.constant 6 : index
    %c3_330 = arith.constant 3 : index
    %825 = memref.load %arg3[%c6_329, %c3_330] : memref<8x8xf32, #tpu.memory_space<smem>>
    %826 = vector.broadcast %825 : f32 to vector<8x128xf32>
    %827 = arith.mulf %826, %503 : vector<8x128xf32>
    %828 = arith.addf %824, %827 : vector<8x128xf32>
    %c6_331 = arith.constant 6 : index
    %c4_332 = arith.constant 4 : index
    %829 = memref.load %arg3[%c6_331, %c4_332] : memref<8x8xf32, #tpu.memory_space<smem>>
    %830 = vector.broadcast %829 : f32 to vector<8x128xf32>
    %831 = arith.mulf %830, %534 : vector<8x128xf32>
    %832 = arith.addf %828, %831 : vector<8x128xf32>
    %c6_333 = arith.constant 6 : index
    %c5_334 = arith.constant 5 : index
    %833 = memref.load %arg3[%c6_333, %c5_334] : memref<8x8xf32, #tpu.memory_space<smem>>
    %834 = vector.broadcast %833 : f32 to vector<8x128xf32>
    %835 = arith.mulf %834, %565 : vector<8x128xf32>
    %836 = arith.addf %832, %835 : vector<8x128xf32>
    %c6_335 = arith.constant 6 : index
    %c6_336 = arith.constant 6 : index
    %837 = memref.load %arg3[%c6_335, %c6_336] : memref<8x8xf32, #tpu.memory_space<smem>>
    %838 = vector.broadcast %837 : f32 to vector<8x128xf32>
    %839 = arith.mulf %838, %596 : vector<8x128xf32>
    %840 = arith.addf %836, %839 : vector<8x128xf32>
    %c6_337 = arith.constant 6 : index
    %c7_338 = arith.constant 7 : index
    %841 = memref.load %arg3[%c6_337, %c7_338] : memref<8x8xf32, #tpu.memory_space<smem>>
    %842 = vector.broadcast %841 : f32 to vector<8x128xf32>
    %843 = arith.mulf %842, %627 : vector<8x128xf32>
    %844 = arith.addf %840, %843 : vector<8x128xf32>
    %c7_339 = arith.constant 7 : index
    %c0_340 = arith.constant 0 : index
    %845 = memref.load %arg3[%c7_339, %c0_340] : memref<8x8xf32, #tpu.memory_space<smem>>
    %846 = vector.broadcast %845 : f32 to vector<8x128xf32>
    %847 = arith.mulf %846, %410 : vector<8x128xf32>
    %c7_341 = arith.constant 7 : index
    %c1_342 = arith.constant 1 : index
    %848 = memref.load %arg3[%c7_341, %c1_342] : memref<8x8xf32, #tpu.memory_space<smem>>
    %849 = vector.broadcast %848 : f32 to vector<8x128xf32>
    %850 = arith.mulf %849, %441 : vector<8x128xf32>
    %851 = arith.addf %847, %850 : vector<8x128xf32>
    %c7_343 = arith.constant 7 : index
    %c2_344 = arith.constant 2 : index
    %852 = memref.load %arg3[%c7_343, %c2_344] : memref<8x8xf32, #tpu.memory_space<smem>>
    %853 = vector.broadcast %852 : f32 to vector<8x128xf32>
    %854 = arith.mulf %853, %472 : vector<8x128xf32>
    %855 = arith.addf %851, %854 : vector<8x128xf32>
    %c7_345 = arith.constant 7 : index
    %c3_346 = arith.constant 3 : index
    %856 = memref.load %arg3[%c7_345, %c3_346] : memref<8x8xf32, #tpu.memory_space<smem>>
    %857 = vector.broadcast %856 : f32 to vector<8x128xf32>
    %858 = arith.mulf %857, %503 : vector<8x128xf32>
    %859 = arith.addf %855, %858 : vector<8x128xf32>
    %c7_347 = arith.constant 7 : index
    %c4_348 = arith.constant 4 : index
    %860 = memref.load %arg3[%c7_347, %c4_348] : memref<8x8xf32, #tpu.memory_space<smem>>
    %861 = vector.broadcast %860 : f32 to vector<8x128xf32>
    %862 = arith.mulf %861, %534 : vector<8x128xf32>
    %863 = arith.addf %859, %862 : vector<8x128xf32>
    %c7_349 = arith.constant 7 : index
    %c5_350 = arith.constant 5 : index
    %864 = memref.load %arg3[%c7_349, %c5_350] : memref<8x8xf32, #tpu.memory_space<smem>>
    %865 = vector.broadcast %864 : f32 to vector<8x128xf32>
    %866 = arith.mulf %865, %565 : vector<8x128xf32>
    %867 = arith.addf %863, %866 : vector<8x128xf32>
    %c7_351 = arith.constant 7 : index
    %c6_352 = arith.constant 6 : index
    %868 = memref.load %arg3[%c7_351, %c6_352] : memref<8x8xf32, #tpu.memory_space<smem>>
    %869 = vector.broadcast %868 : f32 to vector<8x128xf32>
    %870 = arith.mulf %869, %596 : vector<8x128xf32>
    %871 = arith.addf %867, %870 : vector<8x128xf32>
    %c7_353 = arith.constant 7 : index
    %c7_354 = arith.constant 7 : index
    %872 = memref.load %arg3[%c7_353, %c7_354] : memref<8x8xf32, #tpu.memory_space<smem>>
    %873 = vector.broadcast %872 : f32 to vector<8x128xf32>
    %874 = arith.mulf %873, %627 : vector<8x128xf32>
    %875 = arith.addf %871, %874 : vector<8x128xf32>
    %c0_355 = arith.constant 0 : index
    %c0_356 = arith.constant 0 : index
    %c0_357 = arith.constant 0 : index
    %876 = vector.load %arg5[%c0_355, %c0_356, %c0_357] : memref<8x8x128xf32, #tpu.memory_space<vmem>>, vector<1x8x128xf32>
    %877 = vector.shape_cast %876 : vector<1x8x128xf32> to vector<8x128xf32>
    %878 = arith.addf %658, %877 : vector<8x128xf32>
    %c1_358 = arith.constant 1 : index
    %c0_359 = arith.constant 0 : index
    %c0_360 = arith.constant 0 : index
    %879 = vector.load %arg5[%c1_358, %c0_359, %c0_360] : memref<8x8x128xf32, #tpu.memory_space<vmem>>, vector<1x8x128xf32>
    %880 = vector.shape_cast %879 : vector<1x8x128xf32> to vector<8x128xf32>
    %881 = arith.addf %689, %880 : vector<8x128xf32>
    %c2_361 = arith.constant 2 : index
    %c0_362 = arith.constant 0 : index
    %c0_363 = arith.constant 0 : index
    %882 = vector.load %arg5[%c2_361, %c0_362, %c0_363] : memref<8x8x128xf32, #tpu.memory_space<vmem>>, vector<1x8x128xf32>
    %883 = vector.shape_cast %882 : vector<1x8x128xf32> to vector<8x128xf32>
    %884 = arith.addf %720, %883 : vector<8x128xf32>
    %c3_364 = arith.constant 3 : index
    %c0_365 = arith.constant 0 : index
    %c0_366 = arith.constant 0 : index
    %885 = vector.load %arg5[%c3_364, %c0_365, %c0_366] : memref<8x8x128xf32, #tpu.memory_space<vmem>>, vector<1x8x128xf32>
    %886 = vector.shape_cast %885 : vector<1x8x128xf32> to vector<8x128xf32>
    %887 = arith.addf %751, %886 : vector<8x128xf32>
    %c4_367 = arith.constant 4 : index
    %c0_368 = arith.constant 0 : index
    %c0_369 = arith.constant 0 : index
    %888 = vector.load %arg5[%c4_367, %c0_368, %c0_369] : memref<8x8x128xf32, #tpu.memory_space<vmem>>, vector<1x8x128xf32>
    %889 = vector.shape_cast %888 : vector<1x8x128xf32> to vector<8x128xf32>
    %890 = arith.addf %782, %889 : vector<8x128xf32>
    %c5_370 = arith.constant 5 : index
    %c0_371 = arith.constant 0 : index
    %c0_372 = arith.constant 0 : index
    %891 = vector.load %arg5[%c5_370, %c0_371, %c0_372] : memref<8x8x128xf32, #tpu.memory_space<vmem>>, vector<1x8x128xf32>
    %892 = vector.shape_cast %891 : vector<1x8x128xf32> to vector<8x128xf32>
    %893 = arith.addf %813, %892 : vector<8x128xf32>
    %c6_373 = arith.constant 6 : index
    %c0_374 = arith.constant 0 : index
    %c0_375 = arith.constant 0 : index
    %894 = vector.load %arg5[%c6_373, %c0_374, %c0_375] : memref<8x8x128xf32, #tpu.memory_space<vmem>>, vector<1x8x128xf32>
    %895 = vector.shape_cast %894 : vector<1x8x128xf32> to vector<8x128xf32>
    %896 = arith.addf %844, %895 : vector<8x128xf32>
    %c7_376 = arith.constant 7 : index
    %c0_377 = arith.constant 0 : index
    %c0_378 = arith.constant 0 : index
    %897 = vector.load %arg5[%c7_376, %c0_377, %c0_378] : memref<8x8x128xf32, #tpu.memory_space<vmem>>, vector<1x8x128xf32>
    %898 = vector.shape_cast %897 : vector<1x8x128xf32> to vector<8x128xf32>
    %899 = arith.addf %875, %898 : vector<8x128xf32>
    %c0_379 = arith.constant 0 : index
    %c0_380 = arith.constant 0 : index
    %900 = memref.load %arg4[%c0_379, %c0_380] : memref<4x8xf32, #tpu.memory_space<smem>>
    %901 = vector.broadcast %900 : f32 to vector<8x128xf32>
    %902 = arith.mulf %901, %878 : vector<8x128xf32>
    %c0_381 = arith.constant 0 : index
    %c1_382 = arith.constant 1 : index
    %903 = memref.load %arg4[%c0_381, %c1_382] : memref<4x8xf32, #tpu.memory_space<smem>>
    %904 = vector.broadcast %903 : f32 to vector<8x128xf32>
    %905 = arith.mulf %904, %881 : vector<8x128xf32>
    %906 = arith.addf %902, %905 : vector<8x128xf32>
    %c0_383 = arith.constant 0 : index
    %c2_384 = arith.constant 2 : index
    %907 = memref.load %arg4[%c0_383, %c2_384] : memref<4x8xf32, #tpu.memory_space<smem>>
    %908 = vector.broadcast %907 : f32 to vector<8x128xf32>
    %909 = arith.mulf %908, %884 : vector<8x128xf32>
    %910 = arith.addf %906, %909 : vector<8x128xf32>
    %c0_385 = arith.constant 0 : index
    %c3_386 = arith.constant 3 : index
    %911 = memref.load %arg4[%c0_385, %c3_386] : memref<4x8xf32, #tpu.memory_space<smem>>
    %912 = vector.broadcast %911 : f32 to vector<8x128xf32>
    %913 = arith.mulf %912, %887 : vector<8x128xf32>
    %914 = arith.addf %910, %913 : vector<8x128xf32>
    %c0_387 = arith.constant 0 : index
    %c4_388 = arith.constant 4 : index
    %915 = memref.load %arg4[%c0_387, %c4_388] : memref<4x8xf32, #tpu.memory_space<smem>>
    %916 = vector.broadcast %915 : f32 to vector<8x128xf32>
    %917 = arith.mulf %916, %890 : vector<8x128xf32>
    %918 = arith.addf %914, %917 : vector<8x128xf32>
    %c0_389 = arith.constant 0 : index
    %c5_390 = arith.constant 5 : index
    %919 = memref.load %arg4[%c0_389, %c5_390] : memref<4x8xf32, #tpu.memory_space<smem>>
    %920 = vector.broadcast %919 : f32 to vector<8x128xf32>
    %921 = arith.mulf %920, %893 : vector<8x128xf32>
    %922 = arith.addf %918, %921 : vector<8x128xf32>
    %c0_391 = arith.constant 0 : index
    %c6_392 = arith.constant 6 : index
    %923 = memref.load %arg4[%c0_391, %c6_392] : memref<4x8xf32, #tpu.memory_space<smem>>
    %924 = vector.broadcast %923 : f32 to vector<8x128xf32>
    %925 = arith.mulf %924, %896 : vector<8x128xf32>
    %926 = arith.addf %922, %925 : vector<8x128xf32>
    %c0_393 = arith.constant 0 : index
    %c7_394 = arith.constant 7 : index
    %927 = memref.load %arg4[%c0_393, %c7_394] : memref<4x8xf32, #tpu.memory_space<smem>>
    %928 = vector.broadcast %927 : f32 to vector<8x128xf32>
    %929 = arith.mulf %928, %899 : vector<8x128xf32>
    %930 = arith.addf %926, %929 : vector<8x128xf32>
    %c1_395 = arith.constant 1 : index
    %c0_396 = arith.constant 0 : index
    %931 = memref.load %arg4[%c1_395, %c0_396] : memref<4x8xf32, #tpu.memory_space<smem>>
    %932 = vector.broadcast %931 : f32 to vector<8x128xf32>
    %933 = arith.mulf %932, %878 : vector<8x128xf32>
    %c1_397 = arith.constant 1 : index
    %c1_398 = arith.constant 1 : index
    %934 = memref.load %arg4[%c1_397, %c1_398] : memref<4x8xf32, #tpu.memory_space<smem>>
    %935 = vector.broadcast %934 : f32 to vector<8x128xf32>
    %936 = arith.mulf %935, %881 : vector<8x128xf32>
    %937 = arith.addf %933, %936 : vector<8x128xf32>
    %c1_399 = arith.constant 1 : index
    %c2_400 = arith.constant 2 : index
    %938 = memref.load %arg4[%c1_399, %c2_400] : memref<4x8xf32, #tpu.memory_space<smem>>
    %939 = vector.broadcast %938 : f32 to vector<8x128xf32>
    %940 = arith.mulf %939, %884 : vector<8x128xf32>
    %941 = arith.addf %937, %940 : vector<8x128xf32>
    %c1_401 = arith.constant 1 : index
    %c3_402 = arith.constant 3 : index
    %942 = memref.load %arg4[%c1_401, %c3_402] : memref<4x8xf32, #tpu.memory_space<smem>>
    %943 = vector.broadcast %942 : f32 to vector<8x128xf32>
    %944 = arith.mulf %943, %887 : vector<8x128xf32>
    %945 = arith.addf %941, %944 : vector<8x128xf32>
    %c1_403 = arith.constant 1 : index
    %c4_404 = arith.constant 4 : index
    %946 = memref.load %arg4[%c1_403, %c4_404] : memref<4x8xf32, #tpu.memory_space<smem>>
    %947 = vector.broadcast %946 : f32 to vector<8x128xf32>
    %948 = arith.mulf %947, %890 : vector<8x128xf32>
    %949 = arith.addf %945, %948 : vector<8x128xf32>
    %c1_405 = arith.constant 1 : index
    %c5_406 = arith.constant 5 : index
    %950 = memref.load %arg4[%c1_405, %c5_406] : memref<4x8xf32, #tpu.memory_space<smem>>
    %951 = vector.broadcast %950 : f32 to vector<8x128xf32>
    %952 = arith.mulf %951, %893 : vector<8x128xf32>
    %953 = arith.addf %949, %952 : vector<8x128xf32>
    %c1_407 = arith.constant 1 : index
    %c6_408 = arith.constant 6 : index
    %954 = memref.load %arg4[%c1_407, %c6_408] : memref<4x8xf32, #tpu.memory_space<smem>>
    %955 = vector.broadcast %954 : f32 to vector<8x128xf32>
    %956 = arith.mulf %955, %896 : vector<8x128xf32>
    %957 = arith.addf %953, %956 : vector<8x128xf32>
    %c1_409 = arith.constant 1 : index
    %c7_410 = arith.constant 7 : index
    %958 = memref.load %arg4[%c1_409, %c7_410] : memref<4x8xf32, #tpu.memory_space<smem>>
    %959 = vector.broadcast %958 : f32 to vector<8x128xf32>
    %960 = arith.mulf %959, %899 : vector<8x128xf32>
    %961 = arith.addf %957, %960 : vector<8x128xf32>
    %c2_411 = arith.constant 2 : index
    %c0_412 = arith.constant 0 : index
    %962 = memref.load %arg4[%c2_411, %c0_412] : memref<4x8xf32, #tpu.memory_space<smem>>
    %963 = vector.broadcast %962 : f32 to vector<8x128xf32>
    %964 = arith.mulf %963, %878 : vector<8x128xf32>
    %c2_413 = arith.constant 2 : index
    %c1_414 = arith.constant 1 : index
    %965 = memref.load %arg4[%c2_413, %c1_414] : memref<4x8xf32, #tpu.memory_space<smem>>
    %966 = vector.broadcast %965 : f32 to vector<8x128xf32>
    %967 = arith.mulf %966, %881 : vector<8x128xf32>
    %968 = arith.addf %964, %967 : vector<8x128xf32>
    %c2_415 = arith.constant 2 : index
    %c2_416 = arith.constant 2 : index
    %969 = memref.load %arg4[%c2_415, %c2_416] : memref<4x8xf32, #tpu.memory_space<smem>>
    %970 = vector.broadcast %969 : f32 to vector<8x128xf32>
    %971 = arith.mulf %970, %884 : vector<8x128xf32>
    %972 = arith.addf %968, %971 : vector<8x128xf32>
    %c2_417 = arith.constant 2 : index
    %c3_418 = arith.constant 3 : index
    %973 = memref.load %arg4[%c2_417, %c3_418] : memref<4x8xf32, #tpu.memory_space<smem>>
    %974 = vector.broadcast %973 : f32 to vector<8x128xf32>
    %975 = arith.mulf %974, %887 : vector<8x128xf32>
    %976 = arith.addf %972, %975 : vector<8x128xf32>
    %c2_419 = arith.constant 2 : index
    %c4_420 = arith.constant 4 : index
    %977 = memref.load %arg4[%c2_419, %c4_420] : memref<4x8xf32, #tpu.memory_space<smem>>
    %978 = vector.broadcast %977 : f32 to vector<8x128xf32>
    %979 = arith.mulf %978, %890 : vector<8x128xf32>
    %980 = arith.addf %976, %979 : vector<8x128xf32>
    %c2_421 = arith.constant 2 : index
    %c5_422 = arith.constant 5 : index
    %981 = memref.load %arg4[%c2_421, %c5_422] : memref<4x8xf32, #tpu.memory_space<smem>>
    %982 = vector.broadcast %981 : f32 to vector<8x128xf32>
    %983 = arith.mulf %982, %893 : vector<8x128xf32>
    %984 = arith.addf %980, %983 : vector<8x128xf32>
    %c2_423 = arith.constant 2 : index
    %c6_424 = arith.constant 6 : index
    %985 = memref.load %arg4[%c2_423, %c6_424] : memref<4x8xf32, #tpu.memory_space<smem>>
    %986 = vector.broadcast %985 : f32 to vector<8x128xf32>
    %987 = arith.mulf %986, %896 : vector<8x128xf32>
    %988 = arith.addf %984, %987 : vector<8x128xf32>
    %c2_425 = arith.constant 2 : index
    %c7_426 = arith.constant 7 : index
    %989 = memref.load %arg4[%c2_425, %c7_426] : memref<4x8xf32, #tpu.memory_space<smem>>
    %990 = vector.broadcast %989 : f32 to vector<8x128xf32>
    %991 = arith.mulf %990, %899 : vector<8x128xf32>
    %992 = arith.addf %988, %991 : vector<8x128xf32>
    %c3_427 = arith.constant 3 : index
    %c0_428 = arith.constant 0 : index
    %993 = memref.load %arg4[%c3_427, %c0_428] : memref<4x8xf32, #tpu.memory_space<smem>>
    %994 = vector.broadcast %993 : f32 to vector<8x128xf32>
    %995 = arith.mulf %994, %878 : vector<8x128xf32>
    %c3_429 = arith.constant 3 : index
    %c1_430 = arith.constant 1 : index
    %996 = memref.load %arg4[%c3_429, %c1_430] : memref<4x8xf32, #tpu.memory_space<smem>>
    %997 = vector.broadcast %996 : f32 to vector<8x128xf32>
    %998 = arith.mulf %997, %881 : vector<8x128xf32>
    %999 = arith.addf %995, %998 : vector<8x128xf32>
    %c3_431 = arith.constant 3 : index
    %c2_432 = arith.constant 2 : index
    %1000 = memref.load %arg4[%c3_431, %c2_432] : memref<4x8xf32, #tpu.memory_space<smem>>
    %1001 = vector.broadcast %1000 : f32 to vector<8x128xf32>
    %1002 = arith.mulf %1001, %884 : vector<8x128xf32>
    %1003 = arith.addf %999, %1002 : vector<8x128xf32>
    %c3_433 = arith.constant 3 : index
    %c3_434 = arith.constant 3 : index
    %1004 = memref.load %arg4[%c3_433, %c3_434] : memref<4x8xf32, #tpu.memory_space<smem>>
    %1005 = vector.broadcast %1004 : f32 to vector<8x128xf32>
    %1006 = arith.mulf %1005, %887 : vector<8x128xf32>
    %1007 = arith.addf %1003, %1006 : vector<8x128xf32>
    %c3_435 = arith.constant 3 : index
    %c4_436 = arith.constant 4 : index
    %1008 = memref.load %arg4[%c3_435, %c4_436] : memref<4x8xf32, #tpu.memory_space<smem>>
    %1009 = vector.broadcast %1008 : f32 to vector<8x128xf32>
    %1010 = arith.mulf %1009, %890 : vector<8x128xf32>
    %1011 = arith.addf %1007, %1010 : vector<8x128xf32>
    %c3_437 = arith.constant 3 : index
    %c5_438 = arith.constant 5 : index
    %1012 = memref.load %arg4[%c3_437, %c5_438] : memref<4x8xf32, #tpu.memory_space<smem>>
    %1013 = vector.broadcast %1012 : f32 to vector<8x128xf32>
    %1014 = arith.mulf %1013, %893 : vector<8x128xf32>
    %1015 = arith.addf %1011, %1014 : vector<8x128xf32>
    %c3_439 = arith.constant 3 : index
    %c6_440 = arith.constant 6 : index
    %1016 = memref.load %arg4[%c3_439, %c6_440] : memref<4x8xf32, #tpu.memory_space<smem>>
    %1017 = vector.broadcast %1016 : f32 to vector<8x128xf32>
    %1018 = arith.mulf %1017, %896 : vector<8x128xf32>
    %1019 = arith.addf %1015, %1018 : vector<8x128xf32>
    %c3_441 = arith.constant 3 : index
    %c7_442 = arith.constant 7 : index
    %1020 = memref.load %arg4[%c3_441, %c7_442] : memref<4x8xf32, #tpu.memory_space<smem>>
    %1021 = vector.broadcast %1020 : f32 to vector<8x128xf32>
    %1022 = arith.mulf %1021, %899 : vector<8x128xf32>
    %1023 = arith.addf %1019, %1022 : vector<8x128xf32>
    %1024 = vector.extract_strided_slice %930 {offsets = [0, 0], sizes = [1, 128], strides = [1, 1]} : vector<8x128xf32> to vector<1x128xf32>
    %1025 = vector.broadcast %1024 : vector<1x128xf32> to vector<8x128xf32>
    %1026 = arith.mulf %1025, %327 : vector<8x128xf32>
    %1027 = vector.extract_strided_slice %930 {offsets = [1, 0], sizes = [1, 128], strides = [1, 1]} : vector<8x128xf32> to vector<1x128xf32>
    %1028 = vector.broadcast %1027 : vector<1x128xf32> to vector<8x128xf32>
    %1029 = arith.mulf %1028, %331 : vector<8x128xf32>
    %1030 = arith.addf %1026, %1029 : vector<8x128xf32>
    %1031 = vector.extract_strided_slice %930 {offsets = [2, 0], sizes = [1, 128], strides = [1, 1]} : vector<8x128xf32> to vector<1x128xf32>
    %1032 = vector.broadcast %1031 : vector<1x128xf32> to vector<8x128xf32>
    %1033 = arith.mulf %1032, %335 : vector<8x128xf32>
    %1034 = arith.addf %1030, %1033 : vector<8x128xf32>
    %1035 = vector.extract_strided_slice %930 {offsets = [3, 0], sizes = [1, 128], strides = [1, 1]} : vector<8x128xf32> to vector<1x128xf32>
    %1036 = vector.broadcast %1035 : vector<1x128xf32> to vector<8x128xf32>
    %1037 = arith.mulf %1036, %339 : vector<8x128xf32>
    %1038 = arith.addf %1034, %1037 : vector<8x128xf32>
    %1039 = vector.extract_strided_slice %930 {offsets = [4, 0], sizes = [1, 128], strides = [1, 1]} : vector<8x128xf32> to vector<1x128xf32>
    %1040 = vector.broadcast %1039 : vector<1x128xf32> to vector<8x128xf32>
    %1041 = arith.mulf %1040, %343 : vector<8x128xf32>
    %1042 = arith.addf %1038, %1041 : vector<8x128xf32>
    %1043 = vector.extract_strided_slice %930 {offsets = [5, 0], sizes = [1, 128], strides = [1, 1]} : vector<8x128xf32> to vector<1x128xf32>
    %1044 = vector.broadcast %1043 : vector<1x128xf32> to vector<8x128xf32>
    %1045 = arith.mulf %1044, %347 : vector<8x128xf32>
    %1046 = arith.addf %1042, %1045 : vector<8x128xf32>
    %1047 = vector.extract_strided_slice %930 {offsets = [6, 0], sizes = [1, 128], strides = [1, 1]} : vector<8x128xf32> to vector<1x128xf32>
    %1048 = vector.broadcast %1047 : vector<1x128xf32> to vector<8x128xf32>
    %1049 = arith.mulf %1048, %351 : vector<8x128xf32>
    %1050 = arith.addf %1046, %1049 : vector<8x128xf32>
    %1051 = vector.extract_strided_slice %930 {offsets = [7, 0], sizes = [1, 128], strides = [1, 1]} : vector<8x128xf32> to vector<1x128xf32>
    %1052 = vector.broadcast %1051 : vector<1x128xf32> to vector<8x128xf32>
    %1053 = arith.mulf %1052, %355 : vector<8x128xf32>
    %1054 = arith.addf %1050, %1053 : vector<8x128xf32>
    %1055 = vector.extract_strided_slice %961 {offsets = [0, 0], sizes = [1, 128], strides = [1, 1]} : vector<8x128xf32> to vector<1x128xf32>
    %1056 = vector.broadcast %1055 : vector<1x128xf32> to vector<8x128xf32>
    %1057 = arith.mulf %1056, %327 : vector<8x128xf32>
    %1058 = vector.extract_strided_slice %961 {offsets = [1, 0], sizes = [1, 128], strides = [1, 1]} : vector<8x128xf32> to vector<1x128xf32>
    %1059 = vector.broadcast %1058 : vector<1x128xf32> to vector<8x128xf32>
    %1060 = arith.mulf %1059, %331 : vector<8x128xf32>
    %1061 = arith.addf %1057, %1060 : vector<8x128xf32>
    %1062 = vector.extract_strided_slice %961 {offsets = [2, 0], sizes = [1, 128], strides = [1, 1]} : vector<8x128xf32> to vector<1x128xf32>
    %1063 = vector.broadcast %1062 : vector<1x128xf32> to vector<8x128xf32>
    %1064 = arith.mulf %1063, %335 : vector<8x128xf32>
    %1065 = arith.addf %1061, %1064 : vector<8x128xf32>
    %1066 = vector.extract_strided_slice %961 {offsets = [3, 0], sizes = [1, 128], strides = [1, 1]} : vector<8x128xf32> to vector<1x128xf32>
    %1067 = vector.broadcast %1066 : vector<1x128xf32> to vector<8x128xf32>
    %1068 = arith.mulf %1067, %339 : vector<8x128xf32>
    %1069 = arith.addf %1065, %1068 : vector<8x128xf32>
    %1070 = vector.extract_strided_slice %961 {offsets = [4, 0], sizes = [1, 128], strides = [1, 1]} : vector<8x128xf32> to vector<1x128xf32>
    %1071 = vector.broadcast %1070 : vector<1x128xf32> to vector<8x128xf32>
    %1072 = arith.mulf %1071, %343 : vector<8x128xf32>
    %1073 = arith.addf %1069, %1072 : vector<8x128xf32>
    %1074 = vector.extract_strided_slice %961 {offsets = [5, 0], sizes = [1, 128], strides = [1, 1]} : vector<8x128xf32> to vector<1x128xf32>
    %1075 = vector.broadcast %1074 : vector<1x128xf32> to vector<8x128xf32>
    %1076 = arith.mulf %1075, %347 : vector<8x128xf32>
    %1077 = arith.addf %1073, %1076 : vector<8x128xf32>
    %1078 = vector.extract_strided_slice %961 {offsets = [6, 0], sizes = [1, 128], strides = [1, 1]} : vector<8x128xf32> to vector<1x128xf32>
    %1079 = vector.broadcast %1078 : vector<1x128xf32> to vector<8x128xf32>
    %1080 = arith.mulf %1079, %351 : vector<8x128xf32>
    %1081 = arith.addf %1077, %1080 : vector<8x128xf32>
    %1082 = vector.extract_strided_slice %961 {offsets = [7, 0], sizes = [1, 128], strides = [1, 1]} : vector<8x128xf32> to vector<1x128xf32>
    %1083 = vector.broadcast %1082 : vector<1x128xf32> to vector<8x128xf32>
    %1084 = arith.mulf %1083, %355 : vector<8x128xf32>
    %1085 = arith.addf %1081, %1084 : vector<8x128xf32>
    %1086 = vector.extract_strided_slice %992 {offsets = [0, 0], sizes = [1, 128], strides = [1, 1]} : vector<8x128xf32> to vector<1x128xf32>
    %1087 = vector.broadcast %1086 : vector<1x128xf32> to vector<8x128xf32>
    %1088 = arith.mulf %1087, %327 : vector<8x128xf32>
    %1089 = vector.extract_strided_slice %992 {offsets = [1, 0], sizes = [1, 128], strides = [1, 1]} : vector<8x128xf32> to vector<1x128xf32>
    %1090 = vector.broadcast %1089 : vector<1x128xf32> to vector<8x128xf32>
    %1091 = arith.mulf %1090, %331 : vector<8x128xf32>
    %1092 = arith.addf %1088, %1091 : vector<8x128xf32>
    %1093 = vector.extract_strided_slice %992 {offsets = [2, 0], sizes = [1, 128], strides = [1, 1]} : vector<8x128xf32> to vector<1x128xf32>
    %1094 = vector.broadcast %1093 : vector<1x128xf32> to vector<8x128xf32>
    %1095 = arith.mulf %1094, %335 : vector<8x128xf32>
    %1096 = arith.addf %1092, %1095 : vector<8x128xf32>
    %1097 = vector.extract_strided_slice %992 {offsets = [3, 0], sizes = [1, 128], strides = [1, 1]} : vector<8x128xf32> to vector<1x128xf32>
    %1098 = vector.broadcast %1097 : vector<1x128xf32> to vector<8x128xf32>
    %1099 = arith.mulf %1098, %339 : vector<8x128xf32>
    %1100 = arith.addf %1096, %1099 : vector<8x128xf32>
    %1101 = vector.extract_strided_slice %992 {offsets = [4, 0], sizes = [1, 128], strides = [1, 1]} : vector<8x128xf32> to vector<1x128xf32>
    %1102 = vector.broadcast %1101 : vector<1x128xf32> to vector<8x128xf32>
    %1103 = arith.mulf %1102, %343 : vector<8x128xf32>
    %1104 = arith.addf %1100, %1103 : vector<8x128xf32>
    %1105 = vector.extract_strided_slice %992 {offsets = [5, 0], sizes = [1, 128], strides = [1, 1]} : vector<8x128xf32> to vector<1x128xf32>
    %1106 = vector.broadcast %1105 : vector<1x128xf32> to vector<8x128xf32>
    %1107 = arith.mulf %1106, %347 : vector<8x128xf32>
    %1108 = arith.addf %1104, %1107 : vector<8x128xf32>
    %1109 = vector.extract_strided_slice %992 {offsets = [6, 0], sizes = [1, 128], strides = [1, 1]} : vector<8x128xf32> to vector<1x128xf32>
    %1110 = vector.broadcast %1109 : vector<1x128xf32> to vector<8x128xf32>
    %1111 = arith.mulf %1110, %351 : vector<8x128xf32>
    %1112 = arith.addf %1108, %1111 : vector<8x128xf32>
    %1113 = vector.extract_strided_slice %992 {offsets = [7, 0], sizes = [1, 128], strides = [1, 1]} : vector<8x128xf32> to vector<1x128xf32>
    %1114 = vector.broadcast %1113 : vector<1x128xf32> to vector<8x128xf32>
    %1115 = arith.mulf %1114, %355 : vector<8x128xf32>
    %1116 = arith.addf %1112, %1115 : vector<8x128xf32>
    %1117 = vector.extract_strided_slice %1023 {offsets = [0, 0], sizes = [1, 128], strides = [1, 1]} : vector<8x128xf32> to vector<1x128xf32>
    %1118 = vector.broadcast %1117 : vector<1x128xf32> to vector<8x128xf32>
    %1119 = arith.mulf %1118, %327 : vector<8x128xf32>
    %1120 = vector.extract_strided_slice %1023 {offsets = [1, 0], sizes = [1, 128], strides = [1, 1]} : vector<8x128xf32> to vector<1x128xf32>
    %1121 = vector.broadcast %1120 : vector<1x128xf32> to vector<8x128xf32>
    %1122 = arith.mulf %1121, %331 : vector<8x128xf32>
    %1123 = arith.addf %1119, %1122 : vector<8x128xf32>
    %1124 = vector.extract_strided_slice %1023 {offsets = [2, 0], sizes = [1, 128], strides = [1, 1]} : vector<8x128xf32> to vector<1x128xf32>
    %1125 = vector.broadcast %1124 : vector<1x128xf32> to vector<8x128xf32>
    %1126 = arith.mulf %1125, %335 : vector<8x128xf32>
    %1127 = arith.addf %1123, %1126 : vector<8x128xf32>
    %1128 = vector.extract_strided_slice %1023 {offsets = [3, 0], sizes = [1, 128], strides = [1, 1]} : vector<8x128xf32> to vector<1x128xf32>
    %1129 = vector.broadcast %1128 : vector<1x128xf32> to vector<8x128xf32>
    %1130 = arith.mulf %1129, %339 : vector<8x128xf32>
    %1131 = arith.addf %1127, %1130 : vector<8x128xf32>
    %1132 = vector.extract_strided_slice %1023 {offsets = [4, 0], sizes = [1, 128], strides = [1, 1]} : vector<8x128xf32> to vector<1x128xf32>
    %1133 = vector.broadcast %1132 : vector<1x128xf32> to vector<8x128xf32>
    %1134 = arith.mulf %1133, %343 : vector<8x128xf32>
    %1135 = arith.addf %1131, %1134 : vector<8x128xf32>
    %1136 = vector.extract_strided_slice %1023 {offsets = [5, 0], sizes = [1, 128], strides = [1, 1]} : vector<8x128xf32> to vector<1x128xf32>
    %1137 = vector.broadcast %1136 : vector<1x128xf32> to vector<8x128xf32>
    %1138 = arith.mulf %1137, %347 : vector<8x128xf32>
    %1139 = arith.addf %1135, %1138 : vector<8x128xf32>
    %1140 = vector.extract_strided_slice %1023 {offsets = [6, 0], sizes = [1, 128], strides = [1, 1]} : vector<8x128xf32> to vector<1x128xf32>
    %1141 = vector.broadcast %1140 : vector<1x128xf32> to vector<8x128xf32>
    %1142 = arith.mulf %1141, %351 : vector<8x128xf32>
    %1143 = arith.addf %1139, %1142 : vector<8x128xf32>
    %1144 = vector.extract_strided_slice %1023 {offsets = [7, 0], sizes = [1, 128], strides = [1, 1]} : vector<8x128xf32> to vector<1x128xf32>
    %1145 = vector.broadcast %1144 : vector<1x128xf32> to vector<8x128xf32>
    %1146 = arith.mulf %1145, %355 : vector<8x128xf32>
    %1147 = arith.addf %1143, %1146 : vector<8x128xf32>
    %c0_443 = arith.constant 0 : index
    %c0_444 = arith.constant 0 : index
    %c0_445 = arith.constant 0 : index
    %1148 = vector.load %arg6[%c0_443, %c0_444, %c0_445] : memref<4x8x128xf32, #tpu.memory_space<vmem>>, vector<1x8x128xf32>
    %1149 = vector.shape_cast %1148 : vector<1x8x128xf32> to vector<8x128xf32>
    %1150 = arith.addf %1054, %1149 : vector<8x128xf32>
    %c8_446 = arith.constant 8 : index
    %c0_447 = arith.constant 0 : index
    %c0_448 = arith.constant 0 : index
    %1151 = vector.load %arg1[%c8_446, %c0_447, %c0_448] : memref<12x8x128xf32, #tpu.memory_space<vmem>>, vector<1x8x128xf32>
    %1152 = vector.shape_cast %1151 : vector<1x8x128xf32> to vector<8x128xf32>
    %1153 = arith.addf %1150, %1152 : vector<8x128xf32>
    %c8_449 = arith.constant 8 : index
    %c0_450 = arith.constant 0 : index
    %c0_451 = arith.constant 0 : index
    %1154 = vector.load %arg7[%c8_449, %c0_450, %c0_451] : memref<12x8x128xf32, #tpu.memory_space<vmem>>, vector<1x8x128xf32>
    %1155 = vector.shape_cast %1154 : vector<1x8x128xf32> to vector<8x128xf32>
    %1156 = vector.shape_cast %1153 : vector<8x128xf32> to vector<1x8x128xf32>
    tpu.vector_store %arg7[%c8_449, %c0_450, %c0_451], %1156 {strides = array<i32>} : memref<12x8x128xf32, #tpu.memory_space<vmem>>, vector<1x8x128xf32>,
    %c1_452 = arith.constant 1 : index
    %c0_453 = arith.constant 0 : index
    %c0_454 = arith.constant 0 : index
    %1157 = vector.load %arg6[%c1_452, %c0_453, %c0_454] : memref<4x8x128xf32, #tpu.memory_space<vmem>>, vector<1x8x128xf32>
    %1158 = vector.shape_cast %1157 : vector<1x8x128xf32> to vector<8x128xf32>
    %1159 = arith.addf %1085, %1158 : vector<8x128xf32>
    %c9_455 = arith.constant 9 : index
    %c0_456 = arith.constant 0 : index
    %c0_457 = arith.constant 0 : index
    %1160 = vector.load %arg1[%c9_455, %c0_456, %c0_457] : memref<12x8x128xf32, #tpu.memory_space<vmem>>, vector<1x8x128xf32>
    %1161 = vector.shape_cast %1160 : vector<1x8x128xf32> to vector<8x128xf32>
    %1162 = arith.addf %1159, %1161 : vector<8x128xf32>
    %c9_458 = arith.constant 9 : index
    %c0_459 = arith.constant 0 : index
    %c0_460 = arith.constant 0 : index
    %1163 = vector.load %arg7[%c9_458, %c0_459, %c0_460] : memref<12x8x128xf32, #tpu.memory_space<vmem>>, vector<1x8x128xf32>
    %1164 = vector.shape_cast %1163 : vector<1x8x128xf32> to vector<8x128xf32>
    %1165 = vector.shape_cast %1162 : vector<8x128xf32> to vector<1x8x128xf32>
    tpu.vector_store %arg7[%c9_458, %c0_459, %c0_460], %1165 {strides = array<i32>} : memref<12x8x128xf32, #tpu.memory_space<vmem>>, vector<1x8x128xf32>,
    %c2_461 = arith.constant 2 : index
    %c0_462 = arith.constant 0 : index
    %c0_463 = arith.constant 0 : index
    %1166 = vector.load %arg6[%c2_461, %c0_462, %c0_463] : memref<4x8x128xf32, #tpu.memory_space<vmem>>, vector<1x8x128xf32>
    %1167 = vector.shape_cast %1166 : vector<1x8x128xf32> to vector<8x128xf32>
    %1168 = arith.addf %1116, %1167 : vector<8x128xf32>
    %c10_464 = arith.constant 10 : index
    %c0_465 = arith.constant 0 : index
    %c0_466 = arith.constant 0 : index
    %1169 = vector.load %arg1[%c10_464, %c0_465, %c0_466] : memref<12x8x128xf32, #tpu.memory_space<vmem>>, vector<1x8x128xf32>
    %1170 = vector.shape_cast %1169 : vector<1x8x128xf32> to vector<8x128xf32>
    %1171 = arith.addf %1168, %1170 : vector<8x128xf32>
    %c10_467 = arith.constant 10 : index
    %c0_468 = arith.constant 0 : index
    %c0_469 = arith.constant 0 : index
    %1172 = vector.load %arg7[%c10_467, %c0_468, %c0_469] : memref<12x8x128xf32, #tpu.memory_space<vmem>>, vector<1x8x128xf32>
    %1173 = vector.shape_cast %1172 : vector<1x8x128xf32> to vector<8x128xf32>
    %1174 = vector.shape_cast %1171 : vector<8x128xf32> to vector<1x8x128xf32>
    tpu.vector_store %arg7[%c10_467, %c0_468, %c0_469], %1174 {strides = array<i32>} : memref<12x8x128xf32, #tpu.memory_space<vmem>>, vector<1x8x128xf32>,
    %c3_470 = arith.constant 3 : index
    %c0_471 = arith.constant 0 : index
    %c0_472 = arith.constant 0 : index
    %1175 = vector.load %arg6[%c3_470, %c0_471, %c0_472] : memref<4x8x128xf32, #tpu.memory_space<vmem>>, vector<1x8x128xf32>
    %1176 = vector.shape_cast %1175 : vector<1x8x128xf32> to vector<8x128xf32>
    %1177 = arith.addf %1147, %1176 : vector<8x128xf32>
    %c11_473 = arith.constant 11 : index
    %c0_474 = arith.constant 0 : index
    %c0_475 = arith.constant 0 : index
    %1178 = vector.load %arg1[%c11_473, %c0_474, %c0_475] : memref<12x8x128xf32, #tpu.memory_space<vmem>>, vector<1x8x128xf32>
    %1179 = vector.shape_cast %1178 : vector<1x8x128xf32> to vector<8x128xf32>
    %1180 = arith.addf %1177, %1179 : vector<8x128xf32>
    %c11_476 = arith.constant 11 : index
    %c0_477 = arith.constant 0 : index
    %c0_478 = arith.constant 0 : index
    %1181 = vector.load %arg7[%c11_476, %c0_477, %c0_478] : memref<12x8x128xf32, #tpu.memory_space<vmem>>, vector<1x8x128xf32>
    %1182 = vector.shape_cast %1181 : vector<1x8x128xf32> to vector<8x128xf32>
    %1183 = vector.shape_cast %1180 : vector<8x128xf32> to vector<1x8x128xf32>
    tpu.vector_store %arg7[%c11_476, %c0_477, %c0_478], %1183 {strides = array<i32>} : memref<12x8x128xf32, #tpu.memory_space<vmem>>, vector<1x8x128xf32>,
    return
  }
  func.func @transform_0(%arg0: i32) -> (i32, i32, i32) {
    %c0_i32 = arith.constant 0 : i32
    %c0_i32_0 = arith.constant 0 : i32
    %c0_i32_1 = arith.constant 0 : i32
    return %c0_i32, %c0_i32_0, %arg0 : i32, i32, i32
  }
  func.func @transform_1(%arg0: i32) -> (i32, i32) {
    %c0_i32 = arith.constant 0 : i32
    %c0_i32_0 = arith.constant 0 : i32
    %c0_i32_1 = arith.constant 0 : i32
    return %c0_i32, %c0_i32_0 : i32, i32
  }
  func.func @transform_2(%arg0: i32) -> (i32, i32) {
    %c0_i32 = arith.constant 0 : i32
    %c0_i32_0 = arith.constant 0 : i32
    %c0_i32_1 = arith.constant 0 : i32
    return %c0_i32, %c0_i32_0 : i32, i32
  }
  func.func @transform_3(%arg0: i32) -> (i32, i32) {
    %c0_i32 = arith.constant 0 : i32
    %c0_i32_0 = arith.constant 0 : i32
    %c0_i32_1 = arith.constant 0 : i32
    return %c0_i32, %c0_i32_0 : i32, i32
  }
  func.func @transform_4(%arg0: i32) -> (i32, i32, i32) {
    %c0_i32 = arith.constant 0 : i32
    %c0_i32_0 = arith.constant 0 : i32
    %c0_i32_1 = arith.constant 0 : i32
    %c0_i32_2 = arith.constant 0 : i32
    return %c0_i32, %c0_i32_0, %c0_i32_1 : i32, i32, i32
  }
  func.func @transform_5(%arg0: i32) -> (i32, i32, i32) {
    %c0_i32 = arith.constant 0 : i32
    %c0_i32_0 = arith.constant 0 : i32
    %c0_i32_1 = arith.constant 0 : i32
    %c0_i32_2 = arith.constant 0 : i32
    return %c0_i32, %c0_i32_0, %c0_i32_1 : i32, i32, i32
  }
  func.func @transform_6(%arg0: i32) -> (i32, i32, i32) {
    %c0_i32 = arith.constant 0 : i32
    %c0_i32_0 = arith.constant 0 : i32
    %c0_i32_1 = arith.constant 0 : i32
    return %c0_i32, %c0_i32_0, %arg0 : i32, i32, i32
  }
}

</mosaic_0001>

<bundles_post_ra>
// kernel: tpu_custom_call.1
= control target key start
LH: loop header
LB: loop body
LE: loop exit
PB: predicated region body
PF: predicated region fallthrough
CT: control target
= control target key end

     0   :  { %s2382_s0 = inlined_call_operand.hbm [shape: f32[12,8,128], index: 0, kind: input, shape index: {}]   ;;  %s2383_s1 = inlined_call_operand.vmem [shape: f32[8,4], index: 1, kind: input, shape index: {}]   ;;  %s2384_s2 = inlined_call_operand.vmem [shape: f32[8,8], index: 2, kind: input, shape index: {}]   ;;  %s2385_s3 = inlined_call_operand.vmem [shape: f32[4,8], index: 3, kind: input, shape index: {}]   ;;  %s2386_s4 = inlined_call_operand.hbm [shape: f32[8,8,128], index: 4, kind: input, shape index: {}]   ;;  %s2387_s5 = inlined_call_operand.hbm [shape: f32[4,8,128], index: 5, kind: input, shape index: {}]   ;;  %s2388_s6 = inlined_call_operand.hbm [shape: f32[12,8,128], index: 6, kind: output, shape index: {}]  }
   0x1   :  { %2391 = sst [smem:[#allocation23_spill]] %s2388_s6 }
   0x2   :  { %11 = vsyncpa [#allocation3], 0 }
   0x3   :  { %12 = vsyncpa [#allocation5], 0 }
   0x4   :  { %13 = vsyncpa [#allocation8], 0 }
   0x5   :  { %14 = vsyncpa [#allocation11], 0  ;;  %s43_s23 = sshll.u32 %s2384_s2, 4  ;;  %s44_s23 = int_to_ptr.vmem [resolvable:$true] %s43_s23 }
   0x6   :  { %15 = vsyncpa [#allocation4], 0  ;;  %s1453_s24 = smov [#allocation7]   ;;  %s60_s27 = sshll.u32 %s2386_s4, 4  ;;  %s61_s27 = int_to_ptr.hbm [resolvable:$true] %s60_s27 }
   0x7   :  { %46 = dma.vmem_to_smem %s44_s23, 128, %s1453_s24, [#allocation8]  }
   0x8   :  { %s1454_s28 = smov [#allocation10]   ;;  %s20_s8 = sshll.u32 %s2382_s0, 4  ;;  %s21_s8 = int_to_ptr.hbm [resolvable:$true] %s20_s8 }
   0x9   :  { %s62_s29 = sshll.u32 %s1454_s28, 4  ;;  %s2389_s9 = smov 128   ;;  %s63_s29 = int_to_ptr.vmem [resolvable:$true] %s62_s29 }
   0xa   :  { %s2390_s10 = smov 8   ;;  %s34_s12 = sshll.u32 %s2383_s1, 4  ;;  %s35_s12 = int_to_ptr.vmem [resolvable:$true] %s34_s12 }
   0xb   :  { %68 = dma.hbm_to_vmem [thread:$0]  %s61_s27, 1024, %s63_s29, [#allocation11], %s2389_s9, %s2389_s9, %s2390_s10  }
   0xc   :  { %s1457_s4 = smov [#allocation2]   ;;  %s1458_s0 = smov [#allocation6]  }
   0xd   :  { %s22_s13 = sshll.u32 %s1457_s4, 4  ;;  %s52_s16 = sshll.u32 %s2385_s3, 4  ;;  %s23_s13 = int_to_ptr.vmem [resolvable:$true] %s22_s13  ;;  %s53_s16 = int_to_ptr.vmem [resolvable:$true] %s52_s16 }
   0xe   :  { %28 = dma.hbm_to_vmem [thread:$0]  %s21_s8, 1536, %s23_s13, [#allocation3], %s2389_s9, %s2389_s9, %s2390_s10  }
   0xf   :  { %37 = dma.vmem_to_smem %s35_s12, 128, %s1458_s0, [#allocation5]  }
  0x10   :  { %s73_s19 = sshll.u32 %s2387_s5, 4  ;;  %s1459_s1 = smov [#allocation9]   ;;  %s74_s19 = int_to_ptr.hbm [resolvable:$true] %s73_s19 }
  0x11   :  { %55 = dma.vmem_to_smem %s53_s16, 64, %s1459_s1, [#allocation8]  }
  0x12   :  { %s1460_s20 = smov [#allocation12]  }
  0x13   :  { %s75_s21 = sshll.u32 %s1460_s20, 4  ;;  %s76_s21 = int_to_ptr.vmem [resolvable:$true] %s75_s21 }
  0x14   :  { %81 = dma.hbm_to_vmem [thread:$0]  %s74_s19, 512, %s76_s21, [#allocation11], %s2389_s9, %s2389_s9, %s2390_s10  }
  0x15   :  { %1443 = dma.done.wait [#allocation3], 1536  }
  0x16   :  { %1444 = vsyncadd [#allocation3], 4294965760 }
  0x17   :  { %1445 = dma.done.wait [#allocation5], 128  }
  0x18   :  { %1446 = vsyncadd [#allocation5], 4294967168 }
  0x19   :  { %1447 = dma.done.wait [#allocation8], 192  }
  0x1a   :  { %1448 = vsyncadd [#allocation8], 4294967104 }
  0x1b   :  { %1449 = dma.done.wait [#allocation11], 1536  }
  0x1c   :  { %1450 = vsyncadd [#allocation11], 4294965760 }
  0x1d   :  { %106 = sfence }
  0x1e   :  { %v1524_v0 = vld [vmem:[#allocation2] sm:$0xff]  ;;  %v1526_v1 = vld [vmem:[#allocation2 + $0x8] sm:$0xff]  ;;  %v1528_v2 = vld [vmem:[#allocation2 + $0x10] sm:$0xff]  ;;  %s1532_s3 = sld [smem:[#allocation6]] }
  0x1f   :  { %v1530_v3 = vld [vmem:[#allocation2 + $0x18] sm:$0xff]  ;;  %v1271_v4 = vld [vmem:[#allocation2 + $0x40] ss:$0 sm:$0xff]  ;;  %v1272_v5 = vld [vmem:[#allocation2 + $0x41] ss:$0 sm:$0xff]  ;;  %s1541_s5 = sld [smem:[#allocation6 + $0x1]] }
  0x20   :  { %v1534_v6 = vld [vmem:[#allocation2 + $0x20] sm:$0xff]  ;;  %v125_v8 = vmul.f32 %v1271_v4, %v1524_v0  ;;  %v128_v9 = vmul.f32 %v1272_v5, %v1526_v1  ;;  %v1538_v12 = vld [vmem:[#allocation2 + $0x28] sm:$0xff]  ;;  %v1544_v18 = vld [vmem:[#allocation2 + $0x30] sm:$0xff]  ;;  %s1553_s22 = sld [smem:[#allocation6 + $0x2]] }
  0x21   :  { %v1273_v7 = vld [vmem:[#allocation2 + $0x42] ss:$0 sm:$0xff]  ;;  %v1274_v10 = vld [vmem:[#allocation2 + $0x43] ss:$0 sm:$0xff]  ;;  %v1275_v11 = vld [vmem:[#allocation2 + $0x44] ss:$0 sm:$0xff] }
  0x22   :  { %v132_v13 = vmul.f32 %v1273_v7, %v1528_v2  ;;  %v129_v14 = vadd.f32 %v128_v9, %v125_v8  ;;  %v136_v15 = vmul.f32 %v1274_v10, %v1530_v3  ;;  %v1276_v16 = vld [vmem:[#allocation2 + $0x45] ss:$0 sm:$0xff]  ;;  %v1277_v17 = vld [vmem:[#allocation2 + $0x46] ss:$0 sm:$0xff]  ;;  %v1278_v19 = vld [vmem:[#allocation2 + $0x47] ss:$0 sm:$0xff]  ;;  %v140_v23 = vmul.f32 %v1275_v11, %v1534_v6 }
  0x23   :  { %v1279_v20 = vld [vmem:[#allocation2 + $0x48] ss:$0 sm:$0xff]  ;;  %v1546_v21 = vld [vmem:[#allocation2 + $0x38] sm:$0xff]  ;;  %v1280_v24 = vld [vmem:[#allocation2 + $0x49] ss:$0 sm:$0xff]  ;;  %v144_v29 = vmul.f32 %v1276_v16, %v1538_v12  ;;  %v148_v35 = vmul.f32 %v1277_v17, %v1544_v18  ;;  %s1578_s23 = sld [smem:[#allocation6 + $0x3]] }
  0x24   :  { %v133_v22 = vadd.f32 %v132_v13, %v129_v14  ;;  %v1281_v25 = vld [vmem:[#allocation2 + $0x4a] ss:$0 sm:$0xff]  ;;  %v157_v26 = vmul.f32 %v1279_v20, %v1524_v0  ;;  %v1282_v27 = vld [vmem:[#allocation2 + $0x4b] ss:$0 sm:$0xff]  ;;  %v160_v30 = vmul.f32 %v1280_v24, %v1526_v1  ;;  %v1283_v32 = vld [vmem:[#allocation2 + $0x4c] ss:$0 sm:$0xff]  ;;  %v152_v40 = vmul.f32 %v1278_v19, %v1546_v21 }
  0x25   :  { %v164_v31 = vmul.f32 %v1281_v25, %v1528_v2  ;;  %v1284_v33 = vld [vmem:[#allocation2 + $0x4d] ss:$0 sm:$0xff]  ;;  %v168_v37 = vmul.f32 %v1282_v27, %v1530_v3  ;;  %v1285_v38 = vld [vmem:[#allocation2 + $0x4e] ss:$0 sm:$0xff]  ;;  %v1287_v39 = vld [vmem:[#allocation2 + $0x50] ss:$0 sm:$0xff]  ;;  %v172_v44 = vmul.f32 %v1283_v32, %v1534_v6  ;;  %v251_v9 = vstv %s1532_s3 }
  0x26   :  { %v137_v28 = vadd.f32 %v136_v15, %v133_v22  ;;  %v161_v36 = vadd.f32 %v160_v30, %v157_v26  ;;  %v1288_v41 = vld [vmem:[#allocation2 + $0x51] ss:$0 sm:$0xff]  ;;  %v1286_v45 = vld [vmem:[#allocation2 + $0x4f] ss:$0 sm:$0xff]  ;;  %v189_v46 = vmul.f32 %v1287_v39, %v1524_v0  ;;  %v1289_v47 = vld [vmem:[#allocation2 + $0x52] ss:$0 sm:$0xff]  ;;  %v176_v53 = vmul.f32 %v1284_v33, %v1538_v12 }
  0x27   :  { %v1290_v48 = vld [vmem:[#allocation2 + $0x53] ss:$0 sm:$0xff]  ;;  %v192_v49 = vmul.f32 %v1288_v41, %v1526_v1  ;;  %v1291_v50 = vld [vmem:[#allocation2 + $0x54] ss:$0 sm:$0xff]  ;;  %v196_v54 = vmul.f32 %v1289_v47, %v1528_v2  ;;  %v1292_v55 = vld [vmem:[#allocation2 + $0x55] ss:$0 sm:$0xff]  ;;  %v180_v62 = vmul.f32 %v1285_v38, %v1544_v18  ;;  %v184_v11 = vmul.f32 %v1286_v45, %v1546_v21 }
  0x28   :  { %v141_v34 = vadd.f32 %v140_v23, %v137_v28  ;;  %v165_v43 = vadd.f32 %v164_v31, %v161_v36  ;;  %v1293_v56 = vld [vmem:[#allocation2 + $0x56] ss:$0 sm:$0xff]  ;;  %v200_v58 = vmul.f32 %v1290_v48, %v1530_v3  ;;  %v1294_v59 = vld [vmem:[#allocation2 + $0x57] ss:$0 sm:$0xff]  ;;  %v1295_v63 = vld [vmem:[#allocation2 + $0x58] ss:$0 sm:$0xff]  ;;  %v204_v7 = vmul.f32 %v1291_v50, %v1534_v6 }
  0x29   :  { %v193_v57 = vadd.f32 %v192_v49, %v189_v46  ;;  %v1296_v4 = vld [vmem:[#allocation2 + $0x59] ss:$0 sm:$0xff]  ;;  %v1297_v8 = vld [vmem:[#allocation2 + $0x5a] ss:$0 sm:$0xff]  ;;  %v221_v13 = vmul.f32 %v1295_v63, %v1524_v0  ;;  %v1298_v15 = vld [vmem:[#allocation2 + $0x5b] ss:$0 sm:$0xff]  ;;  %v208_v19 = vmul.f32 %v1292_v55, %v1538_v12  ;;  %v254_v23 = vstv %s1541_s5 }
  0x2a   :  { %v145_v42 = vadd.f32 %v144_v29, %v141_v34  ;;  %v169_v52 = vadd.f32 %v168_v37, %v165_v43  ;;  %v224_v14 = vmul.f32 %v1296_v4, %v1526_v1  ;;  %v1299_v16 = vld [vmem:[#allocation2 + $0x5c] ss:$0 sm:$0xff]  ;;  %v228_v20 = vmul.f32 %v1297_v8, %v1528_v2  ;;  %v1300_v22 = vld [vmem:[#allocation2 + $0x5d] ss:$0 sm:$0xff]  ;;  %v1301_v30 = vld [vmem:[#allocation2 + $0x5e] ss:$0 sm:$0xff] }
  0x2b   :  { %v197_v5 = vadd.f32 %v196_v54, %v193_v57  ;;  %v212_v25 = vmul.f32 %v1293_v56, %v1544_v18  ;;  %v232_v27 = vmul.f32 %v1298_v15, %v1530_v3  ;;  %v216_v29 = vmul.f32 %v1294_v59, %v1546_v21  ;;  %s1586_s24 = sld [smem:[#allocation6 + $0x80]]  ;;  %v1302_v39 = vld [vmem:[#allocation2 + $0x5f] ss:$0 sm:$0xff] }
  0x2c   :  { %v149_v51 = vadd.f32 %v148_v35, %v145_v42  ;;  %v173_v61 = vadd.f32 %v172_v44, %v169_v52  ;;  %v225_v26 = vadd.f32 %v224_v14, %v221_v13  ;;  %v386_v31 = vmax.f32 %v1524_v0, 0.0  ;;  %s1589_s25 = sld [smem:[#allocation6 + $0x81]] }
  0x2d   :  { %v201_v17 = vadd.f32 %v200_v58, %v197_v5  ;;  %v388_v32 = vmax.f32 %v1526_v1, 0.0  ;;  %v236_v35 = vmul.f32 %v1299_v16, %v1534_v6  ;;  %v240_v38 = vmul.f32 %v1300_v22, %v1538_v12  ;;  %s1595_s26 = sld [smem:[#allocation6 + $0x82]] }
  0x2e   :  { %v1564_v60 = vadd.f32 %v152_v40, %v149_v51  ;;  %v177_v10 = vadd.f32 %v176_v53, %v173_v61  ;;  %v229_v34 = vadd.f32 %v228_v20, %v225_v26  ;;  %v1591_v40 = vmin.f32 %v386_v31, 6.0  ;;  %s1602_s27 = sld [smem:[#allocation6 + $0x83]] }
  0x2f   :  { %v205_v28 = vadd.f32 %v204_v7, %v201_v17  ;;  %v390_v0 = vmax.f32 %v1528_v2, 0.0  ;;  %v1597_v42 = vmin.f32 %v388_v32, 6.0  ;;  %v392_v43 = vmax.f32 %v1530_v3, 0.0  ;;  %s1607_s28 = sld [smem:[#allocation6 + $0x100]] }
  0x30   :  { %v181_v24 = vadd.f32 %v180_v62, %v177_v10  ;;  %v252_v36 = vmul.f32 %v251_v9, %v1564_v60  ;;  %v233_v1 = vadd.f32 %v232_v27, %v229_v34  ;;  %v244_v45 = vmul.f32 %v1301_v30, %v1544_v18  ;;  %402 = vst [vmem:[#allocation13] sm:$0xff] %v1591_v40  ;;  %s1616_s29 = sld [smem:[#allocation6 + $0x101]] }
  0x31   :  { %v209_v37 = vadd.f32 %v208_v19, %v205_v28  ;;  %v258_v46 = vstv %s1553_s22  ;;  %v1604_v47 = vmin.f32 %v390_v0, 6.0  ;;  %v1609_v49 = vmin.f32 %v392_v43, 6.0  ;;  %404 = vst [vmem:[#allocation13 + $0x8] sm:$0xff] %v1597_v42  ;;  %s1620_s30 = sld [smem:[#allocation6 + $0x102]] }
  0x32   :  { %v1582_v33 = vadd.f32 %v184_v11, %v181_v24  ;;  %v237_v2 = vadd.f32 %v236_v35, %v233_v1  ;;  %v394_v3 = vmax.f32 %v1534_v6, 0.0  ;;  %v248_v51 = vmul.f32 %v1302_v39, %v1546_v21  ;;  %s1630_s7 = sld [smem:[#allocation6 + $0x103]] }
  0x33   :  { %v213_v44 = vadd.f32 %v212_v25, %v209_v37  ;;  %406 = vst [vmem:[#allocation13 + $0x10] sm:$0xff] %v1604_v47  ;;  %v266_v53 = vstv %s1586_s24  ;;  %v396_v6 = vmax.f32 %v1538_v12, 0.0  ;;  %v262_v56 = vstv %s1578_s23  ;;  %s1634_s8 = sld [smem:[#allocation6 + $0x180]] }
  0x34   :  { %v255_v41 = vmul.f32 %v254_v23, %v1582_v33  ;;  %v241_v52 = vadd.f32 %v240_v38, %v237_v2  ;;  %v1622_v54 = vmin.f32 %v394_v3, 6.0  ;;  %408 = vst [vmem:[#allocation13 + $0x18] sm:$0xff] %v1609_v49  ;;  %v267_v57 = vmul.f32 %v266_v53, %v1564_v60  ;;  %s1641_s2 = sld [smem:[#allocation6 + $0x181]] }
  0x35   :  { %v1613_v50 = vadd.f32 %v216_v29, %v213_v44  ;;  %v269_v58 = vstv %s1589_s25  ;;  %v273_v62 = vstv %s1595_s26  ;;  %v1636_v63 = vmin.f32 %v396_v6, 6.0  ;;  %s1647_s11 = sld [smem:[#allocation6 + $0x182]] }
  0x36   :  { %v256_v48 = vadd.f32 %v255_v41, %v252_v36  ;;  %v245_v59 = vadd.f32 %v244_v45, %v241_v52  ;;  %v270_v61 = vmul.f32 %v269_v58, %v1582_v33  ;;  %410 = vst [vmem:[#allocation13 + $0x20] sm:$0xff] %v1622_v54  ;;  %v277_v5 = vstv %s1602_s27  ;;  %s1653_s12 = sld [smem:[#allocation6 + $0x183]] }
  0x37   :  { %v259_v55 = vmul.f32 %v258_v46, %v1613_v50  ;;  %v274_v4 = vmul.f32 %v273_v62, %v1613_v50  ;;  %v398_v7 = vmax.f32 %v1544_v18, 0.0  ;;  %v281_v10 = vstv %s1607_s28  ;;  %412 = vst [vmem:[#allocation13 + $0x28] sm:$0xff] %v1636_v63  ;;  %s1152_s4 = sld [smem:[#allocation6 + $0x200]] }
  0x38   :  { %v1644_v8 = vadd.f32 %v248_v51, %v245_v59  ;;  %v271_v9 = vadd.f32 %v270_v61, %v267_v57  ;;  %v400_v11 = vmax.f32 %v1546_v21, 0.0  ;;  %v282_v13 = vmul.f32 %v281_v10, %v1564_v60  ;;  %s1662_s13 = sld [smem:[#allocation6 + $0x201]] }
  0x39   :  { %v260_v12 = vadd.f32 %v259_v55, %v256_v48  ;;  %v284_v14 = vstv %s1616_s29  ;;  %v1655_v15 = vmin.f32 %v398_v7, 6.0  ;;  %v288_v21 = vstv %s1620_s30  ;;  %s1154_s0 = sld [smem:[#allocation6 + $0x202]] }
  0x3a   :  { %v263_v18 = vmul.f32 %v262_v56, %v1644_v8  ;;  %v275_v16 = vadd.f32 %v274_v4, %v271_v9  ;;  %v278_v17 = vmul.f32 %v277_v5, %v1644_v8  ;;  %v285_v19 = vmul.f32 %v284_v14, %v1582_v33  ;;  %s1671_s14 = sld [smem:[#allocation6 + $0x203]] }
  0x3b   :  { %v292_v20 = vstv %s1630_s7  ;;  %v1664_v22 = vmin.f32 %v400_v11, 6.0  ;;  %414 = vst [vmem:[#allocation13 + $0x30] sm:$0xff] %v1655_v15  ;;  %v289_v26 = vmul.f32 %v288_v21, %v1613_v50  ;;  %v296_v28 = vstv %s1634_s8  ;;  %s1156_s15 = sld [smem:[#allocation6 + $0x280]] }
  0x3c   :  { %v264_v23 = vadd.f32 %v263_v18, %v260_v12  ;;  %v279_v24 = vadd.f32 %v278_v17, %v275_v16  ;;  %v286_v25 = vadd.f32 %v285_v19, %v282_v13  ;;  %v293_v27 = vmul.f32 %v292_v20, %v1644_v8  ;;  %s1679_s16 = sld [smem:[#allocation6 + $0x281]] }
  0x3d   :  { %v299_v29 = vstv %s1641_s2  ;;  %416 = vst [vmem:[#allocation13 + $0x38] sm:$0xff] %v1664_v22  ;;  %v297_v31 = vmul.f32 %v296_v28, %v1564_v60  ;;  %v303_v34 = vstv %s1647_s11  ;;  %v307_v36 = vstv %s1653_s12  ;;  %s1682_s17 = sld [smem:[#allocation6 + $0x282]] }
  0x3e   :  { %v290_v30 = vadd.f32 %v289_v26, %v286_v25  ;;  %v300_v32 = vmul.f32 %v299_v29, %v1582_v33  ;;  %v304_v35 = vmul.f32 %v303_v34, %v1613_v50  ;;  %v370_v37 = vmax.f32 %v264_v23, 0.0  ;;  %s1686_s18 = sld [smem:[#allocation6 + $0x283]] }
  0x3f   :  { %v308_v0 = vmul.f32 %v307_v36, %v1644_v8  ;;  %v311_v1 = vstv %s1152_s4  ;;  %v314_v43 = vstv %s1662_s13  ;;  %v372_v45 = vmax.f32 %v279_v24, 0.0  ;;  %s1691_s19 = sld [smem:[#allocation6 + $0x300]] }
  0x40   :  { %v294_v38 = vadd.f32 %v293_v27, %v290_v30  ;;  %v301_v39 = vadd.f32 %v300_v32, %v297_v31  ;;  %v312_v41 = vmul.f32 %v311_v1, %v1564_v60  ;;  %v1688_v44 = vmin.f32 %v370_v37, 6.0  ;;  %s1695_s1 = sld [smem:[#allocation6 + $0x301]] }
  0x41   :  { %v315_v2 = vmul.f32 %v314_v43, %v1582_v33  ;;  %v318_v48 = vstv %s1154_s0  ;;  %v322_v52 = vstv %s1671_s14  ;;  %v326_v58 = vstv %s1156_s15  ;;  %s1162_s20 = sld [smem:[#allocation6 + $0x302]] }
  0x42   :  { %v305_v46 = vadd.f32 %v304_v35, %v301_v39  ;;  %v374_v3 = vmax.f32 %v294_v38, 0.0  ;;  %v319_v51 = vmul.f32 %v318_v48, %v1613_v50  ;;  %v417_v53 = vperm.slane %v1688_v44, 0  ;;  %s1702_s21 = sld [smem:[#allocation6 + $0x303]] }
  0x43   :  { %v419_v6 = vperm.slane %v1688_v44, 1  ;;  %v316_v56 = vadd.f32 %v315_v2, %v312_v41  ;;  %v323_v57 = vmul.f32 %v322_v52, %v1644_v8  ;;  %v327_v59 = vmul.f32 %v326_v58, %v1564_v60  ;;  %s1164_s3 = sld [smem:[#allocation6 + $0x380]] }
  0x44   :  { %v309_v55 = vadd.f32 %v308_v0, %v305_v46  ;;  %v329_v61 = vstv %s1679_s16  ;;  %v1704_v62 = vmin.f32 %v372_v45, 6.0  ;;  %v418_v12 = vmul.f32 %v417_v53, %v1591_v40  ;;  %s1165_s5 = sld [smem:[#allocation6 + $0x381]] }
  0x45   :  { %v320_v4 = vadd.f32 %v319_v51, %v316_v56  ;;  %v330_v5 = vmul.f32 %v329_v61, %v1582_v33  ;;  %v333_v7 = vstv %s1682_s17  ;;  %v1709_v9 = vmin.f32 %v374_v3, 6.0  ;;  %s1166_s22 = sld [smem:[#allocation6 + $0x382]] }
  0x46   :  { %v334_v10 = vmul.f32 %v333_v7, %v1613_v50  ;;  %v337_v11 = vstv %s1686_s18  ;;  %v420_v13 = vmul.f32 %v419_v6, %v1597_v42  ;;  %v422_v14 = vperm.slane %v1688_v44, 2  ;;  %s1167_s23 = sld [smem:[#allocation6 + $0x383]] }
  0x47   :  { %v324_v18 = vadd.f32 %v323_v57, %v320_v4  ;;  %v331_v16 = vadd.f32 %v330_v5, %v327_v59  ;;  %v338_v17 = vmul.f32 %v337_v11, %v1644_v8  ;;  %v341_v19 = vstv %s1691_s19  ;;  %s1772_s24 = sld [smem:[#allocation7]] }
  0x48   :  { %v342_v21 = vmul.f32 %v341_v19, %v1564_v60  ;;  %v344_v20 = vstv %s1695_s1  ;;  %v376_v23 = vmax.f32 %v309_v55, 0.0  ;;  %v421_v24 = vadd.f32 %v420_v13, %v418_v12  ;;  %s1778_s25 = sld [smem:[#allocation7 + $0x1]] }
  0x49   :  { %v335_v25 = vadd.f32 %v334_v10, %v331_v16  ;;  %v345_v26 = vmul.f32 %v344_v20, %v1582_v33  ;;  %v348_v27 = vstv %s1162_s20  ;;  %v378_v28 = vmax.f32 %v324_v18, 0.0  ;;  %s1783_s26 = sld [smem:[#allocation7 + $0x2]] }
  0x4a   :  { %v349_v29 = vmul.f32 %v348_v27, %v1613_v50  ;;  %v352_v30 = vstv %s1702_s21  ;;  %v423_v31 = vmul.f32 %v422_v14, %v1604_v47  ;;  %v425_v32 = vperm.slane %v1688_v44, 3  ;;  %s1788_s27 = sld [smem:[#allocation7 + $0x3]] }
  0x4b   :  { %v339_v34 = vadd.f32 %v338_v17, %v335_v25  ;;  %v346_v35 = vadd.f32 %v345_v26, %v342_v21  ;;  %v353_v36 = vmul.f32 %v352_v30, %v1644_v8  ;;  %v356_v37 = vstv %s1164_s3  ;;  %s1793_s28 = sld [smem:[#allocation7 + $0x4]] }
  0x4c   :  { %v357_v38 = vmul.f32 %v356_v37, %v1564_v60  ;;  %v359_v39 = vstv %s1165_s5  ;;  %v1726_v0 = vmin.f32 %v376_v23, 6.0  ;;  %v424_v1 = vadd.f32 %v423_v31, %v421_v24  ;;  %s1798_s29 = sld [smem:[#allocation7 + $0x5]] }
  0x4d   :  { %v350_v41 = vadd.f32 %v349_v29, %v346_v35  ;;  %v360_v43 = vmul.f32 %v359_v39, %v1582_v33  ;;  %v363_v45 = vstv %s1166_s22  ;;  %v380_v46 = vmax.f32 %v339_v34, 0.0  ;;  %s1803_s30 = sld [smem:[#allocation7 + $0x6]] }
  0x4e   :  { %v364_v2 = vmul.f32 %v363_v45, %v1613_v50  ;;  %v367_v48 = vstv %s1167_s23  ;;  %v426_v3 = vmul.f32 %v425_v32, %v1609_v49  ;;  %v428_v51 = vperm.slane %v1688_v44, 4  ;;  %s1807_s7 = sld [smem:[#allocation7 + $0x7]] }
  0x4f   :  { %v354_v52 = vadd.f32 %v353_v36, %v350_v41  ;;  %v361_v53 = vadd.f32 %v360_v43, %v357_v38  ;;  %v368_v60 = vmul.f32 %v367_v48, %v1644_v8  ;;  %v1733_v6 = vmin.f32 %v378_v28, 6.0  ;;  %s1814_s8 = sld [smem:[#allocation7 + $0x80]] }
  0x50   :  { %v427_v55 = vadd.f32 %v426_v3, %v424_v1  ;;  %v429_v56 = vmul.f32 %v428_v51, %v1622_v54  ;;  %v431_v33 = vperm.slane %v1688_v44, 5  ;;  %v434_v57 = vperm.slane %v1688_v44, 6  ;;  %s1818_s2 = sld [smem:[#allocation7 + $0x81]] }
  0x51   :  { %v365_v58 = vadd.f32 %v364_v2, %v361_v53  ;;  %v1738_v50 = vmin.f32 %v380_v46, 6.0  ;;  %v437_v59 = vperm.slane %v1688_v44, 7  ;;  %v440_v61 = vperm.slane %v1704_v62, 0  ;;  %s1824_s11 = sld [smem:[#allocation7 + $0x82]] }
  0x52   :  { %v430_v12 = vadd.f32 %v429_v56, %v427_v55  ;;  %v432_v4 = vmul.f32 %v431_v33, %v1636_v63  ;;  %v435_v8 = vmul.f32 %v434_v57, %v1655_v15  ;;  %v442_v5 = vperm.slane %v1704_v62, 1  ;;  %s1828_s12 = sld [smem:[#allocation7 + $0x83]] }
  0x53   :  { %v369_v7 = vadd.f32 %v368_v60, %v365_v58  ;;  %v382_v10 = vmax.f32 %v354_v52, 0.0  ;;  %v438_v11 = vmul.f32 %v437_v59, %v1664_v22  ;;  %v441_v13 = vmul.f32 %v440_v61, %v1591_v40  ;;  %s1834_s4 = sld [smem:[#allocation7 + $0x84]] }
  0x54   :  { %v433_v14 = vadd.f32 %v432_v4, %v430_v12  ;;  %v443_v18 = vmul.f32 %v442_v5, %v1597_v42  ;;  %v445_v44 = vperm.slane %v1704_v62, 2  ;;  %v448_v16 = vperm.slane %v1704_v62, 3  ;;  %s1838_s13 = sld [smem:[#allocation7 + $0x85]] }
  0x55   :  { %v384_v17 = vmax.f32 %v369_v7, 0.0  ;;  %v451_v19 = vperm.slane %v1704_v62, 4  ;;  %v454_v21 = vperm.slane %v1704_v62, 5  ;;  %v457_v20 = vperm.slane %v1704_v62, 6  ;;  %s1843_s0 = sld [smem:[#allocation7 + $0x86]] }
  0x56   :  { %v436_v23 = vadd.f32 %v435_v8, %v433_v14  ;;  %v444_v24 = vadd.f32 %v443_v18, %v441_v13  ;;  %v446_v25 = vmul.f32 %v445_v44, %v1604_v47  ;;  %v449_v26 = vmul.f32 %v448_v16, %v1609_v49  ;;  %s1848_s14 = sld [smem:[#allocation7 + $0x87]] }
  0x57   :  { %v1755_v27 = vmin.f32 %v382_v10, 6.0  ;;  %v1757_v28 = vmin.f32 %v384_v17, 6.0  ;;  %v452_v29 = vmul.f32 %v451_v19, %v1622_v54  ;;  %v455_v30 = vmul.f32 %v454_v21, %v1636_v63  ;;  %s1854_s15 = sld [smem:[#allocation7 + $0x100]] }
  0x58   :  { %v447_v31 = vadd.f32 %v446_v25, %v444_v24  ;;  %v458_v32 = vmul.f32 %v457_v20, %v1655_v15  ;;  %v460_v34 = vperm.slane %v1704_v62, 7  ;;  %v463_v35 = vperm.slane %v1709_v9, 0  ;;  %s1859_s16 = sld [smem:[#allocation7 + $0x101]] }
  0x59   :  { %v465_v36 = vperm.slane %v1709_v9, 1  ;;  %v468_v37 = vperm.slane %v1709_v9, 2  ;;  %v471_v38 = vperm.slane %v1709_v9, 3  ;;  %v474_v39 = vperm.slane %v1709_v9, 4  ;;  %s1864_s17 = sld [smem:[#allocation7 + $0x102]] }
  0x5a   :  { %v1768_v1 = vadd.f32 %v438_v11, %v436_v23  ;;  %v450_v41 = vadd.f32 %v449_v26, %v447_v31  ;;  %v464_v43 = vmul.f32 %v463_v35, %v1591_v40  ;;  %v477_v45 = vperm.slane %v1709_v9, 5  ;;  %s1870_s18 = sld [smem:[#allocation7 + $0x103]] }
  0x5b   :  { %v461_v62 = vmul.f32 %v460_v34, %v1664_v22  ;;  %v466_v46 = vmul.f32 %v465_v36, %v1597_v42  ;;  %v469_v2 = vmul.f32 %v468_v37, %v1604_v47  ;;  %v472_v48 = vmul.f32 %v471_v38, %v1609_v49  ;;  %s1875_s19 = sld [smem:[#allocation7 + $0x104]] }
  0x5c   :  { %v453_v3 = vadd.f32 %v452_v29, %v450_v41  ;;  %v475_v51 = vmul.f32 %v474_v39, %v1622_v54  ;;  %v480_v52 = vperm.slane %v1709_v9, 6  ;;  %v483_v53 = vperm.slane %v1709_v9, 7  ;;  %s1880_s1 = sld [smem:[#allocation7 + $0x105]] }
  0x5d   :  { %v467_v60 = vadd.f32 %v466_v46, %v464_v43  ;;  %v486_v55 = vperm.slane %v1726_v0, 0  ;;  %v488_v56 = vperm.slane %v1726_v0, 1  ;;  %v491_v33 = vperm.slane %v1726_v0, 2  ;;  %s1885_s20 = sld [smem:[#allocation7 + $0x106]] }
  0x5e   :  { %v456_v57 = vadd.f32 %v455_v30, %v453_v3  ;;  %v478_v58 = vmul.f32 %v477_v45, %v1636_v63  ;;  %v481_v59 = vmul.f32 %v480_v52, %v1655_v15  ;;  %v494_v61 = vperm.slane %v1726_v0, 3  ;;  %s1890_s21 = sld [smem:[#allocation7 + $0x107]] }
  0x5f   :  { %v470_v9 = vadd.f32 %v469_v2, %v467_v60  ;;  %v487_v12 = vmul.f32 %v486_v55, %v1591_v40  ;;  %v489_v4 = vmul.f32 %v488_v56, %v1597_v42  ;;  %v492_v8 = vmul.f32 %v491_v33, %v1604_v47  ;;  %s1895_s3 = sld [smem:[#allocation7 + $0x180]] }
  0x60   :  { %v459_v5 = vadd.f32 %v458_v32, %v456_v57  ;;  %v484_v7 = vmul.f32 %v483_v53, %v1664_v22  ;;  %v497_v10 = vperm.slane %v1726_v0, 4  ;;  %v500_v11 = vperm.slane %v1726_v0, 5  ;;  %s1899_s5 = sld [smem:[#allocation7 + $0x181]] }
  0x61   :  { %v473_v13 = vadd.f32 %v472_v48, %v470_v9  ;;  %v490_v14 = vadd.f32 %v489_v4, %v487_v12  ;;  %v495_v18 = vmul.f32 %v494_v61, %v1609_v49  ;;  %v503_v44 = vperm.slane %v1726_v0, 6  ;;  %s1906_s22 = sld [smem:[#allocation7 + $0x182]] }
  0x62   :  { %v1809_v16 = vadd.f32 %v461_v62, %v459_v5  ;;  %v498_v17 = vmul.f32 %v497_v10, %v1622_v54  ;;  %v506_v19 = vperm.slane %v1726_v0, 7  ;;  %v509_v21 = vperm.slane %v1733_v6, 0  ;;  %s1910_s23 = sld [smem:[#allocation7 + $0x183]] }
  0x63   :  { %v476_v20 = vadd.f32 %v475_v51, %v473_v13  ;;  %v493_v23 = vadd.f32 %v492_v8, %v490_v14  ;;  %v501_v24 = vmul.f32 %v500_v11, %v1636_v63  ;;  %v504_v25 = vmul.f32 %v503_v44, %v1655_v15  ;;  %s1916_s9 = sld [smem:[#allocation7 + $0x184]] }
  0x64   :  { %v510_v26 = vmul.f32 %v509_v21, %v1591_v40  ;;  %v511_v29 = vperm.slane %v1733_v6, 1  ;;  %v514_v30 = vperm.slane %v1733_v6, 2  ;;  %v517_v0 = vperm.slane %v1733_v6, 3  ;;  %s1920_s10 = sld [smem:[#allocation7 + $0x185]] }
  0x65   :  { %v479_v31 = vadd.f32 %v478_v58, %v476_v20  ;;  %v496_v32 = vadd.f32 %v495_v18, %v493_v23  ;;  %v520_v34 = vperm.slane %v1733_v6, 4  ;;  %v523_v35 = vperm.slane %v1733_v6, 5  ;;  %s1925_s6 = sld [smem:[#allocation7 + $0x186]] }
  0x66   :  { %v507_v36 = vmul.f32 %v506_v19, %v1664_v22  ;;  %v512_v37 = vmul.f32 %v511_v29, %v1597_v42  ;;  %v515_v38 = vmul.f32 %v514_v30, %v1604_v47  ;;  %v526_v39 = vperm.slane %v1733_v6, 6 }
  0x67   :  { %v482_v41 = vadd.f32 %v481_v59, %v479_v31  ;;  %v499_v43 = vadd.f32 %v498_v17, %v496_v32  ;;  %v518_v45 = vmul.f32 %v517_v0, %v1609_v49  ;;  %v521_v62 = vmul.f32 %v520_v34, %v1622_v54 }
  0x68   :  { %v513_v46 = vadd.f32 %v512_v37, %v510_v26  ;;  %v524_v2 = vmul.f32 %v523_v35, %v1636_v63  ;;  %v529_v48 = vperm.slane %v1733_v6, 7  ;;  %v532_v3 = vperm.slane %v1738_v50, 0 }
  0x69   :  { %v502_v51 = vadd.f32 %v501_v24, %v499_v43  ;;  %v527_v52 = vmul.f32 %v526_v39, %v1655_v15  ;;  %v534_v53 = vperm.slane %v1738_v50, 1  ;;  %v537_v60 = vperm.slane %v1738_v50, 2  ;;  %2392 = sst [smem:[#allocation19_spill]] %s1916_s9 }
  0x6a   :  { %v1850_v55 = vadd.f32 %v484_v7, %v482_v41  ;;  %v516_v56 = vadd.f32 %v515_v38, %v513_v46  ;;  %v533_v33 = vmul.f32 %v532_v3, %v1591_v40  ;;  %v540_v6 = vperm.slane %v1738_v50, 3  ;;  %2393 = sst [smem:[#allocation20_spill]] %s1920_s10 }
  0x6b   :  { %v505_v57 = vadd.f32 %v504_v25, %v502_v51  ;;  %v535_v58 = vmul.f32 %v534_v53, %v1597_v42  ;;  %v538_v59 = vmul.f32 %v537_v60, %v1604_v47  ;;  %v543_v61 = vperm.slane %v1738_v50, 4  ;;  %2394 = sst [smem:[#allocation21_spill]] %s1925_s6 }
  0x6c   :  { %v519_v9 = vadd.f32 %v518_v45, %v516_v56  ;;  %v530_v12 = vmul.f32 %v529_v48, %v1664_v22  ;;  %v546_v4 = vperm.slane %v1738_v50, 5  ;;  %v549_v8 = vperm.slane %v1738_v50, 6  ;;  %s1931_s10 = sld [smem:[#allocation7 + $0x187]] }
  0x6d   :  { %v1866_v5 = vadd.f32 %v507_v36, %v505_v57  ;;  %v536_v7 = vadd.f32 %v535_v58, %v533_v33  ;;  %v541_v10 = vmul.f32 %v540_v6, %v1609_v49  ;;  %v544_v11 = vmul.f32 %v543_v61, %v1622_v54  ;;  %s1936_s9 = sld [smem:[#allocation7 + $0x200]] }
  0x6e   :  { %v522_v13 = vadd.f32 %v521_v62, %v519_v9  ;;  %v547_v14 = vmul.f32 %v546_v4, %v1636_v63  ;;  %v552_v18 = vperm.slane %v1738_v50, 7  ;;  %v555_v44 = vperm.slane %v1755_v27, 0  ;;  %s1941_s6 = sld [smem:[#allocation7 + $0x201]] }
  0x6f   :  { %v539_v17 = vadd.f32 %v538_v59, %v536_v7  ;;  %v550_v19 = vmul.f32 %v549_v8, %v1655_v15  ;;  %v557_v21 = vperm.slane %v1755_v27, 1  ;;  %v560_v20 = vperm.slane %v1755_v27, 2 }
  0x70   :  { %v525_v23 = vadd.f32 %v524_v2, %v522_v13  ;;  %v556_v24 = vmul.f32 %v555_v44, %v1591_v40  ;;  %v563_v25 = vperm.slane %v1755_v27, 3  ;;  %v566_v50 = vperm.slane %v1755_v27, 4 }
  0x71   :  { %v542_v26 = vadd.f32 %v541_v10, %v539_v17  ;;  %v558_v29 = vmul.f32 %v557_v21, %v1597_v42  ;;  %v561_v30 = vmul.f32 %v560_v20, %v1604_v47  ;;  %v569_v0 = vperm.slane %v1755_v27, 5 }
  0x72   :  { %v528_v31 = vadd.f32 %v527_v52, %v525_v23  ;;  %v553_v32 = vmul.f32 %v552_v18, %v1664_v22  ;;  %v564_v34 = vmul.f32 %v563_v25, %v1609_v49  ;;  %v572_v35 = vperm.slane %v1755_v27, 6  ;;  %2395 = sst [smem:[#allocation22_spill]] %s1931_s10 }
  0x73   :  { %v545_v36 = vadd.f32 %v544_v11, %v542_v26  ;;  %v559_v37 = vadd.f32 %v558_v29, %v556_v24  ;;  %v567_v38 = vmul.f32 %v566_v50, %v1622_v54  ;;  %v570_v39 = vmul.f32 %v569_v0, %v1636_v63  ;;  %s1946_s10 = sld [smem:[#allocation7 + $0x202]] }
  0x74   :  { %v1901_v41 = vadd.f32 %v530_v12, %v528_v31  ;;  %v575_v43 = vperm.slane %v1755_v27, 7  ;;  %v578_v45 = vperm.slane %v1757_v28, 0  ;;  %v580_v62 = vperm.slane %v1757_v28, 1 }
  0x75   :  { %v548_v46 = vadd.f32 %v547_v14, %v545_v36  ;;  %v562_v2 = vadd.f32 %v561_v30, %v559_v37  ;;  %v573_v48 = vmul.f32 %v572_v35, %v1655_v15  ;;  %v583_v3 = vperm.slane %v1757_v28, 2 }
  0x76   :  { %v579_v51 = vmul.f32 %v578_v45, %v1591_v40  ;;  %v581_v52 = vmul.f32 %v580_v62, %v1597_v42  ;;  %v586_v27 = vperm.slane %v1757_v28, 3  ;;  %v589_v53 = vperm.slane %v1757_v28, 4 }
  0x77   :  { %v551_v60 = vadd.f32 %v550_v19, %v548_v46  ;;  %v565_v56 = vadd.f32 %v564_v34, %v562_v2  ;;  %v584_v33 = vmul.f32 %v583_v3, %v1604_v47  ;;  %v592_v6 = vperm.slane %v1757_v28, 5 }
  0x78   :  { %v576_v40 = vmul.f32 %v575_v43, %v1664_v22  ;;  %v582_v57 = vadd.f32 %v581_v52, %v579_v51  ;;  %v587_v42 = vmul.f32 %v586_v27, %v1609_v49  ;;  %v595_v58 = vperm.slane %v1757_v28, 6 }
  0x79   :  { %v1927_v59 = vadd.f32 %v553_v32, %v551_v60  ;;  %v568_v61 = vadd.f32 %v567_v38, %v565_v56  ;;  %v590_v47 = vmul.f32 %v589_v53, %v1622_v54  ;;  %v593_v9 = vmul.f32 %v592_v6, %v1636_v63 }
  0x7a   :  { %v585_v12 = vadd.f32 %v584_v33, %v582_v57  ;;  %v598_v4 = vperm.slane %v1757_v28, 7  ;;  %v602_v49 = vstv %s1772_s24  ;;  %v605_v8 = vstv %s1778_s25  ;;  %s1950_s24 = sld [smem:[#allocation7 + $0x203]] }
  0x7b   :  { %v571_v7 = vadd.f32 %v570_v39, %v568_v61  ;;  %v596_v10 = vmul.f32 %v595_v58, %v1655_v15  ;;  %v603_v11 = vmul.f32 %v602_v49, %v1768_v1  ;;  %v606_v54 = vmul.f32 %v605_v8, %v1809_v16  ;;  %s1955_s25 = sld [smem:[#allocation7 + $0x204]] }
  0x7c   :  { %v588_v63 = vadd.f32 %v587_v42, %v585_v12  ;;  %v609_v13 = vstv %s1783_s26  ;;  %v613_v14 = vstv %s1788_s27  ;;  %v617_v18 = vstv %s1793_s28  ;;  %s1961_s26 = sld [smem:[#allocation7 + $0x205]] }
  0x7d   :  { %v574_v28 = vadd.f32 %v573_v48, %v571_v7  ;;  %v607_v44 = vadd.f32 %v606_v54, %v603_v11  ;;  %v610_v15 = vmul.f32 %v609_v13, %v1850_v55  ;;  %v614_v17 = vmul.f32 %v613_v14, %v1866_v5  ;;  %s1966_s27 = sld [smem:[#allocation7 + $0x206]] }
  0x7e   :  { %v591_v19 = vadd.f32 %v590_v47, %v588_v63  ;;  %v599_v21 = vmul.f32 %v598_v4, %v1664_v22  ;;  %v618_v20 = vmul.f32 %v617_v18, %v1901_v41  ;;  %v621_v23 = vstv %s1798_s29  ;;  %s1971_s28 = sld [smem:[#allocation7 + $0x207]] }
  0x7f   :  { %v1957_v24 = vadd.f32 %v576_v40, %v574_v28  ;;  %v611_v25 = vadd.f32 %v610_v15, %v607_v44  ;;  %v622_v50 = vmul.f32 %v621_v23, %v1927_v59  ;;  %v625_v26 = vstv %s1803_s30  ;;  %s1976_s29 = sld [smem:[#allocation7 + $0x280]] }
  0x80   :  { %v594_v29 = vadd.f32 %v593_v9, %v591_v19  ;;  %v633_v30 = vstv %s1814_s8  ;;  %v636_v0 = vstv %s1818_s2  ;;  %v640_v31 = vstv %s1824_s11  ;;  %s1980_s30 = sld [smem:[#allocation7 + $0x281]] }
  0x81   :  { %v615_v22 = vadd.f32 %v614_v17, %v611_v25  ;;  %v629_v32 = vstv %s1807_s7  ;;  %v634_v34 = vmul.f32 %v633_v30, %v1768_v1  ;;  %v637_v35 = vmul.f32 %v636_v0, %v1809_v16  ;;  %s1987_s7 = sld [smem:[#allocation7 + $0x282]] }
  0x82   :  { %v597_v36 = vadd.f32 %v596_v10, %v594_v29  ;;  %v641_v37 = vmul.f32 %v640_v31, %v1850_v55  ;;  %v644_v38 = vstv %s1828_s12  ;;  %v648_v39 = vstv %s1834_s4  ;;  %s1991_s8 = sld [smem:[#allocation7 + $0x283]] }
  0x83   :  { %v619_v43 = vadd.f32 %v618_v20, %v615_v22  ;;  %v626_v45 = vmul.f32 %v625_v26, %v1957_v24  ;;  %v638_v62 = vadd.f32 %v637_v35, %v634_v34  ;;  %v645_v46 = vmul.f32 %v644_v38, %v1866_v5  ;;  %s1997_s2 = sld [smem:[#allocation7 + $0x284]] }
  0x84   :  { %v1982_v2 = vadd.f32 %v599_v21, %v597_v36  ;;  %v649_v48 = vmul.f32 %v648_v39, %v1901_v41  ;;  %v652_v3 = vstv %s1838_s13  ;;  %v656_v51 = vstv %s1843_s0  ;;  %s2001_s11 = sld [smem:[#allocation7 + $0x285]] }
  0x85   :  { %v623_v52 = vadd.f32 %v622_v50, %v619_v43  ;;  %v642_v27 = vadd.f32 %v641_v37, %v638_v62  ;;  %v653_v53 = vmul.f32 %v652_v3, %v1927_v59  ;;  %v660_v60 = vstv %s1848_s14  ;;  %s2007_s12 = sld [smem:[#allocation7 + $0x286]] }
  0x86   :  { %v630_v56 = vmul.f32 %v629_v32, %v1982_v2  ;;  %v657_v33 = vmul.f32 %v656_v51, %v1957_v24  ;;  %v664_v6 = vstv %s1854_s15  ;;  %v667_v40 = vstv %s1859_s16  ;;  %s2012_s4 = sld [smem:[#allocation7 + $0x287]] }
  0x87   :  { %v627_v57 = vadd.f32 %v626_v45, %v623_v52  ;;  %v646_v42 = vadd.f32 %v645_v46, %v642_v27  ;;  %v665_v58 = vmul.f32 %v664_v6, %v1768_v1  ;;  %v668_v61 = vmul.f32 %v667_v40, %v1809_v16  ;;  %s2018_s13 = sld [smem:[#allocation7 + $0x300]] }
  0x88   :  { %v671_v47 = vstv %s1864_s17  ;;  %v675_v9 = vstv %s1870_s18  ;;  %v679_v12 = vstv %s1875_s19  ;;  %v683_v4 = vstv %s1880_s1  ;;  %s2396_s0 = sld [smem:[#allocation19_spill]] }
  0x89   :  { %v2009_v49 = vadd.f32 %v630_v56, %v627_v57  ;;  %v650_v8 = vadd.f32 %v649_v48, %v646_v42  ;;  %v669_v7 = vadd.f32 %v668_v61, %v665_v58  ;;  %v672_v10 = vmul.f32 %v671_v47, %v1850_v55  ;;  %s2397_s14 = sld [smem:[#allocation20_spill]] }
  0x8a   :  { %v661_v11 = vmul.f32 %v660_v60, %v1982_v2  ;;  %v676_v54 = vmul.f32 %v675_v9, %v1866_v5  ;;  %v680_v63 = vmul.f32 %v679_v12, %v1901_v41  ;;  %v687_v13 = vstv %s1885_s20  ;;  %s2022_s15 = sld [smem:[#allocation7 + $0x301]] }
  0x8b   :  { %v654_v14 = vadd.f32 %v653_v53, %v650_v8  ;;  %v673_v18 = vadd.f32 %v672_v10, %v669_v7  ;;  %v684_v28 = vmul.f32 %v683_v4, %v1927_v59  ;;  %v688_v44 = vmul.f32 %v687_v13, %v1957_v24  ;;  %s2028_s16 = sld [smem:[#allocation7 + $0x302]] }
  0x8c   :  { %v691_v15 = vstv %s1890_s21  ;;  %v695_v17 = vstv %s1895_s3  ;;  %v698_v19 = vstv %s1899_s5  ;;  %v702_v21 = vstv %s1906_s22  ;;  %s2398_s17 = sld [smem:[#allocation21_spill]] }
  0x8d   :  { %v658_v20 = vadd.f32 %v657_v33, %v654_v14  ;;  %v677_v23 = vadd.f32 %v676_v54, %v673_v18  ;;  %v696_v25 = vmul.f32 %v695_v17, %v1768_v1  ;;  %v699_v50 = vmul.f32 %v698_v19, %v1809_v16  ;;  %s2032_s18 = sld [smem:[#allocation7 + $0x303]] }
  0x8e   :  { %v703_v26 = vmul.f32 %v702_v21, %v1850_v55  ;;  %v706_v29 = vstv %s1910_s23  ;;  %v710_v30 = vstv %s2396_s0  ;;  %s2399_s19 = sld [smem:[#allocation22_spill]]  ;;  %v692_v35 = vmul.f32 %v691_v15, %v1982_v2 }
  0x8f   :  { %v714_v0 = vstv %s2397_s14  ;;  %s2038_s1 = sld [smem:[#allocation7 + $0x304]]  ;;  %v2040_v31 = vadd.f32 %v661_v11, %v658_v20  ;;  %v681_v22 = vadd.f32 %v680_v63, %v677_v23  ;;  %v700_v32 = vadd.f32 %v699_v50, %v696_v25 }
  0x90   :  { %v707_v34 = vmul.f32 %v706_v29, %v1866_v5  ;;  %s2043_s20 = sld [smem:[#allocation7 + $0x305]]  ;;  %v711_v36 = vmul.f32 %v710_v30, %v1901_v41  ;;  %v715_v37 = vmul.f32 %v714_v0, %v1927_v59  ;;  %v726_v46 = vstv %s1936_s9 }
  0x91   :  { %s2049_s21 = sld [smem:[#allocation7 + $0x306]]  ;;  %v685_v39 = vadd.f32 %v684_v28, %v681_v22  ;;  %v704_v43 = vadd.f32 %v703_v26, %v700_v32  ;;  %v729_v48 = vstv %s1941_s6  ;;  %v733_v3 = vstv %s1946_s10 }
  0x92   :  { %v718_v38 = vstv %s2398_s17  ;;  %s2053_s3 = sld [smem:[#allocation7 + $0x307]]  ;;  %v737_v51 = vstv %s1950_s24  ;;  %v727_v53 = vmul.f32 %v726_v46, %v1768_v1  ;;  %v730_v60 = vmul.f32 %v729_v48, %v1809_v16 }
  0x93   :  { %v719_v45 = vmul.f32 %v718_v38, %v1957_v24  ;;  %s2059_s5 = sld [smem:[#allocation7 + $0x380]]  ;;  %v689_v52 = vadd.f32 %v688_v44, %v685_v39  ;;  %v708_v27 = vadd.f32 %v707_v34, %v704_v43  ;;  %v734_v33 = vmul.f32 %v733_v3, %v1850_v55 }
  0x94   :  { %v722_v62 = vstv %s2399_s19  ;;  %s2063_s22 = sld [smem:[#allocation7 + $0x381]]  ;;  %v741_v6 = vstv %s1955_s25  ;;  %v745_v40 = vstv %s1961_s26  ;;  %v731_v58 = vadd.f32 %v730_v60, %v727_v53 }
  0x95   :  { %v723_v56 = vmul.f32 %v722_v62, %v1982_v2  ;;  %s2069_s6 = sld [smem:[#allocation7 + $0x382]]  ;;  %v2071_v57 = vadd.f32 %v692_v35, %v689_v52  ;;  %v712_v42 = vadd.f32 %v711_v36, %v708_v27  ;;  %v738_v61 = vmul.f32 %v737_v51, %v1866_v5 }
  0x96   :  { %s2074_s9 = sld [smem:[#allocation7 + $0x383]]  ;;  %v742_v47 = vmul.f32 %v741_v6, %v1901_v41  ;;  %v746_v9 = vmul.f32 %v745_v40, %v1927_v59  ;;  %v749_v12 = vstv %s1966_s27  ;;  %v757_v4 = vstv %s1976_s29 }
  0x97   :  { %s2080_s10 = sld [smem:[#allocation7 + $0x384]]  ;;  %v716_v8 = vadd.f32 %v715_v37, %v712_v42  ;;  %v735_v7 = vadd.f32 %v734_v33, %v731_v58  ;;  %v750_v10 = vmul.f32 %v749_v12, %v1957_v24  ;;  %v753_v11 = vstv %s1971_s28 }
  0x98   :  { %s2084_s23 = sld [smem:[#allocation7 + $0x385]]  ;;  %v758_v54 = vmul.f32 %v757_v4, %v1768_v1  ;;  %v760_v63 = vstv %s1980_s30  ;;  %v764_v13 = vstv %s1987_s7  ;;  %v768_v14 = vstv %s1991_s8 }
  0x99   :  { %s2090_s24 = sld [smem:[#allocation7 + $0x386]]  ;;  %v720_v18 = vadd.f32 %v719_v45, %v716_v8  ;;  %v739_v28 = vadd.f32 %v738_v61, %v735_v7  ;;  %v761_v44 = vmul.f32 %v760_v63, %v1809_v16  ;;  %v765_v15 = vmul.f32 %v764_v13, %v1850_v55 }
  0x9a   :  { %s2094_s25 = sld [smem:[#allocation7 + $0x387]]  ;;  %v754_v17 = vmul.f32 %v753_v11, %v1982_v2  ;;  %v772_v19 = vstv %s1997_s2  ;;  %v776_v21 = vstv %s2001_s11  ;;  %v780_v20 = vstv %s2007_s12 }
  0x9b   :  { %s2100_s26 = sld [smem:[#allocation9]]  ;;  %v2102_v23 = vadd.f32 %v723_v56, %v720_v18  ;;  %v743_v25 = vadd.f32 %v742_v47, %v739_v28  ;;  %v762_v50 = vadd.f32 %v761_v44, %v758_v54  ;;  %v769_v26 = vmul.f32 %v768_v14, %v1866_v5  ;;  %v849_v14 = vld [vmem:[#allocation10] sm:$0xff]  ;;  %v852_v18 = vld [vmem:[#allocation10 + $0x8] sm:$0xff] }
  0x9c   :  { %s2105_s27 = sld [smem:[#allocation9 + $0x1]]  ;;  %v773_v29 = vmul.f32 %v772_v19, %v1901_v41  ;;  %v777_v30 = vmul.f32 %v776_v21, %v1927_v59  ;;  %v781_v0 = vmul.f32 %v780_v20, %v1957_v24  ;;  %v788_v22 = vstv %s2018_s13 }
  0x9d   :  { %s2111_s28 = sld [smem:[#allocation9 + $0x2]]  ;;  %v747_v32 = vadd.f32 %v746_v9, %v743_v25  ;;  %v766_v34 = vadd.f32 %v765_v15, %v762_v50  ;;  %v784_v35 = vstv %s2012_s4  ;;  %v789_v36 = vmul.f32 %v788_v22, %v1768_v1  ;;  %v855_v15 = vld [vmem:[#allocation10 + $0x10] sm:$0xff]  ;;  %v861_v25 = vld [vmem:[#allocation10 + $0x20] sm:$0xff]  ;;  %v864_v50 = vld [vmem:[#allocation10 + $0x28] sm:$0xff] }
  0x9e   :  { %s2115_s29 = sld [smem:[#allocation9 + $0x3]]  ;;  %v791_v37 = vstv %s2022_s15  ;;  %v795_v38 = vstv %s2028_s16  ;;  %v799_v39 = vstv %s2032_s18  ;;  %v803_v43 = vstv %s2038_s1 }
  0x9f   :  { %s2121_s30 = sld [smem:[#allocation9 + $0x4]]  ;;  %v751_v45 = vadd.f32 %v750_v10, %v747_v32  ;;  %v770_v62 = vadd.f32 %v769_v26, %v766_v34  ;;  %v792_v46 = vmul.f32 %v791_v37, %v1809_v16  ;;  %v796_v48 = vmul.f32 %v795_v38, %v1850_v55  ;;  %v867_v37 = vld [vmem:[#allocation10 + $0x30] sm:$0xff] }
  0xa0   :  { %s2125_s7 = sld [smem:[#allocation9 + $0x5]]  ;;  %v785_v3 = vmul.f32 %v784_v35, %v1982_v2  ;;  %v800_v51 = vmul.f32 %v799_v39, %v1866_v5  ;;  %v807_v52 = vstv %s2043_s20  ;;  %v811_v27 = vstv %s2049_s21 }
  0xa1   :  { %s2131_s8 = sld [smem:[#allocation9 + $0x6]]  ;;  %v755_v53 = vadd.f32 %v754_v17, %v751_v45  ;;  %v774_v60 = vadd.f32 %v773_v29, %v770_v62  ;;  %v793_v56 = vadd.f32 %v792_v46, %v789_v36  ;;  %v804_v33 = vmul.f32 %v803_v43, %v1901_v41  ;;  %v858_v17 = vld [vmem:[#allocation10 + $0x18] sm:$0xff] }
  0xa2   :  { %s2134_s2 = sld [smem:[#allocation9 + $0x7]]  ;;  %v808_v6 = vmul.f32 %v807_v52, %v1927_v59  ;;  %v815_v40 = vstv %s2053_s3  ;;  %v819_v42 = vstv %s2059_s5  ;;  %v822_v58 = vstv %s2063_s22 }
  0xa3   :  { %s2140_s11 = sld [smem:[#allocation9 + $0x80]]  ;;  %v778_v61 = vadd.f32 %v777_v30, %v774_v60  ;;  %v797_v47 = vadd.f32 %v796_v48, %v793_v56  ;;  %v812_v9 = vmul.f32 %v811_v27, %v1957_v24  ;;  %v820_v12 = vmul.f32 %v819_v42, %v1768_v1  ;;  %v870_v42 = vld [vmem:[#allocation10 + $0x38] sm:$0xff] }
  0xa4   :  { %s2144_s12 = sld [smem:[#allocation9 + $0x81]]  ;;  %v823_v4 = vmul.f32 %v822_v58, %v1809_v16  ;;  %v826_v8 = vstv %s2069_s6  ;;  %v830_v7 = vstv %s2074_s9  ;;  %v834_v10 = vstv %s2080_s10 }
  0xa5   :  { %s2150_s4 = sld [smem:[#allocation9 + $0x82]]  ;;  %v782_v11 = vadd.f32 %v781_v0, %v778_v61  ;;  %v801_v54 = vadd.f32 %v800_v51, %v797_v47  ;;  %v816_v63 = vmul.f32 %v815_v40, %v1982_v2  ;;  %v827_v13 = vmul.f32 %v826_v8, %v1850_v55 }
  0xa6   :  { %s2154_s13 = sld [smem:[#allocation9 + $0x83]]  ;;  %v824_v1 = vadd.f32 %v823_v4, %v820_v12  ;;  %v831_v28 = vmul.f32 %v830_v7, %v1866_v5  ;;  %v838_v44 = vstv %s2084_s23  ;;  %v842_v16 = vstv %s2090_s24 }
  0xa7   :  { %s2159_s0 = sld [smem:[#allocation9 + $0x84]]  ;;  %v786_v19 = vadd.f32 %v785_v3, %v782_v11  ;;  %v805_v21 = vadd.f32 %v804_v33, %v801_v54  ;;  %v835_v20 = vmul.f32 %v834_v10, %v1901_v41  ;;  %v839_v55 = vmul.f32 %v838_v44, %v1927_v59 }
  0xa8   :  { %s2163_s14 = sld [smem:[#allocation9 + $0x85]]  ;;  %v828_v26 = vadd.f32 %v827_v13, %v824_v1  ;;  %v843_v5 = vmul.f32 %v842_v16, %v1957_v24  ;;  %v2167_v29 = vadd.f32 %v849_v14, %v2009_v49  ;;  %v2170_v30 = vadd.f32 %v852_v18, %v2040_v31 }
  0xa9   :  { %s2172_s15 = sld [smem:[#allocation9 + $0x86]]  ;;  %v809_v41 = vadd.f32 %v808_v6, %v805_v21  ;;  %v846_v59 = vstv %s2094_s25  ;;  %v2176_v0 = vadd.f32 %v855_v15, %v2071_v57  ;;  %v2179_v22 = vadd.f32 %v858_v17, %v2102_v23 }
  0xaa   :  { %s2181_s16 = sld [smem:[#allocation9 + $0x87]]  ;;  %v832_v24 = vadd.f32 %v831_v28, %v828_v26  ;;  %v2183_v49 = vadd.f32 %v861_v25, %v755_v53  ;;  %v2185_v32 = vadd.f32 %v864_v50, %v786_v19  ;;  %v873_v31 = vstv %s2100_s26 }
  0xab   :  { %s2188_s17 = sld [smem:[#allocation9 + $0x100]]  ;;  %v813_v34 = vadd.f32 %v812_v9, %v809_v41  ;;  %v874_v57 = vmul.f32 %v873_v31, %v2167_v29  ;;  %v876_v35 = vstv %s2105_s27  ;;  %v880_v36 = vstv %s2111_s28  ;;  %s1461_s27 = smov [#allocation13]  }
  0xac   :  { %s2193_s18 = sld [smem:[#allocation9 + $0x101]]  ;;  %v836_v23 = vadd.f32 %v835_v20, %v832_v24  ;;  %v877_v38 = vmul.f32 %v876_v35, %v2170_v30  ;;  %v881_v39 = vmul.f32 %v880_v36, %v2176_v0  ;;  %v884_v43 = vstv %s2115_s29  ;;  %s1119_s28 = sshll.u32 %s1461_s27, 4  ;;  %s1120_s28 = int_to_ptr.vmem [resolvable:$true] %s1119_s28 }
  0xad   :  { %s2198_s19 = sld [smem:[#allocation9 + $0x102]]  ;;  %v817_v45 = vadd.f32 %v816_v63, %v813_v34  ;;  %v888_v62 = vstv %s2121_s30  ;;  %v892_v46 = vstv %s2125_s7  ;;  %v847_v3 = vmul.f32 %v846_v59, %v1982_v2 }
  0xae   :  { %s2202_s1 = sld [smem:[#allocation9 + $0x103]]  ;;  %v840_v48 = vadd.f32 %v839_v55, %v836_v23  ;;  %v878_v51 = vadd.f32 %v877_v38, %v874_v57  ;;  %v885_v52 = vmul.f32 %v884_v43, %v2179_v22  ;;  %v889_v53 = vmul.f32 %v888_v62, %v2183_v49 }
  0xaf   :  { %s2206_s20 = sld [smem:[#allocation9 + $0x104]]  ;;  %v2208_v27 = vadd.f32 %v867_v37, %v817_v45  ;;  %v893_v60 = vmul.f32 %v892_v46, %v2185_v32  ;;  %v904_v56 = vstv %s2140_s11  ;;  %v907_v40 = vstv %s2144_s12  ;;  %s2402_s11 = smov 128  }
  0xb0   :  { %s2213_s21 = sld [smem:[#allocation9 + $0x105]]  ;;  %v844_v33 = vadd.f32 %v843_v5, %v840_v48  ;;  %v882_v6 = vadd.f32 %v881_v39, %v878_v51  ;;  %v905_v2 = vmul.f32 %v904_v56, %v2167_v29  ;;  %v896_v58 = vstv %s2131_s8 }
  0xb1   :  { %s2217_s3 = sld [smem:[#allocation9 + $0x106]]  ;;  %v908_v61 = vmul.f32 %v907_v40, %v2170_v30  ;;  %v911_v47 = vstv %s2150_s4  ;;  %v915_v9 = vstv %s2154_s13  ;;  %v900_v8 = vstv %s2134_s2  ;;  %s2401_s2 = smov 8  }
  0xb2   :  { %s2223_s5 = sld [smem:[#allocation9 + $0x107]]  ;;  %v848_v12 = vadd.f32 %v847_v3, %v844_v33  ;;  %v886_v4 = vadd.f32 %v885_v52, %v882_v6  ;;  %v912_v7 = vmul.f32 %v911_v47, %v2176_v0  ;;  %v916_v11 = vmul.f32 %v915_v9, %v2179_v22 }
  0xb3   :  { %s2227_s22 = sld [smem:[#allocation9 + $0x180]]  ;;  %v909_v10 = vadd.f32 %v908_v61, %v905_v2  ;;  %v919_v54 = vstv %s2159_s0  ;;  %v923_v63 = vstv %s2163_s14  ;;  %v897_v18 = vmul.f32 %v896_v58, %v2208_v27 }
  0xb4   :  { %s2232_s6 = sld [smem:[#allocation9 + $0x181]]  ;;  %v2234_v13 = vadd.f32 %v870_v42, %v848_v12  ;;  %v890_v14 = vadd.f32 %v889_v53, %v886_v4  ;;  %v927_v1 = vstv %s2172_s15  ;;  %v920_v44 = vmul.f32 %v919_v54, %v2183_v49 }
  0xb5   :  { %s2238_s9 = sld [smem:[#allocation9 + $0x182]]  ;;  %v913_v28 = vadd.f32 %v912_v7, %v909_v10  ;;  %v924_v16 = vmul.f32 %v923_v63, %v2185_v32  ;;  %v935_v15 = vstv %s2188_s17  ;;  %v931_v21 = vstv %s2181_s16 }
  0xb6   :  { %s2243_s10 = sld [smem:[#allocation9 + $0x183]]  ;;  %v894_v17 = vadd.f32 %v893_v60, %v890_v14  ;;  %v901_v19 = vmul.f32 %v900_v8, %v2234_v13  ;;  %v936_v20 = vmul.f32 %v935_v15, %v2167_v29  ;;  %v938_v25 = vstv %s2193_s18 }
  0xb7   :  { %s2248_s23 = sld [smem:[#allocation9 + $0x184]]  ;;  %v917_v55 = vadd.f32 %v916_v11, %v913_v28  ;;  %v942_v50 = vstv %s2198_s19  ;;  %v946_v26 = vstv %s2202_s1  ;;  %v928_v41 = vmul.f32 %v927_v1, %v2208_v27  ;;  %v2299_v28 = vld [vmem:[#allocation13 + $0x8] sm:$0xff] }
  0xb8   :  { %s2253_s24 = sld [smem:[#allocation9 + $0x185]]  ;;  %v898_v5 = vadd.f32 %v897_v18, %v894_v17  ;;  %v939_v59 = vmul.f32 %v938_v25, %v2170_v30  ;;  %v943_v24 = vmul.f32 %v942_v50, %v2176_v0  ;;  %v932_v34 = vmul.f32 %v931_v21, %v2234_v13  ;;  %v2295_v18 = vld [vmem:[#allocation13] sm:$0xff]  ;;  %v2307_v21 = vld [vmem:[#allocation13 + $0x18] sm:$0xff] }
  0xb9   :  { %s2258_s25 = sld [smem:[#allocation9 + $0x186]]  ;;  %v921_v31 = vadd.f32 %v920_v44, %v917_v55  ;;  %v950_v57 = vstv %s2206_s20  ;;  %v954_v35 = vstv %s2213_s21  ;;  %v947_v37 = vmul.f32 %v946_v26, %v2179_v22 }
  0xba   :  { %s2263_s26 = sld [smem:[#allocation9 + $0x187]]  ;;  %v2265_v36 = vadd.f32 %v901_v19, %v898_v5  ;;  %v940_v23 = vadd.f32 %v939_v59, %v936_v20  ;;  %v958_v38 = vstv %s2217_s3  ;;  %v951_v43 = vmul.f32 %v950_v57, %v2183_v49  ;;  %v2315_v59 = vld [vmem:[#allocation13 + $0x20] sm:$0xff]  ;;  %v2320_v57 = vld [vmem:[#allocation13 + $0x28] sm:$0xff] }
  0xbb   :  { %v925_v39 = vadd.f32 %v924_v16, %v921_v31  ;;  %v955_v45 = vmul.f32 %v954_v35, %v2185_v32  ;;  %v966_v62 = vstv %s2227_s22  ;;  %v962_v48 = vstv %s2223_s5  ;;  %v2302_v16 = vld [vmem:[#allocation13 + $0x10] sm:$0xff]  ;;  %s2400_s7 = sld [smem:[#allocation23_spill]] }
  0xbc   :  { %v944_v46 = vadd.f32 %v943_v24, %v940_v23  ;;  %v967_v3 = vmul.f32 %v966_v62, %v2167_v29  ;;  %v969_v51 = vstv %s2232_s6  ;;  %v973_v60 = vstv %s2238_s9  ;;  %v2328_v62 = vld [vmem:[#allocation13 + $0x30] sm:$0xff] }
  0xbd   :  { %v929_v52 = vadd.f32 %v928_v41, %v925_v39  ;;  %v970_v53 = vmul.f32 %v969_v51, %v2170_v30  ;;  %v977_v56 = vstv %s2243_s10  ;;  %v959_v6 = vmul.f32 %v958_v38, %v2208_v27 }
  0xbe   :  { %v948_v33 = vadd.f32 %v947_v37, %v944_v46  ;;  %v974_v2 = vmul.f32 %v973_v60, %v2176_v0  ;;  %v981_v40 = vstv %s2248_s23  ;;  %v978_v61 = vmul.f32 %v977_v56, %v2179_v22 }
  0xbf   :  { %v2281_v42 = vadd.f32 %v932_v34, %v929_v52  ;;  %v971_v58 = vadd.f32 %v970_v53, %v967_v3  ;;  %v985_v29 = vstv %s2253_s24  ;;  %v963_v9 = vmul.f32 %v962_v48, %v2234_v13  ;;  %v2331_v48 = vld [vmem:[#allocation13 + $0x38] sm:$0xff] }
  0xc0   :  { %v952_v47 = vadd.f32 %v951_v43, %v948_v33  ;;  %v982_v30 = vmul.f32 %v981_v40, %v2183_v49  ;;  %v989_v12 = vstv %s2258_s25  ;;  %v986_v8 = vmul.f32 %v985_v29, %v2185_v32 }
  0xc1   :  { %v975_v4 = vadd.f32 %v974_v2, %v971_v58  ;;  %v993_v7 = vstv %s2263_s26  ;;  %v996_v10 = vperm.slane %v2265_v36, 0  ;;  %v998_v11 = vperm.slane %v2265_v36, 1  ;;  %s1121_s8 = sshll.u32 %s2400_s7, 4  ;;  %s1122_s8 = int_to_ptr.hbm [resolvable:$true] %s1121_s8 }
  0xc2   :  { %v956_v0 = vadd.f32 %v955_v45, %v952_v47  ;;  %v1001_v54 = vperm.slane %v2265_v36, 2  ;;  %v1004_v22 = vperm.slane %v2265_v36, 3  ;;  %v990_v14 = vmul.f32 %v989_v12, %v2208_v27 }
  0xc3   :  { %v979_v63 = vadd.f32 %v978_v61, %v975_v4  ;;  %v997_v49 = vmul.f32 %v2295_v18, %v996_v10  ;;  %v1007_v1 = vperm.slane %v2265_v36, 4  ;;  %v999_v44 = vmul.f32 %v2299_v28, %v998_v11 }
  0xc4   :  { %v960_v32 = vadd.f32 %v959_v6, %v956_v0  ;;  %v1002_v15 = vmul.f32 %v2302_v16, %v1001_v54  ;;  %v1010_v17 = vperm.slane %v2265_v36, 5  ;;  %v994_v27 = vmul.f32 %v993_v7, %v2234_v13 }
  0xc5   :  { %v983_v19 = vadd.f32 %v982_v30, %v979_v63  ;;  %v1005_v20 = vmul.f32 %v2307_v21, %v1004_v22  ;;  %v1013_v55 = vperm.slane %v2265_v36, 6  ;;  %v1000_v50 = vadd.f32 %v999_v44, %v997_v49 }
  0xc6   :  { %v2311_v25 = vadd.f32 %v963_v9, %v960_v32  ;;  %v1016_v26 = vperm.slane %v2265_v36, 7  ;;  %v1019_v5 = vperm.slane %v2281_v42, 0  ;;  %v1008_v24 = vmul.f32 %v2315_v59, %v1007_v1 }
  0xc7   :  { %v987_v41 = vadd.f32 %v986_v8, %v983_v19  ;;  %v1021_v13 = vperm.slane %v2281_v42, 1  ;;  %v1024_v31 = vperm.slane %v2281_v42, 2  ;;  %v1003_v34 = vadd.f32 %v1002_v15, %v1000_v50 }
  0xc8   :  { %v1011_v35 = vmul.f32 %v2320_v57, %v1010_v17  ;;  %v1020_v23 = vmul.f32 %v2295_v18, %v1019_v5  ;;  %v1027_v36 = vperm.slane %v2281_v42, 3  ;;  %v1030_v43 = vperm.slane %v2281_v42, 4 }
  0xc9   :  { %v991_v37 = vadd.f32 %v990_v14, %v987_v41  ;;  %v1022_v38 = vmul.f32 %v2299_v28, %v1021_v13  ;;  %v1025_v39 = vmul.f32 %v2302_v16, %v1024_v31  ;;  %v1006_v45 = vadd.f32 %v1005_v20, %v1003_v34  ;;  %v1088_v34 = vld [vmem:[#allocation12] sm:$0xff] }
  0xca   :  { %v1014_v46 = vmul.f32 %v2328_v62, %v1013_v55  ;;  %v1017_v3 = vmul.f32 %v2331_v48, %v1016_v26  ;;  %v1033_v51 = vperm.slane %v2281_v42, 5  ;;  %v1028_v60 = vmul.f32 %v2307_v21, %v1027_v36 }
  0xcb   :  { %v2335_v52 = vadd.f32 %v994_v27, %v991_v37  ;;  %v1023_v53 = vadd.f32 %v1022_v38, %v1020_v23  ;;  %v1036_v56 = vperm.slane %v2281_v42, 6  ;;  %v1009_v33 = vadd.f32 %v1008_v24, %v1006_v45  ;;  %v1095_v37 = vld [vmem:[#allocation12 + $0x8] sm:$0xff] }
  0xcc   :  { %v1031_v6 = vmul.f32 %v2315_v59, %v1030_v43  ;;  %v1039_v2 = vperm.slane %v2281_v42, 7  ;;  %v1042_v40 = vperm.slane %v2311_v25, 0  ;;  %v1034_v61 = vmul.f32 %v2320_v57, %v1033_v51 }
  0xcd   :  { %v1026_v58 = vadd.f32 %v1025_v39, %v1023_v53  ;;  %v1044_v29 = vperm.slane %v2311_v25, 1  ;;  %v1047_v47 = vperm.slane %v2311_v25, 2  ;;  %v1012_v9 = vadd.f32 %v1011_v35, %v1009_v33  ;;  %v1090_v39 = vld [vmem:[#allocation2 + $0x40] sm:$0xff] }
  0xce   :  { %v1043_v30 = vmul.f32 %v2295_v18, %v1042_v40  ;;  %v1050_v12 = vperm.slane %v2311_v25, 3  ;;  %v1053_v4 = vperm.slane %v2311_v25, 4  ;;  %v1056_v10 = vperm.slane %v2311_v25, 5 }
  0xcf   :  { %v1029_v8 = vadd.f32 %v1028_v60, %v1026_v58  ;;  %v1045_v7 = vmul.f32 %v2299_v28, %v1044_v29  ;;  %v1048_v42 = vmul.f32 %v2302_v16, %v1047_v47  ;;  %v1015_v0 = vadd.f32 %v1014_v46, %v1012_v9  ;;  %v1104_v9 = vld [vmem:[#allocation2 + $0x50] sm:$0xff] }
  0xd0   :  { %v1037_v11 = vmul.f32 %v2328_v62, %v1036_v56  ;;  %v1040_v54 = vmul.f32 %v2331_v48, %v1039_v2  ;;  %v1051_v14 = vmul.f32 %v2307_v21, %v1050_v12  ;;  %v1054_v49 = vmul.f32 %v2315_v59, %v1053_v4 }
  0xd1   :  { %v1032_v22 = vadd.f32 %v1031_v6, %v1029_v8  ;;  %v1046_v63 = vadd.f32 %v1045_v7, %v1043_v30  ;;  %v1057_v1 = vmul.f32 %v2320_v57, %v1056_v10  ;;  %v1059_v32 = vperm.slane %v2311_v25, 6 }
  0xd2   :  { %v1065_v44 = vperm.slane %v2335_v52, 0  ;;  %v1067_v15 = vperm.slane %v2335_v52, 1  ;;  %v1018_v17 = vadd.f32 %v1017_v3, %v1015_v0  ;;  %v1070_v20 = vperm.slane %v2335_v52, 2  ;;  %v1097_v3 = vld [vmem:[#allocation2 + $0x48] sm:$0xff] }
  0xd3   :  { %v1035_v19 = vadd.f32 %v1034_v61, %v1032_v22  ;;  %v1049_v27 = vadd.f32 %v1048_v42, %v1046_v63  ;;  %v1073_v26 = vperm.slane %v2335_v52, 3  ;;  %v1076_v5 = vperm.slane %v2335_v52, 4 }
  0xd4   :  { %v1066_v55 = vmul.f32 %v2295_v18, %v1065_v44  ;;  %v1068_v50 = vmul.f32 %v2299_v28, %v1067_v15  ;;  %v1062_v13 = vperm.slane %v2311_v25, 7  ;;  %v1071_v31 = vmul.f32 %v2302_v16, %v1070_v20 }
  0xd5   :  { %v1038_v41 = vadd.f32 %v1037_v11, %v1035_v19  ;;  %v1052_v24 = vadd.f32 %v1051_v14, %v1049_v27  ;;  %v1074_v23 = vmul.f32 %v2307_v21, %v1073_v26  ;;  %v1079_v36 = vperm.slane %v2335_v52, 5 }
  0xd6   :  { %v1069_v35 = vadd.f32 %v1068_v50, %v1066_v55  ;;  %v1060_v28 = vmul.f32 %v2328_v62, %v1059_v32  ;;  %v1077_v45 = vmul.f32 %v2315_v59, %v1076_v5  ;;  %v1082_v46 = vperm.slane %v2335_v52, 6  ;;  %v1102_v59 = vld [vmem:[#allocation12 + $0x10] sm:$0xff] }
  0xd7   :  { %v1041_v18 = vadd.f32 %v1040_v54, %v1038_v41  ;;  %v1055_v38 = vadd.f32 %v1054_v49, %v1052_v24  ;;  %v1089_v25 = vadd.f32 %v1088_v34, %v1018_v17  ;;  %v1063_v51 = vmul.f32 %v2331_v48, %v1062_v13 }
  0xd8   :  { %v1072_v43 = vadd.f32 %v1071_v31, %v1069_v35  ;;  %v1080_v60 = vmul.f32 %v2320_v57, %v1079_v36  ;;  %v1085_v56 = vperm.slane %v2335_v52, 7  ;;  %v1083_v58 = vmul.f32 %v2328_v62, %v1082_v46  ;;  %v1109_v57 = vld [vmem:[#allocation12 + $0x18] sm:$0xff] }
  0xd9   :  { %v1058_v16 = vadd.f32 %v1057_v1, %v1055_v38  ;;  %v1096_v53 = vadd.f32 %v1095_v37, %v1041_v18  ;;  %v1091_v33 = vadd.f32 %v1090_v39, %v1089_v25  ;;  %v1111_v52 = vld [vmem:[#allocation2 + $0x58] sm:$0xff] }
  0xda   :  { %v1075_v21 = vadd.f32 %v1074_v23, %v1072_v43  ;;  %v1086_v47 = vmul.f32 %v2331_v48, %v1085_v56 }
  0xdb   :  { %v1061_v6 = vadd.f32 %v1060_v28, %v1058_v16  ;;  %v1098_v2 = vadd.f32 %v1097_v3, %v1096_v53  ;;  %1093 = vst [vmem:[#allocation13 + $0x40] sm:$0xff] %v1091_v33 }
  0xdc   :  { %v1078_v40 = vadd.f32 %v1077_v45, %v1075_v21 }
  0xdd   :  { %v1064_v61 = vadd.f32 %v1063_v51, %v1061_v6  ;;  %1100 = vst [vmem:[#allocation13 + $0x48] sm:$0xff] %v1098_v2 }
  0xde   :  { %v1081_v29 = vadd.f32 %v1080_v60, %v1078_v40 }
  0xdf   :  { %v1103_v30 = vadd.f32 %v1102_v59, %v1064_v61 }
  0xe0   :  { %v1084_v12 = vadd.f32 %v1083_v58, %v1081_v29 }
  0xe1   :  { %v1105_v4 = vadd.f32 %v1104_v9, %v1103_v30 }
  0xe2   :  { %v1087_v8 = vadd.f32 %v1086_v47, %v1084_v12 }
  0xe3   :  { %1107 = vst [vmem:[#allocation13 + $0x50] sm:$0xff] %v1105_v4 }
  0xe4   :  { %v1110_v62 = vadd.f32 %v1109_v57, %v1087_v8 }
  0xe6   :  { %v1112_v7 = vadd.f32 %v1111_v52, %v1110_v62 }
  0xe8   :  { %1114 = vst [vmem:[#allocation13 + $0x58] sm:$0xff] %v1112_v7 }
  0xe9   :  { %1127 = dma.vmem_to_hbm [thread:$0]  %s1120_s28, 1536, %s1122_s8, [#allocation4], %s2402_s11, %s2402_s11, %s2401_s2  }
  0xea   :  { %1451 = dma.done.wait [#allocation4], 1536  }
  0xeb   :  { %1452 = vsyncadd [#allocation4], 4294965760 }
  0xec   :  { %1132 = vsyncpa [#allocation3], 1 }
  0xed   :  { %1133 = vsyncpa [#allocation11], 1 }
  0xee   :  { %1134 = vsyncpa [#allocation4], 1 }
  0xef   :  { %1135 = vsyncpa [#allocation5], 1 }
  0xf0   :  { %1136 = vsyncpa [#allocation8], 1 }

</bundles_post_ra>
